<compile_context>
chip_gen: v7x
topology: tpu7x:2x2x1
jax: 0.10.0
libtpu: 0.0.40
codegen_flags: <defaults>
</compile_context>

<pallas_src>
import functools

import jax
import jax.numpy as jnp
import numpy as np
from jax.experimental import pallas as pl
from jax.experimental.pallas import tpu as pltpu

LANE = 128      # lane quantum (last dim)
SUBLANE = 8     # sublane quantum (second-to-last dim)


def _round_up(x, m):
    return (x + m - 1) // m * m


def _stage(src_ref, w_ref, s_ref, b_ref, H, W):
    """One fused (3x3 'same' conv + folded BN + ReLU) stage.

    src_ref: (H+2, Wp, Cs)  zero-padded activations in VMEM (compute dtype);
                            Wp is a multiple of 8, border rows/cols are zero.
    w_ref  : (3*Cs, 3*Cp)   merged weights; row = kh*Cs + ci, col = kw*Cp + co.
    s_ref  : (1, Cp)        folded BN scale (f32)
    b_ref  : (1, Cp)        folded BN bias  (f32)
    returns (H, W, Cp) float32
    """
    _, Wp, Cs = src_ref.shape
    Cp = s_ref.shape[-1]

    # kh taps: three accumulated MXU matmuls over sublane-ALIGNED row-offset
    # views (no patch matrix is materialized).  f32 accumulation on the MXU.
    y = None
    for kh in range(3):
        p = src_ref[kh:kh + H, :, :].reshape(H * Wp, Cs)
        t = jnp.dot(p, w_ref[kh * Cs:(kh + 1) * Cs, :],
                    preferred_element_type=jnp.float32)
        y = t if y is None else y + t
    y = y.reshape(H, Wp, 3 * Cp)

    # Combine kw taps: out[h, w] = y[h, w, kw0] + y[h, w+1, kw1] + y[h, w+2, kw2]
    acc = (y[:, 0:W, 0:Cp]
           + y[:, 1:W + 1, Cp:2 * Cp]
           + y[:, 2:W + 2, 2 * Cp:3 * Cp])

    acc = acc * s_ref[0] + b_ref[0]          # folded BatchNorm (inference)
    return jnp.maximum(acc, 0.0)             # ReLU


def _conv_block_kernel(x_ref, w1_ref, s1_ref, b1_ref, w2_ref, s2_ref, b2_ref,
                       o_ref, xpad_ref, midpad_ref):
    """Fused ConvBlock: (pad->conv->BN->ReLU) x 2, intermediate kept in VMEM.

    x_ref     : (1, H, W, Cin)      unpadded input tile (one batch element)
    w1_ref    : (3*Cin_p, 3*C1_p)   merged stage-1 weights (compute dtype)
    w2_ref    : (3*C1_p, 3*C2_p)    merged stage-2 weights (compute dtype)
    s*/b*     : (1, C*_p)           folded BN scale / bias (f32, padded lanes 0)
    o_ref     : (1, H, W, Cout)     output (Cout = real c2 or padded c2p)
    xpad_ref  : (H+2, Wp, Cin_p)    VMEM scratch, zero-padded stage-1 input
    midpad_ref: (H+2, Wp, C1_p)     VMEM scratch, zero-padded stage-1 output
    """
    _, H, W, cin = x_ref.shape

    # One-time memset of both padded slabs: the halo borders and the padded
    # channel lanes are never written afterwards, and the interiors are fully
    # rewritten every iteration.  Scratch persists across grid iterations and
    # the batch axis is "arbitrary" (sequential on one core), so guarding on
    # program_id(0)==0 is safe.  Relies on padded weight rows/cols and padded
    # scale/bias lanes being exactly zero (checked host-side).
    @pl.when(pl.program_id(0) == 0)
    def _init():
        xpad_ref[...] = jnp.zeros_like(xpad_ref)
        midpad_ref[...] = jnp.zeros_like(midpad_ref)

    # Stage-1 input: drop the real image into the slab interior.
    xpad_ref[1:H + 1, 1:W + 1, 0:cin] = x_ref[0]

    mid = _stage(xpad_ref, w1_ref, s1_ref, b1_ref, H, W)        # (H, W, C1_p)

    # Stage-1 activation never touches HBM: re-pad it in VMEM for stage 2.
    midpad_ref[1:H + 1, 1:W + 1, :] = mid.astype(midpad_ref.dtype)

    out = _stage(midpad_ref, w2_ref, s2_ref, b2_ref, H, W)      # (H, W, C2_p)
    o_ref[0] = out[:, :, :o_ref.shape[-1]].astype(o_ref.dtype)


def conv_block_pallas(x_nhwc, params, *, out_channels=None,
                      compute_dtype=jnp.bfloat16):
    """Fused ConvBlock on NHWC activations.

    x_nhwc: (N, H, W, Cin) unpadded. Returns (N, H, W, out_channels) f32.
    out_channels: real c2 (default -> no padded-channel HBM writeback) or the
                  lane-padded c2p when the next fused block consumes it.
    compute_dtype: matmul-operand / scratch dtype (bf16 for v6e/v7x MXU rate
                   and half-size slabs; f32 for exact arithmetic).
    """
    N, H, W, cin = x_nhwc.shape
    w1 = params["w1"].astype(compute_dtype)
    w2 = params["w2"].astype(compute_dtype)
    s1, b1 = params["scale1"], params["bias1"]
    s2, b2 = params["scale2"], params["bias2"]

    cin_p = w1.shape[0] // 3
    c1p = s1.shape[-1]
    c2p = s2.shape[-1]
    if out_channels is None:
        out_channels = c2p
    wp = _round_up(W + 2, SUBLANE)          # tile-aligned padded width

    x = x_nhwc.astype(compute_dtype)

    # Explicit scoped-VMEM budget: slabs + f32 matmul temporaries +
    # double-buffered I/O blocks + weights, with 2x headroom.
    cbytes = np.dtype(compute_dtype).itemsize
    slab_bytes = (H + 2) * wp * (cin_p + c1p) * cbytes
    temp_bytes = 2 * H * wp * 3 * max(c1p, c2p) * 4
    io_bytes = 2 * (H * W * cin * cbytes + H * W * out_channels * 4)
    wgt_bytes = 2 * (w1.size + w2.size) * cbytes
    vmem_limit = int(min(64 * 1024 * 1024,
                         max(32 * 1024 * 1024,
                             2 * (slab_bytes + temp_bytes + io_bytes
                                  + wgt_bytes))))

    return pl.pallas_call(
        _conv_block_kernel,
        out_shape=jax.ShapeDtypeStruct((N, H, W, out_channels), jnp.float32),
        grid=(N,),
        in_specs=[
            pl.BlockSpec((1, H, W, cin), lambda b: (b, 0, 0, 0)),
            pl.BlockSpec(w1.shape, lambda b: (0, 0)),
            pl.BlockSpec(s1.shape, lambda b: (0, 0)),
            pl.BlockSpec(b1.shape, lambda b: (0, 0)),
            pl.BlockSpec(w2.shape, lambda b: (0, 0)),
            pl.BlockSpec(s2.shape, lambda b: (0, 0)),
            pl.BlockSpec(b2.shape, lambda b: (0, 0)),
        ],
        out_specs=pl.BlockSpec((1, H, W, out_channels),
                               lambda b: (b, 0, 0, 0)),
        scratch_shapes=[
            pltpu.VMEM((H + 2, wp, cin_p), compute_dtype),
            pltpu.VMEM((H + 2, wp, c1p), compute_dtype),
        ],
        compiler_params=pltpu.CompilerParams(
            # "arbitrary": sequential batch loop on one core, which makes the
            # one-time scratch memset guard correct.  TODO(synk): re-enable a
            # "parallel" axis (H-tiles) for v7x 2-TC once halo DMA is added.
            dimension_semantics=("arbitrary",),
            vmem_limit_bytes=vmem_limit),
    )(x, w1, s1, b1, w2, s2, b2)


# -------------------------- parameter preparation --------------------------

def _fold_bn(conv_bias, gamma, beta, running_mean, running_var, eps=1e-5):
    """Fold inference-mode BatchNorm2d (applied after a biased conv)."""
    scale = gamma / jnp.sqrt(running_var + eps)
    bias = beta + scale * (conv_bias - running_mean)
    return scale, bias


def _pack_weight(w_oihw, cin_p, cout_p):
    """PyTorch (Cout, Cin, 3, 3) -> merged (3*cin_p, 3*cout_p).

    Row index = kh*cin_p + ci, column index = kw*cout_p + co; padded rows and
    columns are zero (the kernel's halo / one-time-memset logic relies on it).
    """
    cout, cin = w_oihw.shape[0], w_oihw.shape[1]
    w = jnp.zeros((3, cin_p, 3, cout_p), jnp.float32)
    w = w.at[:, :cin, :, :cout].set(jnp.transpose(w_oihw, (2, 1, 3, 0)))
    return w.reshape(3 * cin_p, 3 * cout_p)


def _pad_vec(v, cp):
    out = jnp.zeros((1, cp), jnp.float32)
    return out.at[0, :v.shape[0]].set(v.astype(jnp.float32))


def make_conv_block_params(key, channels):
    """Deterministic parameters matching the module shapes.

    channels = (c0, c1, c2):
      conv1: weight (c1, c0, 3, 3), bias (c1,)
      conv2: weight (c2, c1, 3, 3), bias (c2,)
      BatchNorm2d(c1) / BatchNorm2d(c2): fresh stats (gamma=1, beta=0,
      mean=0, var=1) -> folded inference affine.
    Returns (packed_params_for_kernel, raw_params_for_reference).
    """
    c0, c1, c2 = channels
    k1, k2, k3, k4 = jax.random.split(key, 4)
    w1 = jax.random.normal(k1, (c1, c0, 3, 3), jnp.float32) * 0.1
    b1 = jax.random.normal(k2, (c1,), jnp.float32) * 0.1
    w2 = jax.random.normal(k3, (c2, c1, 3, 3), jnp.float32) * 0.1
    b2 = jax.random.normal(k4, (c2,), jnp.float32) * 0.1

    c0p, c1p, c2p = (_round_up(c, LANE) for c in (c0, c1, c2))

    s1, bb1 = _fold_bn(b1, jnp.ones((c1,)), jnp.zeros((c1,)),
                       jnp.zeros((c1,)), jnp.ones((c1,)))
    s2, bb2 = _fold_bn(b2, jnp.ones((c2,)), jnp.zeros((c2,)),
                       jnp.zeros((c2,)), jnp.ones((c2,)))

    packed = {
        "w1": _pack_weight(w1, c0p, c1p),
        "w2": _pack_weight(w2, c1p, c2p),
        "scale1": _pad_vec(s1, c1p), "bias1": _pad_vec(bb1, c1p),
        "scale2": _pad_vec(s2, c2p), "bias2": _pad_vec(bb2, c2p),
    }
    raw = {"w1": w1, "b1": b1, "w2": w2, "b2": b2}
    return packed, raw


def check_padding_invariants(packed, channels):
    """Padded weight rows/cols and padded scale/bias lanes must be exactly 0.

    The kernel's one-time scratch memset + halo correctness relies on these
    invariants (review's correctness concern).  Host-side, concrete arrays.
    """
    c0, c1, c2 = channels
    c0p, c1p, c2p = (_round_up(c, LANE) for c in (c0, c1, c2))
    w1 = np.asarray(packed["w1"]).reshape(3, c0p, 3, c1p)
    w2 = np.asarray(packed["w2"]).reshape(3, c1p, 3, c2p)
    assert not np.any(w1[:, c0:, :, :]) and not np.any(w1[:, :, :, c1:])
    assert not np.any(w2[:, c1:, :, :]) and not np.any(w2[:, :, :, c2:])
    assert not np.any(np.asarray(packed["scale1"])[:, c1:])
    assert not np.any(np.asarray(packed["bias1"])[:, c1:])
    assert not np.any(np.asarray(packed["scale2"])[:, c2:])
    assert not np.any(np.asarray(packed["bias2"])[:, c2:])


# ------------------------------- forward -----------------------------------

@functools.partial(jax.jit, static_argnames=("out_channels", "pooling",
                                             "upsampling", "compute_dtype"))
def conv_block_forward(x_nchw, params, out_channels, pooling=False,
                       upsampling=False, compute_dtype=jnp.bfloat16):
    """ConvBlock.forward with PyTorch NCHW convention at the boundary."""
    # TODO(synk): pooling=True (MaxPool2d(2)) and upsampling=True (bilinear
    #             Upsample x2) branches are not implemented; defaults are False.
    assert not pooling and not upsampling

    # NCHW -> NHWC once at the module boundary.  When stacking ConvBlocks,
    # call conv_block_pallas on NHWC activations directly (no per-block
    # transposes / channel slices).
    x = jnp.transpose(x_nchw, (0, 2, 3, 1))
    y = conv_block_pallas(x, params, out_channels=out_channels,
                          compute_dtype=compute_dtype)   # (N, H, W, c2)
    return jnp.transpose(y, (0, 3, 1, 2))                # back to NCHW


# ------------------------------- demo / test --------------------------------

if __name__ == "__main__":
    key = jax.random.PRNGKey(0)
    k_x, k_p = jax.random.split(key)

    channels = (4, 8, 16)                       # (in, mid, out)
    N, H, W = 2, 16, 16
    x = jax.random.normal(k_x, (N, channels[0], H, W), jnp.float32)

    params, raw = make_conv_block_params(k_p, channels)
    check_padding_invariants(params, channels)

    # Pure-JAX reference: (ZeroPad2d(1) -> Conv2d 3x3 -> BN(inference) -> ReLU) x 2
    def ref_stage(xv, w, b):
        y = jax.lax.conv_general_dilated(
            xv, w, window_strides=(1, 1), padding=((1, 1), (1, 1)),
            dimension_numbers=("NCHW", "OIHW", "NCHW"),
            precision=jax.lax.Precision.HIGHEST)
        y = (y + b[None, :, None, None]) / jnp.sqrt(1.0 + 1e-5)
        return jnp.maximum(y, 0.0)

    ref = ref_stage(ref_stage(x, raw["w1"], raw["b1"]), raw["w2"], raw["b2"])

    # Exact f32 compute path (matches reference up to summation order).
    out_f32 = conv_block_forward(x, params, out_channels=channels[2],
                                 compute_dtype=jnp.float32)
    out_f32 = jax.block_until_ready(out_f32)
    assert out_f32.shape == (N, channels[2], H, W), out_f32.shape
    assert bool(jnp.all(jnp.isfinite(out_f32)))
    err_f32 = float(jnp.max(jnp.abs(out_f32 - ref)))
    assert bool(jnp.allclose(out_f32, ref, atol=1e-3, rtol=1e-3)), err_f32

    # Default bf16-operand path (v6e/v7x MXU rate, half-size VMEM slabs).
    out_bf16 = conv_block_forward(x, params, out_channels=channels[2],
                                  compute_dtype=jnp.bfloat16)
    out_bf16 = jax.block_until_ready(out_bf16)
    assert out_bf16.shape == (N, channels[2], H, W), out_bf16.shape
    assert bool(jnp.all(jnp.isfinite(out_bf16)))
    err_bf16 = float(jnp.max(jnp.abs(out_bf16 - ref)))
    assert bool(jnp.allclose(out_bf16, ref, atol=2e-2, rtol=2e-2)), err_bf16

    print("KERNEL_OK")
</pallas_src>

<mosaic_0001>
module attributes {stable_mosaic.version = 11 : i64} {
  func.func @_conv_block_kernel(%arg0: i32, %arg1: memref<1x16x16x4xf32, #tpu.memory_space<vmem>>, %arg2: memref<384x384xf32, #tpu.memory_space<vmem>>, %arg3: memref<1x128xf32, #tpu.memory_space<vmem>>, %arg4: memref<1x128xf32, #tpu.memory_space<vmem>>, %arg5: memref<384x384xf32, #tpu.memory_space<vmem>>, %arg6: memref<1x128xf32, #tpu.memory_space<vmem>>, %arg7: memref<1x128xf32, #tpu.memory_space<vmem>>, %arg8: memref<1x16x16x16xf32, #tpu.memory_space<vmem>>, %arg9: memref<18x24x128xf32, #tpu.memory_space<vmem>>, %arg10: memref<18x24x128xf32, #tpu.memory_space<vmem>>) attributes {dimension_semantics = [#tpu.dimension_semantics<arbitrary>], iteration_bounds = array<i64: 2>, scalar_prefetch = 0 : i64, scratch_operands = 2 : i64, tpu.core_type = #tpu.core_type<tc>, window_params = [{transform_indices = @transform_0, window_bounds = array<i64: 1, 16, 16, 4>}, {pipeline_mode = #tpu.pipeline_mode<synchronous>, transform_indices = @transform_1, window_bounds = array<i64: 384, 384>}, {pipeline_mode = #tpu.pipeline_mode<synchronous>, transform_indices = @transform_2, window_bounds = array<i64: 1, 128>}, {pipeline_mode = #tpu.pipeline_mode<synchronous>, transform_indices = @transform_3, window_bounds = array<i64: 1, 128>}, {pipeline_mode = #tpu.pipeline_mode<synchronous>, transform_indices = @transform_4, window_bounds = array<i64: 384, 384>}, {pipeline_mode = #tpu.pipeline_mode<synchronous>, transform_indices = @transform_5, window_bounds = array<i64: 1, 128>}, {pipeline_mode = #tpu.pipeline_mode<synchronous>, transform_indices = @transform_6, window_bounds = array<i64: 1, 128>}, {transform_indices = @transform_7, window_bounds = array<i64: 1, 16, 16, 16>}]} {
    %c0_i32 = arith.constant 0 : i32
    %0 = arith.cmpi eq, %arg0, %c0_i32 : i32
    %1 = arith.extui %0 : i1 to i32
    %c0_i32_0 = arith.constant 0 : i32
    %2 = arith.cmpi ne, %1, %c0_i32_0 : i32
    scf.if %2 {
      %cst_55 = arith.constant 0.000000e+00 : f32
      %75 = vector.broadcast %cst_55 : f32 to vector<18x24x128xf32>
      %c0_56 = arith.constant 0 : index
      %c0_57 = arith.constant 0 : index
      %c0_58 = arith.constant 0 : index
      %76 = vector.load %arg9[%c0_56, %c0_57, %c0_58] : memref<18x24x128xf32, #tpu.memory_space<vmem>>, vector<18x24x128xf32>
      tpu.vector_store %arg9[%c0_56, %c0_57, %c0_58], %75 {strides = array<i32>} : memref<18x24x128xf32, #tpu.memory_space<vmem>>, vector<18x24x128xf32>,
      %cst_59 = arith.constant 0.000000e+00 : f32
      %77 = vector.broadcast %cst_59 : f32 to vector<18x24x128xf32>
      %c0_60 = arith.constant 0 : index
      %c0_61 = arith.constant 0 : index
      %c0_62 = arith.constant 0 : index
      %78 = vector.load %arg10[%c0_60, %c0_61, %c0_62] : memref<18x24x128xf32, #tpu.memory_space<vmem>>, vector<18x24x128xf32>
      tpu.vector_store %arg10[%c0_60, %c0_61, %c0_62], %77 {strides = array<i32>} : memref<18x24x128xf32, #tpu.memory_space<vmem>>, vector<18x24x128xf32>,
    } else {
    }
    %c0 = arith.constant 0 : index
    %c0_1 = arith.constant 0 : index
    %c0_2 = arith.constant 0 : index
    %c0_3 = arith.constant 0 : index
    %3 = vector.load %arg1[%c0, %c0_1, %c0_2, %c0_3] : memref<1x16x16x4xf32, #tpu.memory_space<vmem>>, vector<1x16x16x4xf32>
    %4 = vector.shape_cast %3 : vector<1x16x16x4xf32> to vector<16x16x4xf32>
    %c1 = arith.constant 1 : index
    %c1_4 = arith.constant 1 : index
    %c0_5 = arith.constant 0 : index
    %5 = vector.load %arg9[%c1, %c1_4, %c0_5] : memref<18x24x128xf32, #tpu.memory_space<vmem>>, vector<16x16x4xf32>
    tpu.vector_store %arg9[%c1, %c1_4, %c0_5], %4 {strides = array<i32>} : memref<18x24x128xf32, #tpu.memory_space<vmem>>, vector<16x16x4xf32>,
    %c0_6 = arith.constant 0 : index
    %c0_7 = arith.constant 0 : index
    %c0_8 = arith.constant 0 : index
    %6 = vector.load %arg9[%c0_6, %c0_7, %c0_8] : memref<18x24x128xf32, #tpu.memory_space<vmem>>, vector<16x24x128xf32>
    %7 = vector.shape_cast %6 : vector<16x24x128xf32> to vector<384x128xf32>
    %c0_9 = arith.constant 0 : index
    %c0_10 = arith.constant 0 : index
    %8 = vector.load %arg2[%c0_9, %c0_10] : memref<384x384xf32, #tpu.memory_space<vmem>>, vector<128x384xf32>
    %cst = arith.constant dense<0.000000e+00> : vector<384x384xf32>
    %9 = tpu.matmul %7, %8, %cst {dimension_numbers = #tpu.dot_dimension_numbers<[1], [0], [0], [1], [0, 0, 1, 1], [], []>} : vector<384x128xf32>, vector<128x384xf32>, vector<384x384xf32> -> vector<384x384xf32>
    %c1_11 = arith.constant 1 : index
    %c0_12 = arith.constant 0 : index
    %c0_13 = arith.constant 0 : index
    %10 = vector.load %arg9[%c1_11, %c0_12, %c0_13] : memref<18x24x128xf32, #tpu.memory_space<vmem>>, vector<16x24x128xf32>
    %11 = vector.shape_cast %10 : vector<16x24x128xf32> to vector<384x128xf32>
    %c128 = arith.constant 128 : index
    %c0_14 = arith.constant 0 : index
    %12 = vector.load %arg2[%c128, %c0_14] : memref<384x384xf32, #tpu.memory_space<vmem>>, vector<128x384xf32>
    %cst_15 = arith.constant dense<0.000000e+00> : vector<384x384xf32>
    %13 = tpu.matmul %11, %12, %cst_15 {dimension_numbers = #tpu.dot_dimension_numbers<[1], [0], [0], [1], [0, 0, 1, 1], [], []>} : vector<384x128xf32>, vector<128x384xf32>, vector<384x384xf32> -> vector<384x384xf32>
    %14 = arith.addf %9, %13 : vector<384x384xf32>
    %c2 = arith.constant 2 : index
    %c0_16 = arith.constant 0 : index
    %c0_17 = arith.constant 0 : index
    %15 = vector.load %arg9[%c2, %c0_16, %c0_17] : memref<18x24x128xf32, #tpu.memory_space<vmem>>, vector<16x24x128xf32>
    %16 = vector.shape_cast %15 : vector<16x24x128xf32> to vector<384x128xf32>
    %c256 = arith.constant 256 : index
    %c0_18 = arith.constant 0 : index
    %17 = vector.load %arg2[%c256, %c0_18] : memref<384x384xf32, #tpu.memory_space<vmem>>, vector<128x384xf32>
    %cst_19 = arith.constant dense<0.000000e+00> : vector<384x384xf32>
    %18 = tpu.matmul %16, %17, %cst_19 {dimension_numbers = #tpu.dot_dimension_numbers<[1], [0], [0], [1], [0, 0, 1, 1], [], []>} : vector<384x128xf32>, vector<128x384xf32>, vector<384x384xf32> -> vector<384x384xf32>
    %19 = arith.addf %14, %18 : vector<384x384xf32>
    %20 = vector.shape_cast %19 : vector<384x384xf32> to vector<16x24x384xf32>
    %21 = vector.extract_strided_slice %20 {offsets = [0, 0, 0], sizes = [16, 16, 128], strides = [1, 1, 1]} : vector<16x24x384xf32> to vector<16x16x128xf32>
    %22 = vector.extract_strided_slice %20 {offsets = [0, 1, 128], sizes = [16, 16, 128], strides = [1, 1, 1]} : vector<16x24x384xf32> to vector<16x16x128xf32>
    %23 = arith.addf %21, %22 : vector<16x16x128xf32>
    %24 = vector.extract_strided_slice %20 {offsets = [0, 2, 256], sizes = [16, 16, 128], strides = [1, 1, 1]} : vector<16x24x384xf32> to vector<16x16x128xf32>
    %25 = arith.addf %23, %24 : vector<16x16x128xf32>
    %c0_20 = arith.constant 0 : index
    %c0_21 = arith.constant 0 : index
    %26 = vector.load %arg3[%c0_20, %c0_21] : memref<1x128xf32, #tpu.memory_space<vmem>>, vector<1x128xf32>
    %27 = vector.shape_cast %26 : vector<1x128xf32> to vector<128xf32>
    %28 = vector.shape_cast %27 : vector<128xf32> to vector<1x1x128xf32>
    %29 = vector.broadcast %28 : vector<1x1x128xf32> to vector<16x16x128xf32>
    %30 = arith.mulf %25, %29 : vector<16x16x128xf32>
    %c0_22 = arith.constant 0 : index
    %c0_23 = arith.constant 0 : index
    %31 = vector.load %arg4[%c0_22, %c0_23] : memref<1x128xf32, #tpu.memory_space<vmem>>, vector<1x128xf32>
    %32 = vector.shape_cast %31 : vector<1x128xf32> to vector<128xf32>
    %33 = vector.shape_cast %32 : vector<128xf32> to vector<1x1x128xf32>
    %34 = vector.broadcast %33 : vector<1x1x128xf32> to vector<16x16x128xf32>
    %35 = arith.addf %30, %34 : vector<16x16x128xf32>
    %cst_24 = arith.constant 0.000000e+00 : f32
    %36 = vector.broadcast %cst_24 : f32 to vector<16x16x128xf32>
    %37 = arith.maximumf %35, %36 : vector<16x16x128xf32>
    %c1_25 = arith.constant 1 : index
    %c1_26 = arith.constant 1 : index
    %c0_27 = arith.constant 0 : index
    %38 = vector.load %arg10[%c1_25, %c1_26, %c0_27] : memref<18x24x128xf32, #tpu.memory_space<vmem>>, vector<16x16x128xf32>
    tpu.vector_store %arg10[%c1_25, %c1_26, %c0_27], %37 {strides = array<i32>} : memref<18x24x128xf32, #tpu.memory_space<vmem>>, vector<16x16x128xf32>,
    %c0_28 = arith.constant 0 : index
    %c0_29 = arith.constant 0 : index
    %c0_30 = arith.constant 0 : index
    %39 = vector.load %arg10[%c0_28, %c0_29, %c0_30] : memref<18x24x128xf32, #tpu.memory_space<vmem>>, vector<16x24x128xf32>
    %40 = vector.shape_cast %39 : vector<16x24x128xf32> to vector<384x128xf32>
    %c0_31 = arith.constant 0 : index
    %c0_32 = arith.constant 0 : index
    %41 = vector.load %arg5[%c0_31, %c0_32] : memref<384x384xf32, #tpu.memory_space<vmem>>, vector<128x384xf32>
    %cst_33 = arith.constant dense<0.000000e+00> : vector<384x384xf32>
    %42 = tpu.matmul %40, %41, %cst_33 {dimension_numbers = #tpu.dot_dimension_numbers<[1], [0], [0], [1], [0, 0, 1, 1], [], []>} : vector<384x128xf32>, vector<128x384xf32>, vector<384x384xf32> -> vector<384x384xf32>
    %c1_34 = arith.constant 1 : index
    %c0_35 = arith.constant 0 : index
    %c0_36 = arith.constant 0 : index
    %43 = vector.load %arg10[%c1_34, %c0_35, %c0_36] : memref<18x24x128xf32, #tpu.memory_space<vmem>>, vector<16x24x128xf32>
    %44 = vector.shape_cast %43 : vector<16x24x128xf32> to vector<384x128xf32>
    %c128_37 = arith.constant 128 : index
    %c0_38 = arith.constant 0 : index
    %45 = vector.load %arg5[%c128_37, %c0_38] : memref<384x384xf32, #tpu.memory_space<vmem>>, vector<128x384xf32>
    %cst_39 = arith.constant dense<0.000000e+00> : vector<384x384xf32>
    %46 = tpu.matmul %44, %45, %cst_39 {dimension_numbers = #tpu.dot_dimension_numbers<[1], [0], [0], [1], [0, 0, 1, 1], [], []>} : vector<384x128xf32>, vector<128x384xf32>, vector<384x384xf32> -> vector<384x384xf32>
    %47 = arith.addf %42, %46 : vector<384x384xf32>
    %c2_40 = arith.constant 2 : index
    %c0_41 = arith.constant 0 : index
    %c0_42 = arith.constant 0 : index
    %48 = vector.load %arg10[%c2_40, %c0_41, %c0_42] : memref<18x24x128xf32, #tpu.memory_space<vmem>>, vector<16x24x128xf32>
    %49 = vector.shape_cast %48 : vector<16x24x128xf32> to vector<384x128xf32>
    %c256_43 = arith.constant 256 : index
    %c0_44 = arith.constant 0 : index
    %50 = vector.load %arg5[%c256_43, %c0_44] : memref<384x384xf32, #tpu.memory_space<vmem>>, vector<128x384xf32>
    %cst_45 = arith.constant dense<0.000000e+00> : vector<384x384xf32>
    %51 = tpu.matmul %49, %50, %cst_45 {dimension_numbers = #tpu.dot_dimension_numbers<[1], [0], [0], [1], [0, 0, 1, 1], [], []>} : vector<384x128xf32>, vector<128x384xf32>, vector<384x384xf32> -> vector<384x384xf32>
    %52 = arith.addf %47, %51 : vector<384x384xf32>
    %53 = vector.shape_cast %52 : vector<384x384xf32> to vector<16x24x384xf32>
    %54 = vector.extract_strided_slice %53 {offsets = [0, 0, 0], sizes = [16, 16, 128], strides = [1, 1, 1]} : vector<16x24x384xf32> to vector<16x16x128xf32>
    %55 = vector.extract_strided_slice %53 {offsets = [0, 1, 128], sizes = [16, 16, 128], strides = [1, 1, 1]} : vector<16x24x384xf32> to vector<16x16x128xf32>
    %56 = arith.addf %54, %55 : vector<16x16x128xf32>
    %57 = vector.extract_strided_slice %53 {offsets = [0, 2, 256], sizes = [16, 16, 128], strides = [1, 1, 1]} : vector<16x24x384xf32> to vector<16x16x128xf32>
    %58 = arith.addf %56, %57 : vector<16x16x128xf32>
    %c0_46 = arith.constant 0 : index
    %c0_47 = arith.constant 0 : index
    %59 = vector.load %arg6[%c0_46, %c0_47] : memref<1x128xf32, #tpu.memory_space<vmem>>, vector<1x128xf32>
    %60 = vector.shape_cast %59 : vector<1x128xf32> to vector<128xf32>
    %61 = vector.shape_cast %60 : vector<128xf32> to vector<1x1x128xf32>
    %62 = vector.broadcast %61 : vector<1x1x128xf32> to vector<16x16x128xf32>
    %63 = arith.mulf %58, %62 : vector<16x16x128xf32>
    %c0_48 = arith.constant 0 : index
    %c0_49 = arith.constant 0 : index
    %64 = vector.load %arg7[%c0_48, %c0_49] : memref<1x128xf32, #tpu.memory_space<vmem>>, vector<1x128xf32>
    %65 = vector.shape_cast %64 : vector<1x128xf32> to vector<128xf32>
    %66 = vector.shape_cast %65 : vector<128xf32> to vector<1x1x128xf32>
    %67 = vector.broadcast %66 : vector<1x1x128xf32> to vector<16x16x128xf32>
    %68 = arith.addf %63, %67 : vector<16x16x128xf32>
    %cst_50 = arith.constant 0.000000e+00 : f32
    %69 = vector.broadcast %cst_50 : f32 to vector<16x16x128xf32>
    %70 = arith.maximumf %68, %69 : vector<16x16x128xf32>
    %71 = vector.extract_strided_slice %70 {offsets = [0, 0, 0], sizes = [16, 16, 16], strides = [1, 1, 1]} : vector<16x16x128xf32> to vector<16x16x16xf32>
    %c0_51 = arith.constant 0 : index
    %c0_52 = arith.constant 0 : index
    %c0_53 = arith.constant 0 : index
    %c0_54 = arith.constant 0 : index
    %72 = vector.load %arg8[%c0_51, %c0_52, %c0_53, %c0_54] : memref<1x16x16x16xf32, #tpu.memory_space<vmem>>, vector<1x16x16x16xf32>
    %73 = vector.shape_cast %72 : vector<1x16x16x16xf32> to vector<16x16x16xf32>
    %74 = vector.shape_cast %71 : vector<16x16x16xf32> to vector<1x16x16x16xf32>
    tpu.vector_store %arg8[%c0_51, %c0_52, %c0_53, %c0_54], %74 {strides = array<i32>} : memref<1x16x16x16xf32, #tpu.memory_space<vmem>>, vector<1x16x16x16xf32>,
    return
  }
  func.func @transform_0(%arg0: i32) -> (i32, i32, i32, i32) {
    %c0_i32 = arith.constant 0 : i32
    %c0_i32_0 = arith.constant 0 : i32
    %c0_i32_1 = arith.constant 0 : i32
    %c0_i32_2 = arith.constant 0 : i32
    return %arg0, %c0_i32, %c0_i32_0, %c0_i32_1 : i32, i32, i32, i32
  }
  func.func @transform_1(%arg0: i32) -> (i32, i32) {
    %c0_i32 = arith.constant 0 : i32
    %c0_i32_0 = arith.constant 0 : i32
    %c0_i32_1 = arith.constant 0 : i32
    return %c0_i32, %c0_i32_0 : i32, i32
  }
  func.func @transform_2(%arg0: i32) -> (i32, i32) {
    %c0_i32 = arith.constant 0 : i32
    %c0_i32_0 = arith.constant 0 : i32
    %c0_i32_1 = arith.constant 0 : i32
    return %c0_i32, %c0_i32_0 : i32, i32
  }
  func.func @transform_3(%arg0: i32) -> (i32, i32) {
    %c0_i32 = arith.constant 0 : i32
    %c0_i32_0 = arith.constant 0 : i32
    %c0_i32_1 = arith.constant 0 : i32
    return %c0_i32, %c0_i32_0 : i32, i32
  }
  func.func @transform_4(%arg0: i32) -> (i32, i32) {
    %c0_i32 = arith.constant 0 : i32
    %c0_i32_0 = arith.constant 0 : i32
    %c0_i32_1 = arith.constant 0 : i32
    return %c0_i32, %c0_i32_0 : i32, i32
  }
  func.func @transform_5(%arg0: i32) -> (i32, i32) {
    %c0_i32 = arith.constant 0 : i32
    %c0_i32_0 = arith.constant 0 : i32
    %c0_i32_1 = arith.constant 0 : i32
    return %c0_i32, %c0_i32_0 : i32, i32
  }
  func.func @transform_6(%arg0: i32) -> (i32, i32) {
    %c0_i32 = arith.constant 0 : i32
    %c0_i32_0 = arith.constant 0 : i32
    %c0_i32_1 = arith.constant 0 : i32
    return %c0_i32, %c0_i32_0 : i32, i32
  }
  func.func @transform_7(%arg0: i32) -> (i32, i32, i32, i32) {
    %c0_i32 = arith.constant 0 : i32
    %c0_i32_0 = arith.constant 0 : i32
    %c0_i32_1 = arith.constant 0 : i32
    %c0_i32_2 = arith.constant 0 : i32
    return %arg0, %c0_i32, %c0_i32_0, %c0_i32_1 : i32, i32, i32, i32
  }
}

</mosaic_0001>

<bundles_post_ra>
// kernel: conv_block_forward.1
= control target key start
LH: loop header
LB: loop body
LE: loop exit
PB: predicated region body
PF: predicated region fallthrough
CT: control target
= control target key end

     0   :  { %12 = vsyncpa [#allocation5], 0  ;;  %s10756_s0 = inlined_call_operand.vmem [shape: f32[2,16,16,4], index: 0, kind: input, shape index: {}]   ;;  %s10757_s1 = inlined_call_operand.hbm [shape: f32[384,384], index: 1, kind: input, shape index: {}]   ;;  %s10758_s2 = inlined_call_operand.vmem [shape: f32[1,128], index: 2, kind: input, shape index: {}]   ;;  %s10759_s3 = inlined_call_operand.vmem [shape: f32[1,128], index: 3, kind: input, shape index: {}]   ;;  %s10760_s4 = inlined_call_operand.hbm [shape: f32[384,384], index: 4, kind: input, shape index: {}]   ;;  %s10761_s5 = inlined_call_operand.vmem [shape: f32[1,128], index: 5, kind: input, shape index: {}]   ;;  %s10762_s6 = inlined_call_operand.vmem [shape: f32[1,128], index: 6, kind: input, shape index: {}]   ;;  %s10763_s7 = inlined_call_operand.vmem [shape: f32[2,16,16,16], index: 7, kind: output, shape index: {}]  }
   0x1   :  { %13 = vsyncpa [#allocation7], 0  ;;  %s8500_s24 = smov 0  }
   0x2 LB: > { %s8506_s25 = sadd.s32 4294967295, %s8452_s24   ;;  %p6308_p0 = scmp.ge.s32.totalorder %s8452_s24, 1  ;;  %s8452_s24 = sphi %s8500_s24, %s19_s24  }
   0x3   : > { %p202_p1 = scmp.lt.s32.totalorder %s8452_s24, 3  ;;  %s8454_s26 = smov [#allocation4]  }
   0x4   : > { %s214_s27 = sshll.u32 %s8454_s26, 4  ;;  %p10764_p4 = scmp.eq.s32.totalorder %s8506_s25, 0  ;;  %s215_s27 = int_to_ptr.vmem [resolvable:$true] %s214_s27 }
   0x5   : > { %p8511_p3 = pnand %p6308_p0, %p202_p1  ;;  %s8455_s29 = smov [#allocation6]  }
   0x6   : > { %s233_s30 = sshll.u32 %s8455_s29, 4  ;;  %s8382_s11 = scalar_lea.hbm %s10757_s1, 18432  ;;  %s8524_s30 = int_to_ptr.vmem [resolvable:$true] %s233_s30 }
   0x7   : > { %s10773_s28 = scalar_select %p8511_p3, 1, 0 }
   0x8   : > { %p8288_p5 = pneg %p8511_p3  ;;  %p8383_p7 = scmp.ne.s32.totalorder %s10757_s1, %s8382_s11 }
   0x9   : > { %p8389_p11 = scmp.lt.u32.totalorder %s8382_s11, %s10757_s1 }
   0xa   : > { %p8520_p6 = pnand %p10764_p4, %p8288_p5 }
   0xc   : > { %p8384_p8 = pneg %p8520_p6 }
   0xe   : > { %p8385_p9 = pnand %p8384_p8, %p8383_p7 }
  0x10   : > { %p8386_p10 = pneg %p8385_p9 }
  0x12   : > { %p8391_p12 = pnand %p8389_p11, %p8386_p10 }
  0x14   : > { %8394 = shalt.err (!%p8391_p12)
}
  0x15   : > { %s8395_s16 = scalar_lea.vmem %s215_s27, 18432  ;;  %p8403_p5 = scmp.lt.s32.totalorder %s215_s27, %s215_s27 }
  0x16   : > { %p8396_p13 = scmp.ne.s32.totalorder %s215_s27, %s8395_s16  ;;  %p8404_p2 = scmp.lt.s32.totalorder %s8395_s16, %s8395_s16 }
  0x18   : > { %p8398_p0 = pnand %p8396_p13, %p8384_p8  ;;  %p8405_p4 = por %p8404_p2, %p8403_p5 }
  0x1a   : > { %p8399_p1 = pneg %p8398_p0 }
  0x1c   : > { %p8406_p3 = pnand %p8405_p4, %p8399_p1 }
  0x1e   : > { %8409 = shalt.err (!%p8406_p3)
}
  0x1f   : > { %s8456_s17 = smov 384   ;;  %s8457_s18 = smov 24  }
  0x20   : > { %8291 = dma.hbm_to_vmem [thread:$0]  (!%p8520_p6), %s10757_s1, 18432, %s215_s27, [#allocation5], %s8456_s17, %s8456_s17, %s8457_s18  }
  0x21   : > { %s8410_s23 = scalar_lea.hbm %s10760_s4, 18432 }
  0x22   : > { %p8411_p7 = scmp.ne.s32.totalorder %s10760_s4, %s8410_s23  ;;  %p8417_p4 = scmp.lt.u32.totalorder %s8410_s23, %s10760_s4 }
  0x24   : > { %p8413_p2 = pnand %p8411_p7, %p8384_p8 }
  0x26   : > { %p8414_p3 = pneg %p8413_p2 }
  0x28   : > { %p8419_p9 = pnand %p8417_p4, %p8414_p3 }
  0x2a   : > { %8422 = shalt.err (!%p8419_p9)
}
  0x2b   : > { %s8423_s27 = scalar_lea.vmem %s8524_s30, 18432  ;;  %p8431_p13 = scmp.lt.s32.totalorder %s8524_s30, %s8524_s30 }
  0x2c   : > { %p8424_p10 = scmp.ne.s32.totalorder %s8524_s30, %s8423_s27  ;;  %p8432_p0 = scmp.lt.s32.totalorder %s8423_s27, %s8423_s27 }
  0x2e   : > { %p8426_p11 = pnand %p8424_p10, %p8384_p8  ;;  %p8433_p1 = por %p8432_p0, %p8431_p13 }
  0x30   : > { %p8427_p12 = pneg %p8426_p11 }
  0x32   : > { %p8434_p5 = pnand %p8433_p1, %p8427_p12 }
  0x34   : > { %8437 = shalt.err (!%p8434_p5)
}
  0x35   : > { %8294 = dma.hbm_to_vmem [thread:$0]  (!%p8520_p6), %s10760_s4, 18432, %s8524_s30, [#allocation7], %s8456_s17, %s8456_s17, %s8457_s18  }
  0x36   : > { %p10775_p7 = scmp.ne.s32.totalorder %s10773_s28, 0 }
  0x38   : > { %263 = sbr.rel (%p10775_p7) target bundleno = 1865 (0x749), region = 48 }
  0x3f   : > { %p10776_p2 = scmp.eq.s32.totalorder %s8506_s25, 0 }
  0x41   : > { %8443 = dma.done.wait (%p10776_p2), [#allocation5], 18432   ;;  %p10777_p8 = pmov %p10776_p2 }
  0x42   : > { %p10778_p3 = pmov %p10776_p2 }
  0x43   : > { %8445 = vsyncadd (%p10777_p8), [#allocation5], 4294948864 }
  0x44   : > { %8447 = dma.done.wait (%p10778_p3), [#allocation7], 18432   ;;  %p10779_p4 = pmov %p10776_p2 }
  0x45   : > { %p299_p9 = scmp.lt.s32.totalorder %s8506_s25, 1  ;;  %p10780_p6 = scmp.ne.s32.totalorder %s8506_s25, 0 }
  0x46   : > { %8449 = vsyncadd (%p10779_p4), [#allocation7], 4294948864  ;;  %v8458_v0 = vmov (!%p10780_p6), 0.0  }
  0x47   : > { %s300_s8 = scalar_select %p299_p9, %s8506_s25, 1 }
  0x48   : > { %312 = sbr.rel (%p10780_p6) target bundleno = 126 (0x7e), region = 60  ;;  %313 = vst [vmem:[#allocation2] sm:$0xff] (!%p10780_p6), %v8458_v0  ;;  %314 = vst [vmem:[#allocation2 + $0x8] sm:$0xff] (!%p10780_p6), %v8458_v0 }
  0x49   : > { %s6326_s30 = sshll.u32 %s300_s8, 8  ;;  %315 = vst [vmem:[#allocation2 + $0x10] sm:$0xff] (!%p10780_p6), %v8458_v0  ;;  %316 = vst [vmem:[#allocation2 + $0x18] sm:$0xff] (!%p10780_p6), %v8458_v0 }
  0x4a   : > { %s8588_s14 = scalar_lea.vmem %s10756_s0, %s6326_s30  ;;  %s8593_s17 = scalar_lea.vmem %s10763_s7, %s6326_s30  ;;  %317 = vst [vmem:[#allocation2 + $0x20] sm:$0xff] (!%p10780_p6), %v8458_v0  ;;  %318 = vst [vmem:[#allocation2 + $0x28] sm:$0xff] (!%p10780_p6), %v8458_v0 }
  0x4b   : > { %319 = vst [vmem:[#allocation2 + $0x30] sm:$0xff] (!%p10780_p6), %v8458_v0  ;;  %320 = vst [vmem:[#allocation2 + $0x38] sm:$0xff] (!%p10780_p6), %v8458_v0 }
  0x4c   : > { %321 = vst [vmem:[#allocation2 + $0x40] sm:$0xff] (!%p10780_p6), %v8458_v0  ;;  %322 = vst [vmem:[#allocation2 + $0x48] sm:$0xff] (!%p10780_p6), %v8458_v0 }
  0x4d   : > { %323 = vst [vmem:[#allocation2 + $0x50] sm:$0xff] (!%p10780_p6), %v8458_v0  ;;  %324 = vst [vmem:[#allocation2 + $0x58] sm:$0xff] (!%p10780_p6), %v8458_v0 }
  0x4e   : > { %325 = vst [vmem:[#allocation2 + $0x60] sm:$0xff] (!%p10780_p6), %v8458_v0  ;;  %326 = vst [vmem:[#allocation2 + $0x68] sm:$0xff] (!%p10780_p6), %v8458_v0 }
  0x4f   : > { %327 = vst [vmem:[#allocation2 + $0x70] sm:$0xff] %v8458_v0  ;;  %328 = vst [vmem:[#allocation2 + $0x78] sm:$0xff] %v8458_v0 }
  0x50   : > { %329 = vst [vmem:[#allocation2 + $0x80] sm:$0xff] %v8458_v0  ;;  %330 = vst [vmem:[#allocation2 + $0x88] sm:$0xff] %v8458_v0 }
  0x51   : > { %331 = vst [vmem:[#allocation2 + $0x90] sm:$0xff] %v8458_v0  ;;  %332 = vst [vmem:[#allocation2 + $0x98] sm:$0xff] %v8458_v0 }
  0x52   : > { %333 = vst [vmem:[#allocation2 + $0xa0] sm:$0xff] %v8458_v0  ;;  %334 = vst [vmem:[#allocation2 + $0xa8] sm:$0xff] %v8458_v0 }
  0x53   : > { %335 = vst [vmem:[#allocation2 + $0xb0] sm:$0xff] %v8458_v0  ;;  %336 = vst [vmem:[#allocation2 + $0xb8] sm:$0xff] %v8458_v0 }
  0x54   : > { %337 = vst [vmem:[#allocation2 + $0xc0] sm:$0xff] %v8458_v0  ;;  %338 = vst [vmem:[#allocation2 + $0xc8] sm:$0xff] %v8458_v0 }
  0x55   : > { %339 = vst [vmem:[#allocation2 + $0xd0] sm:$0xff] %v8458_v0  ;;  %340 = vst [vmem:[#allocation2 + $0xd8] sm:$0xff] %v8458_v0 }
  0x56   : > { %341 = vst [vmem:[#allocation2 + $0xe0] sm:$0xff] %v8458_v0  ;;  %342 = vst [vmem:[#allocation2 + $0xe8] sm:$0xff] %v8458_v0 }
  0x57   : > { %343 = vst [vmem:[#allocation2 + $0xf0] sm:$0xff] %v8458_v0  ;;  %344 = vst [vmem:[#allocation2 + $0xf8] sm:$0xff] %v8458_v0 }
  0x58   : > { %345 = vst [vmem:[#allocation2 + $0x100] sm:$0xff] %v8458_v0  ;;  %346 = vst [vmem:[#allocation2 + $0x108] sm:$0xff] %v8458_v0 }
  0x59   : > { %347 = vst [vmem:[#allocation2 + $0x110] sm:$0xff] %v8458_v0  ;;  %348 = vst [vmem:[#allocation2 + $0x118] sm:$0xff] %v8458_v0 }
  0x5a   : > { %349 = vst [vmem:[#allocation2 + $0x120] sm:$0xff] %v8458_v0  ;;  %350 = vst [vmem:[#allocation2 + $0x128] sm:$0xff] %v8458_v0 }
  0x5b   : > { %351 = vst [vmem:[#allocation2 + $0x130] sm:$0xff] %v8458_v0  ;;  %352 = vst [vmem:[#allocation2 + $0x138] sm:$0xff] %v8458_v0 }
  0x5c   : > { %353 = vst [vmem:[#allocation2 + $0x140] sm:$0xff] %v8458_v0  ;;  %354 = vst [vmem:[#allocation2 + $0x148] sm:$0xff] %v8458_v0 }
  0x5d   : > { %355 = vst [vmem:[#allocation2 + $0x150] sm:$0xff] %v8458_v0  ;;  %356 = vst [vmem:[#allocation2 + $0x158] sm:$0xff] %v8458_v0 }
  0x5e   : > { %357 = vst [vmem:[#allocation2 + $0x160] sm:$0xff] %v8458_v0  ;;  %358 = vst [vmem:[#allocation2 + $0x168] sm:$0xff] %v8458_v0 }
  0x5f   : > { %359 = vst [vmem:[#allocation2 + $0x170] sm:$0xff] %v8458_v0  ;;  %360 = vst [vmem:[#allocation2 + $0x178] sm:$0xff] %v8458_v0 }
  0x60   : > { %361 = vst [vmem:[#allocation2 + $0x180] sm:$0xff] %v8458_v0  ;;  %362 = vst [vmem:[#allocation2 + $0x188] sm:$0xff] %v8458_v0 }
  0x61   : > { %363 = vst [vmem:[#allocation2 + $0x190] sm:$0xff] %v8458_v0  ;;  %364 = vst [vmem:[#allocation2 + $0x198] sm:$0xff] %v8458_v0 }
  0x62   : > { %365 = vst [vmem:[#allocation2 + $0x1a0] sm:$0xff] %v8458_v0  ;;  %366 = vst [vmem:[#allocation2 + $0x1a8] sm:$0xff] %v8458_v0 }
  0x63   : > { %367 = vst [vmem:[#allocation3] sm:$0xff] %v8458_v0  ;;  %368 = vst [vmem:[#allocation3 + $0x8] sm:$0xff] %v8458_v0 }
  0x64   : > { %369 = vst [vmem:[#allocation3 + $0x10] sm:$0xff] %v8458_v0  ;;  %370 = vst [vmem:[#allocation3 + $0x18] sm:$0xff] %v8458_v0 }
  0x65   : > { %371 = vst [vmem:[#allocation3 + $0x20] sm:$0xff] %v8458_v0  ;;  %372 = vst [vmem:[#allocation3 + $0x28] sm:$0xff] %v8458_v0 }
  0x66   : > { %373 = vst [vmem:[#allocation3 + $0x30] sm:$0xff] %v8458_v0  ;;  %374 = vst [vmem:[#allocation3 + $0x38] sm:$0xff] %v8458_v0 }
  0x67   : > { %375 = vst [vmem:[#allocation3 + $0x40] sm:$0xff] %v8458_v0  ;;  %376 = vst [vmem:[#allocation3 + $0x48] sm:$0xff] %v8458_v0 }
  0x68   : > { %377 = vst [vmem:[#allocation3 + $0x50] sm:$0xff] %v8458_v0  ;;  %378 = vst [vmem:[#allocation3 + $0x58] sm:$0xff] %v8458_v0 }
  0x69   : > { %379 = vst [vmem:[#allocation3 + $0x60] sm:$0xff] %v8458_v0  ;;  %380 = vst [vmem:[#allocation3 + $0x68] sm:$0xff] %v8458_v0 }
  0x6a   : > { %381 = vst [vmem:[#allocation3 + $0x70] sm:$0xff] %v8458_v0  ;;  %382 = vst [vmem:[#allocation3 + $0x78] sm:$0xff] %v8458_v0 }
  0x6b   : > { %383 = vst [vmem:[#allocation3 + $0x80] sm:$0xff] %v8458_v0  ;;  %384 = vst [vmem:[#allocation3 + $0x88] sm:$0xff] %v8458_v0 }
  0x6c   : > { %385 = vst [vmem:[#allocation3 + $0x90] sm:$0xff] %v8458_v0  ;;  %386 = vst [vmem:[#allocation3 + $0x98] sm:$0xff] %v8458_v0 }
  0x6d   : > { %387 = vst [vmem:[#allocation3 + $0xa0] sm:$0xff] %v8458_v0  ;;  %388 = vst [vmem:[#allocation3 + $0xa8] sm:$0xff] %v8458_v0 }
  0x6e   : > { %389 = vst [vmem:[#allocation3 + $0xb0] sm:$0xff] %v8458_v0  ;;  %390 = vst [vmem:[#allocation3 + $0xb8] sm:$0xff] %v8458_v0 }
  0x6f   : > { %391 = vst [vmem:[#allocation3 + $0xc0] sm:$0xff] %v8458_v0  ;;  %392 = vst [vmem:[#allocation3 + $0xc8] sm:$0xff] %v8458_v0 }
  0x70   : > { %393 = vst [vmem:[#allocation3 + $0xd0] sm:$0xff] %v8458_v0  ;;  %394 = vst [vmem:[#allocation3 + $0xd8] sm:$0xff] %v8458_v0 }
  0x71   : > { %395 = vst [vmem:[#allocation3 + $0xe0] sm:$0xff] %v8458_v0  ;;  %396 = vst [vmem:[#allocation3 + $0xe8] sm:$0xff] %v8458_v0 }
  0x72   : > { %397 = vst [vmem:[#allocation3 + $0xf0] sm:$0xff] %v8458_v0  ;;  %398 = vst [vmem:[#allocation3 + $0xf8] sm:$0xff] %v8458_v0 }
  0x73   : > { %399 = vst [vmem:[#allocation3 + $0x100] sm:$0xff] %v8458_v0  ;;  %400 = vst [vmem:[#allocation3 + $0x108] sm:$0xff] %v8458_v0 }
  0x74   : > { %401 = vst [vmem:[#allocation3 + $0x110] sm:$0xff] %v8458_v0  ;;  %402 = vst [vmem:[#allocation3 + $0x118] sm:$0xff] %v8458_v0 }
  0x75   : > { %403 = vst [vmem:[#allocation3 + $0x120] sm:$0xff] %v8458_v0  ;;  %404 = vst [vmem:[#allocation3 + $0x128] sm:$0xff] %v8458_v0 }
  0x76   : > { %405 = vst [vmem:[#allocation3 + $0x130] sm:$0xff] %v8458_v0  ;;  %406 = vst [vmem:[#allocation3 + $0x138] sm:$0xff] %v8458_v0 }
  0x77   : > { %407 = vst [vmem:[#allocation3 + $0x140] sm:$0xff] %v8458_v0  ;;  %408 = vst [vmem:[#allocation3 + $0x148] sm:$0xff] %v8458_v0 }
  0x78   : > { %409 = vst [vmem:[#allocation3 + $0x150] sm:$0xff] %v8458_v0  ;;  %410 = vst [vmem:[#allocation3 + $0x158] sm:$0xff] %v8458_v0 }
  0x79   : > { %411 = vst [vmem:[#allocation3 + $0x160] sm:$0xff] %v8458_v0  ;;  %412 = vst [vmem:[#allocation3 + $0x168] sm:$0xff] %v8458_v0 }
  0x7a   : > { %413 = vst [vmem:[#allocation3 + $0x170] sm:$0xff] %v8458_v0  ;;  %414 = vst [vmem:[#allocation3 + $0x178] sm:$0xff] %v8458_v0 }
  0x7b   : > { %415 = vst [vmem:[#allocation3 + $0x180] sm:$0xff] %v8458_v0  ;;  %416 = vst [vmem:[#allocation3 + $0x188] sm:$0xff] %v8458_v0 }
  0x7c   : > { %417 = vst [vmem:[#allocation3 + $0x190] sm:$0xff] %v8458_v0  ;;  %418 = vst [vmem:[#allocation3 + $0x198] sm:$0xff] %v8458_v0 }
  0x7d   : > { %419 = vst [vmem:[#allocation3 + $0x1a0] sm:$0xff] %v8458_v0  ;;  %420 = vst [vmem:[#allocation3 + $0x1a8] sm:$0xff] %v8458_v0 }
  0x7e PF: > { %v632_v1 = vld [vmem:[#allocation4 + $0x188] sm:$0xff]  ;;  %v635_v2 = vld [vmem:[#allocation4 + $0x1a0] sm:$0xff]  ;;  %v634_v5 = vld [vmem:[#allocation4 + $0x198] sm:$0xff]  ;;  %v10766_v8 = vmov 0.0   ;;  %vm454_vm0 = vcmask 31744   ;;  %vm3071_vm1 = vcmask 1045504  }
  0x7f   : > { %v631_v3 = vld [vmem:[#allocation4 + $0x180] sm:$0xff]  ;;  %v7336_v4 = vpack.c.bf16 %v635_v2, %v632_v1  ;;  %v638_v6 = vld [vmem:[#allocation4 + $0x1b8] sm:$0xff]  ;;  %v641_v7 = vld [vmem:[#allocation4 + $0x1d0] sm:$0xff]  ;;  %743 = vmatprep.mubr.f32.mxu0 %v10766_v8  ;;  %vm2878_vm2 = vcmask 1046528   ;;  %vm6196_vm3 = vcmask 130048  }
  0x80   : > { %v7338_v9 = vpack.c.bf16 %v634_v5, %v631_v3  ;;  %v7340_v10 = vpack.c.bf16 %v641_v7, %v638_v6  ;;  %v637_v11 = vld [vmem:[#allocation4 + $0x1b0] sm:$0xff]  ;;  %v640_v12 = vld [vmem:[#allocation4 + $0x1c8] sm:$0xff]  ;;  %v647_v14 = vld [vmem:[#allocation4 + $0x200] sm:$0xff] }
  0x81   : > { %v644_v13 = vld [vmem:[#allocation4 + $0x1e8] sm:$0xff]  ;;  %7337 = vmatprep.subr.bf16.mxu0 %v7336_v4  ;;  %v7342_v15 = vpack.c.bf16 %v640_v12, %v637_v11  ;;  %v643_v17 = vld [vmem:[#allocation4 + $0x1e0] sm:$0xff]  ;;  %v646_v18 = vld [vmem:[#allocation4 + $0x1f8] sm:$0xff] }
  0x82   : > { %7339 = vmatpush1.bf16.msra.mxu0 %v7338_v9  ;;  %v7344_v16 = vpack.c.bf16 %v647_v14, %v644_v13  ;;  %v650_v19 = vld [vmem:[#allocation4 + $0x218] sm:$0xff]  ;;  %v653_v20 = vld [vmem:[#allocation4 + $0x230] sm:$0xff]  ;;  %v7346_v21 = vpack.c.bf16 %v646_v18, %v643_v17  ;;  %v652_v24 = vld [vmem:[#allocation4 + $0x228] sm:$0xff] }
  0x83   : > { %7341 = vmatprep.subr.bf16.mxu0 %v7340_v10  ;;  %v7348_v22 = vpack.c.bf16 %v653_v20, %v650_v19  ;;  %v649_v23 = vld [vmem:[#allocation4 + $0x210] sm:$0xff]  ;;  %v656_v25 = vld [vmem:[#allocation4 + $0x248] sm:$0xff]  ;;  %v659_v26 = vld [vmem:[#allocation4 + $0x260] sm:$0xff] }
  0x84   : > { %v421_v27 = vld [vmem:[%s8588_s14] sm:$0xff]  ;;  %v658_v29 = vld [vmem:[#allocation4 + $0x258] sm:$0xff]  ;;  %v422_v30 = vld [vmem:[%s8588_s14 + $0x8] sm:$0xff]  ;;  %v7350_v31 = vpack.c.bf16 %v652_v24, %v649_v23  ;;  %v7352_v35 = vpack.c.bf16 %v659_v26, %v656_v25 }
  0x85   : > { %v655_v28 = vld [vmem:[#allocation4 + $0x240] sm:$0xff]  ;;  %455 = vst.msk [vmem:[#allocation2 + $0x19] sm:$0xff] %vm454_vm0, %v421_v27  ;;  %456 = vst.msk [vmem:[#allocation2 + $0x21] sm:$0xff] %vm454_vm0, %v422_v30  ;;  %v423_v32 = vld [vmem:[%s8588_s14 + $0x10] sm:$0xff] }
  0x86   : > { %7343 = vmatpush1.bf16.msra.mxu0 %v7342_v15  ;;  %v424_v33 = vld [vmem:[%s8588_s14 + $0x18] sm:$0xff]  ;;  %v425_v34 = vld [vmem:[%s8588_s14 + $0x20] sm:$0xff]  ;;  %v665_v37 = vld [vmem:[#allocation4 + $0x290] sm:$0xff]  ;;  %457 = vst.msk [vmem:[#allocation2 + $0x31] sm:$0xff] %vm454_vm0, %v423_v32  ;;  %v7354_v45 = vpack.c.bf16 %v658_v29, %v655_v28 }
  0x87   : > { %7345 = vmatprep.subr.bf16.mxu0 %v7344_v16  ;;  %v662_v36 = vld [vmem:[#allocation4 + $0x278] sm:$0xff]  ;;  %458 = vst.msk [vmem:[#allocation2 + $0x39] sm:$0xff] %vm454_vm0, %v424_v33  ;;  %459 = vst.msk [vmem:[#allocation2 + $0x49] sm:$0xff] %vm454_vm0, %v425_v34  ;;  %v426_v38 = vld [vmem:[%s8588_s14 + $0x28] sm:$0xff] }
  0x88   : > { %460 = vst.msk [vmem:[#allocation2 + $0x51] sm:$0xff] %vm454_vm0, %v426_v38  ;;  %v427_v39 = vld [vmem:[%s8588_s14 + $0x30] sm:$0xff]  ;;  %v428_v40 = vld [vmem:[%s8588_s14 + $0x38] sm:$0xff]  ;;  %v429_v41 = vld [vmem:[%s8588_s14 + $0x40] sm:$0xff]  ;;  %v7356_v49 = vpack.c.bf16 %v665_v37, %v662_v36 }
  0x89   : > { %v661_v42 = vld [vmem:[#allocation4 + $0x270] sm:$0xff]  ;;  %v664_v43 = vld [vmem:[#allocation4 + $0x288] sm:$0xff]  ;;  %461 = vst.msk [vmem:[#allocation2 + $0x61] sm:$0xff] %vm454_vm0, %v427_v39  ;;  %462 = vst.msk [vmem:[#allocation2 + $0x69] sm:$0xff] %vm454_vm0, %v428_v40 }
  0x8a   : > { %7347 = vmatpush1.bf16.msra.mxu0 %v7346_v21  ;;  %463 = vst.msk [vmem:[#allocation2 + $0x79] sm:$0xff] %vm454_vm0, %v429_v41  ;;  %v430_v44 = vld [vmem:[%s8588_s14 + $0x48] sm:$0xff]  ;;  %v431_v46 = vld [vmem:[%s8588_s14 + $0x50] sm:$0xff]  ;;  %v432_v47 = vld [vmem:[%s8588_s14 + $0x58] sm:$0xff]  ;;  %v7358_v58 = vpack.c.bf16 %v664_v43, %v661_v42 }
  0x8b   : > { %7349 = vmatprep.subr.bf16.mxu0 %v7348_v22  ;;  %464 = vst.msk [vmem:[#allocation2 + $0x81] sm:$0xff] %vm454_vm0, %v430_v44  ;;  %v537_v48 = vld [vmem:[#allocation4 + $0x10] sm:$0xff]  ;;  %465 = vst.msk [vmem:[#allocation2 + $0x91] sm:$0xff] %vm454_vm0, %v431_v46  ;;  %v540_v50 = vld [vmem:[#allocation4 + $0x28] sm:$0xff] }
  0x8c   : > { %466 = vst.msk [vmem:[#allocation2 + $0x99] sm:$0xff] %vm454_vm0, %v432_v47  ;;  %v543_v51 = vld [vmem:[#allocation4 + $0x40] sm:$0xff]  ;;  %v546_v52 = vld [vmem:[#allocation4 + $0x58] sm:$0xff]  ;;  %v668_v53 = vld [vmem:[#allocation4 + $0x2a8] sm:$0xff]  ;;  %v7432_v55 = vpack.c.bf16 %v540_v50, %v537_v48 }
  0x8d   : > { %v671_v54 = vld [vmem:[#allocation4 + $0x2c0] sm:$0xff]  ;;  %v7436_v56 = vpack.c.bf16 %v546_v52, %v543_v51  ;;  %v670_v61 = vld [vmem:[#allocation4 + $0x2b8] sm:$0xff]  ;;  %v677_v63 = vld [vmem:[#allocation4 + $0x2f0] sm:$0xff] }
  0x8e   : > { %7351 = vmatpush1.bf16.msra.mxu0 %v7350_v31  ;;  %v433_v57 = vld [vmem:[%s8588_s14 + $0x60] sm:$0xff]  ;;  %7433 = vmatprep.subr.bf16.mxu1 %v7432_v55  ;;  %v7360_v59 = vpack.c.bf16 %v671_v54, %v668_v53  ;;  %v674_v62 = vld [vmem:[#allocation4 + $0x2d8] sm:$0xff]  ;;  %v673_v1 = vld [vmem:[#allocation4 + $0x2d0] sm:$0xff] }
  0x8f   : > { %7353 = vmatprep.subr.bf16.mxu0 %v7352_v35  ;;  %467 = vst.msk [vmem:[#allocation2 + $0xa9] sm:$0xff] %vm454_vm0, %v433_v57  ;;  %v667_v60 = vld [vmem:[#allocation4 + $0x2a0] sm:$0xff]  ;;  %7435 = vmatpush3.bf16.msra.mxu1 %v7432_v55  ;;  %v676_v2 = vld [vmem:[#allocation4 + $0x2e8] sm:$0xff]  ;;  %v633_v3 = vld [vmem:[#allocation4 + $0x190] sm:$0xff]  ;;  %v7364_v4 = vpack.c.bf16 %v677_v63, %v674_v62 }
  0x90   : > { %7437 = vmatprep.subr.bf16.mxu1 %v7436_v56  ;;  %v7362_v0 = vpack.c.bf16 %v670_v61, %v667_v60  ;;  %v549_v5 = vld [vmem:[#allocation4 + $0x70] sm:$0xff]  ;;  %v552_v6 = vld [vmem:[#allocation4 + $0x88] sm:$0xff]  ;;  %v555_v11 = vld [vmem:[#allocation4 + $0xa0] sm:$0xff]  ;;  %v7366_v17 = vpack.c.bf16 %v676_v2, %v673_v1 }
  0x91   : > { %v434_v7 = vld [vmem:[%s8588_s14 + $0x68] sm:$0xff]  ;;  %v7440_v10 = vpack.c.bf16 %v552_v6, %v549_v5  ;;  %v558_v12 = vld [vmem:[#allocation4 + $0xb8] sm:$0xff]  ;;  %v561_v14 = vld [vmem:[#allocation4 + $0xd0] sm:$0xff] }
  0x92   : > { %7355 = vmatpush1.bf16.msra.mxu0 %v7354_v45  ;;  %v636_v9 = vld [vmem:[#allocation4 + $0x1a8] sm:$0xff]  ;;  %468 = vst.msk [vmem:[#allocation2 + $0xb1] sm:$0xff] %vm454_vm0, %v434_v7  ;;  %v7444_v13 = vpack.c.bf16 %v558_v12, %v555_v11  ;;  %v435_v16 = vld [vmem:[%s8588_s14 + $0x70] sm:$0xff]  ;;  %v436_v18 = vld [vmem:[%s8588_s14 + $0x78] sm:$0xff] }
  0x93   : > { %7357 = vmatprep.subr.bf16.mxu0 %v7356_v49  ;;  %7439 = vmatpush3.bf16.msra.mxu1 %v7436_v56  ;;  %v564_v15 = vld [vmem:[#allocation4 + $0xe8] sm:$0xff]  ;;  %469 = vst.msk [vmem:[#allocation2 + $0xc1] sm:$0xff] %vm454_vm0, %v435_v16  ;;  %v7368_v19 = vpack.c.bf16 %v636_v9, %v633_v3  ;;  %v639_v20 = vld [vmem:[#allocation4 + $0x1c0] sm:$0xff]  ;;  %470 = vst.msk [vmem:[#allocation2 + $0xc9] sm:$0xff] %vm454_vm0, %v436_v18 }
  0x94   : > { %7441 = vmatprep.subr.bf16.mxu1 %v7440_v10  ;;  %v642_v21 = vld [vmem:[#allocation4 + $0x1d8] sm:$0xff]  ;;  %v7448_v22 = vpack.c.bf16 %v564_v15, %v561_v14  ;;  %v8738_v23 = vld [vmem:[#allocation2] sm:$0xff]  ;;  %v438_v28 = vld [vmem:[%s8588_s14 + $0x88] sm:$0xff] }
  0x95   : > { %v437_v24 = vld [vmem:[%s8588_s14 + $0x80] sm:$0xff]  ;;  %v570_v26 = vld [vmem:[#allocation4 + $0x118] sm:$0xff]  ;;  %6848 = vmatprep.mubr.f32.mxu1 %v8738_v23  ;;  %v439_v29 = vld [vmem:[%s8588_s14 + $0x90] sm:$0xff]  ;;  %v7372_v30 = vpack.c.bf16 %v642_v21, %v639_v20  ;;  %472 = vst.msk [vmem:[#allocation2 + $0xe1] sm:$0xff] %vm454_vm0, %v438_v28 }
  0x96   : > { %7359 = vmatpush1.bf16.msra.mxu0 %v7358_v58  ;;  %v567_v25 = vld [vmem:[#allocation4 + $0x100] sm:$0xff]  ;;  %471 = vst.msk [vmem:[#allocation2 + $0xd9] sm:$0xff] %vm454_vm0, %v437_v24  ;;  %v8743_v27 = vld [vmem:[#allocation2 + $0x18] sm:$0xff]  ;;  %v645_v31 = vld [vmem:[#allocation4 + $0x1f0] sm:$0xff] }
  0x97   : > { %7361 = vmatprep.subr.bf16.mxu0 %v7360_v59  ;;  %7443 = vmatpush3.bf16.msra.mxu1 %v7440_v10  ;;  %473 = vst.msk [vmem:[#allocation2 + $0xf1] sm:$0xff] %vm454_vm0, %v439_v29  ;;  %v440_v32 = vld [vmem:[%s8588_s14 + $0x98] sm:$0xff]  ;;  %v648_v33 = vld [vmem:[#allocation4 + $0x208] sm:$0xff]  ;;  %v7452_v34 = vpack.c.bf16 %v570_v26, %v567_v25  ;;  %v573_v35 = vld [vmem:[#allocation4 + $0x130] sm:$0xff] }
  0x98   : > { %7445 = vmatprep.subr.bf16.mxu1 %v7444_v13  ;;  %474 = vst.msk [vmem:[#allocation2 + $0xf9] sm:$0xff] %vm454_vm0, %v440_v32  ;;  %v441_v36 = vld [vmem:[%s8588_s14 + $0xa0] sm:$0xff]  ;;  %v576_v37 = vld [vmem:[#allocation4 + $0x148] sm:$0xff]  ;;  %v443_v39 = vld [vmem:[%s8588_s14 + $0xb0] sm:$0xff]  ;;  %v7376_v42 = vpack.c.bf16 %v648_v33, %v645_v31 }
  0x99   : > { %475 = vst.msk [vmem:[#allocation2 + $0x109] sm:$0xff] %vm454_vm0, %v441_v36  ;;  %v442_v38 = vld [vmem:[%s8588_s14 + $0xa8] sm:$0xff]  ;;  %v8757_v40 = vld [vmem:[#allocation2 + $0x20] sm:$0xff]  ;;  %477 = vst.msk [vmem:[#allocation2 + $0x121] sm:$0xff] %vm454_vm0, %v443_v39  ;;  %v7456_v45 = vpack.c.bf16 %v576_v37, %v573_v35 }
  0x9a   : > { %7363 = vmatpush1.bf16.msra.mxu0 %v7362_v0  ;;  %476 = vst.msk [vmem:[#allocation2 + $0x111] sm:$0xff] %vm454_vm0, %v442_v38  ;;  %v444_v41 = vld [vmem:[%s8588_s14 + $0xb8] sm:$0xff]  ;;  %v651_v43 = vld [vmem:[#allocation4 + $0x220] sm:$0xff]  ;;  %v8765_v48 = vld [vmem:[#allocation2 + $0x28] sm:$0xff] }
  0x9b   : > { %7365 = vmatprep.subr.bf16.mxu0 %v7364_v4  ;;  %7447 = vmatpush3.bf16.msra.mxu1 %v7444_v13  ;;  %478 = vst.msk [vmem:[#allocation2 + $0x129] sm:$0xff] %vm454_vm0, %v444_v41  ;;  %v654_v44 = vld [vmem:[#allocation4 + $0x238] sm:$0xff]  ;;  %v579_v46 = vld [vmem:[#allocation4 + $0x160] sm:$0xff]  ;;  %v657_v51 = vld [vmem:[#allocation4 + $0x250] sm:$0xff] }
  0x9c   : > { %7449 = vmatprep.subr.bf16.mxu1 %v7448_v22  ;;  %v582_v47 = vld [vmem:[#allocation4 + $0x178] sm:$0xff]  ;;  %v7380_v49 = vpack.c.bf16 %v654_v44, %v651_v43  ;;  %v660_v52 = vld [vmem:[#allocation4 + $0x268] sm:$0xff]  ;;  %v445_v53 = vld [vmem:[%s8588_s14 + $0xc0] sm:$0xff] }
  0x9d   : > { %v7460_v50 = vpack.c.bf16 %v582_v47, %v579_v46  ;;  %479 = vst.msk [vmem:[#allocation2 + $0x139] sm:$0xff] %vm454_vm0, %v445_v53  ;;  %v8771_v54 = vld [vmem:[#allocation2 + $0x30] sm:$0xff]  ;;  %v7384_v55 = vpack.c.bf16 %v660_v52, %v657_v51  ;;  %v446_v56 = vld [vmem:[%s8588_s14 + $0xc8] sm:$0xff]  ;;  %v663_v57 = vld [vmem:[#allocation4 + $0x280] sm:$0xff] }
  0x9e   : > { %7367 = vmatpush1.bf16.msra.mxu0 %v7366_v17  ;;  %10781 = vst [vmem:[#allocation10_spill] sm:$0xff] %v8771_v54  ;;  %v666_v58 = vld [vmem:[#allocation4 + $0x298] sm:$0xff]  ;;  %480 = vst.msk [vmem:[#allocation2 + $0x141] sm:$0xff] %vm454_vm0, %v446_v56  ;;  %v8779_v60 = vld [vmem:[#allocation2 + $0x8] sm:$0xff] }
  0x9f   : > { %7369 = vmatprep.subr.bf16.mxu0 %v7368_v19  ;;  %7451 = vmatpush3.bf16.msra.mxu1 %v7448_v22  ;;  %v8777_v59 = vld [vmem:[#allocation2 + $0x38] sm:$0xff]  ;;  %v8781_v61 = vld [vmem:[#allocation2 + $0x10] sm:$0xff]  ;;  %v7388_v62 = vpack.c.bf16 %v666_v58, %v663_v57  ;;  %v672_v0 = vld [vmem:[#allocation4 + $0x2c8] sm:$0xff] }
  0xa0   : > { %7453 = vmatprep.subr.bf16.mxu1 %v7452_v34  ;;  %10782 = vst [vmem:[#allocation11_spill] sm:$0xff] %v8777_v59  ;;  %v669_v63 = vld [vmem:[#allocation4 + $0x2b0] sm:$0xff]  ;;  %v8785_v1 = vld [vmem:[#allocation2 + $0x40] sm:$0xff]  ;;  %v8793_v4 = vld [vmem:[#allocation2 + $0x48] sm:$0xff] }
  0xa1   : > { %744 = vmatmul.mubr.f32.vlgmr.msra.gmra.mrb[0].mxu0 %v8743_v27  ;;  %10783 = vst [vmem:[#allocation12_spill] sm:$0xff] %v8785_v1  ;;  %v7392_v2 = vpack.c.bf16 %v672_v0, %v669_v63  ;;  %v447_v3 = vld [vmem:[%s8588_s14 + $0xd0] sm:$0xff]  ;;  %10784 = vst [vmem:[#allocation13_spill] sm:$0xff] %v8793_v4  ;;  %v448_v5 = vld [vmem:[%s8588_s14 + $0xd8] sm:$0xff] }
  0xa2   : > { %7371 = vmatpush3.bf16.msra.mxu0 %v7368_v19  ;;  %749 = vmatprep.mubr.f32.mxu0 %v10766_v8  ;;  %481 = vst.msk [vmem:[#allocation2 + $0x151] sm:$0xff] %vm454_vm0, %v447_v3  ;;  %482 = vst.msk [vmem:[#allocation2 + $0x159] sm:$0xff] %vm454_vm0, %v448_v5  ;;  %v8801_v6 = vld [vmem:[#allocation2 + $0x50] sm:$0xff]  ;;  %v8807_v7 = vld [vmem:[#allocation2 + $0x58] sm:$0xff] }
  0xa3   : > { %7373 = vmatprep.subr.bf16.mxu0 %v7372_v30  ;;  %7455 = vmatpush3.bf16.msra.mxu1 %v7452_v34  ;;  %v2014_v9 = vld [vmem:[#allocation4 + $0x310] sm:$0xff]  ;;  %v2017_v10 = vld [vmem:[#allocation4 + $0x328] sm:$0xff]  ;;  %v449_v12 = vld [vmem:[%s8588_s14 + $0xe0] sm:$0xff] }
  0xa4   : > { %7457 = vmatprep.subr.bf16.mxu1 %v7456_v45  ;;  %v7496_v11 = vpack.c.bf16 %v2017_v10, %v2014_v9  ;;  %483 = vst.msk [vmem:[#allocation2 + $0x169] sm:$0xff] %vm454_vm0, %v449_v12  ;;  %v8815_v13 = vld [vmem:[#allocation2 + $0x60] sm:$0xff]  ;;  %v2023_v15 = vld [vmem:[#allocation4 + $0x358] sm:$0xff]  ;;  %v450_v17 = vld [vmem:[%s8588_s14 + $0xe8] sm:$0xff] }
  0xa5   : > { %750 = vmatmul.mubr.f32.gmra.mrb[2].mxu0 %v8757_v40  ;;  %v2020_v14 = vld [vmem:[#allocation4 + $0x340] sm:$0xff]  ;;  %484 = vst.msk [vmem:[#allocation2 + $0x171] sm:$0xff] %vm454_vm0, %v450_v17  ;;  %v8823_v18 = vld [vmem:[#allocation2 + $0x68] sm:$0xff]  ;;  %v2026_v19 = vld [vmem:[#allocation4 + $0x370] sm:$0xff] }
  0xa6   : > { %755 = vmatprep.mubr.f32.mxu0 %v10766_v8  ;;  %7375 = vmatpush3.bf16.msra.mxu0 %v7372_v30  ;;  %v7500_v16 = vpack.c.bf16 %v2023_v15, %v2020_v14  ;;  %v2029_v20 = vld [vmem:[#allocation4 + $0x388] sm:$0xff]  ;;  %v675_v22 = vld [vmem:[#allocation4 + $0x2e0] sm:$0xff]  ;;  %v678_v24 = vld [vmem:[#allocation4 + $0x2f8] sm:$0xff] }
  0xa7   : > { %7377 = vmatprep.subr.bf16.mxu0 %v7376_v42  ;;  %7459 = vmatpush3.bf16.msra.mxu1 %v7456_v45  ;;  %v7504_v21 = vpack.c.bf16 %v2029_v20, %v2026_v19  ;;  %v8829_v25 = vld [vmem:[#allocation2 + $0x70] sm:$0xff]  ;;  %v7396_v26 = vpack.c.bf16 %v678_v24, %v675_v22  ;;  %v2032_v28 = vld [vmem:[#allocation4 + $0x3a0] sm:$0xff]  ;;  %v2035_v29 = vld [vmem:[#allocation4 + $0x3b8] sm:$0xff] }
  0xa8   : > { %7461 = vmatprep.subr.bf16.mxu1 %v7460_v50  ;;  %v7508_v30 = vpack.c.bf16 %v2035_v29, %v2032_v28  ;;  %v451_v31 = vld [vmem:[%s8588_s14 + $0xf0] sm:$0xff]  ;;  %v8835_v32 = vld [vmem:[#allocation2 + $0x78] sm:$0xff]  ;;  %v8839_v33 = vld [vmem:[#allocation2 + $0x80] sm:$0xff] }
  0xa9   : > { %756 = vmatmul.mubr.f32.gmra.mrb[4].mxu0 %v8765_v48  ;;  %485 = vst.msk [vmem:[#allocation2 + $0x181] sm:$0xff] %vm454_vm0, %v451_v31  ;;  %v2038_v34 = vld [vmem:[#allocation4 + $0x3d0] sm:$0xff]  ;;  %v2041_v35 = vld [vmem:[#allocation4 + $0x3e8] sm:$0xff]  ;;  %v452_v37 = vld [vmem:[%s8588_s14 + $0xf8] sm:$0xff] }
  0xaa   : > { %760 = vmatprep.mubr.f32.mxu0 %v10766_v8  ;;  %7379 = vmatpush3.bf16.msra.mxu0 %v7376_v42  ;;  %v7512_v36 = vpack.c.bf16 %v2041_v35, %v2038_v34  ;;  %v8845_v38 = vld [vmem:[#allocation2 + $0x88] sm:$0xff]  ;;  %486 = vst.msk [vmem:[#allocation2 + $0x189] sm:$0xff] %vm454_vm0, %v452_v37  ;;  %v8849_v39 = vld [vmem:[#allocation2 + $0x90] sm:$0xff]  ;;  %v2044_v41 = vld [vmem:[#allocation4 + $0x400] sm:$0xff] }
  0xab   : > { %7381 = vmatprep.subr.bf16.mxu0 %v7380_v49  ;;  %7463 = vmatpush3.bf16.msra.mxu1 %v7460_v50  ;;  %v2047_v42 = vld [vmem:[#allocation4 + $0x418] sm:$0xff]  ;;  %v8857_v45 = vld [vmem:[#allocation2 + $0xa0] sm:$0xff]  ;;  %v2050_v46 = vld [vmem:[#allocation4 + $0x430] sm:$0xff] }
  0xac   : > { %7497 = vmatprep.subr.bf16.mxu1 %v7496_v11  ;;  %v7516_v43 = vpack.c.bf16 %v2047_v42, %v2044_v41  ;;  %v8854_v44 = vld [vmem:[#allocation2 + $0x98] sm:$0xff]  ;;  %v2053_v47 = vld [vmem:[#allocation4 + $0x448] sm:$0xff]  ;;  %v8865_v51 = vld [vmem:[#allocation2 + $0xb0] sm:$0xff] }
  0xad   : > { %761 = vmatmul.mubr.f32.gmra.mrb[6].mxu0 %v8771_v54  ;;  %v8862_v50 = vld [vmem:[#allocation2 + $0xa8] sm:$0xff]  ;;  %v2056_v52 = vld [vmem:[#allocation4 + $0x460] sm:$0xff]  ;;  %v2059_v53 = vld [vmem:[#allocation4 + $0x478] sm:$0xff] }
  0xae   : > { %766 = vmatprep.mubr.f32.mxu0 %v10766_v8  ;;  %7383 = vmatpush3.bf16.msra.mxu0 %v7380_v49  ;;  %v7520_v49 = vpack.c.bf16 %v2053_v47, %v2050_v46  ;;  %v8870_v56 = vld [vmem:[#allocation2 + $0xb8] sm:$0xff]  ;;  %v8873_v57 = vld [vmem:[#allocation2 + $0xc0] sm:$0xff]  ;;  %v8878_v58 = vld [vmem:[#allocation2 + $0xc8] sm:$0xff] }
  0xaf   : > { %7385 = vmatprep.subr.bf16.mxu0 %v7384_v55  ;;  %6849 = vmatmul.mubr.f32.vlgmr.msra.gmra.mrb[0].mxu1 %v8779_v60  ;;  %v539_v63 = vld [vmem:[#allocation4 + $0x20] sm:$0xff]  ;;  %v8881_v0 = vld [vmem:[#allocation2 + $0xd0] sm:$0xff]  ;;  %v8886_v3 = vld [vmem:[#allocation2 + $0xd8] sm:$0xff] }
  0xb0   : > { %6851 = vmatprep.mubr.f32.mxu1 %v8781_v61  ;;  %7499 = vmatpush3.bf16.msra.mxu1 %v7496_v11  ;;  %v8889_v5 = vld [vmem:[#allocation2 + $0xe0] sm:$0xff]  ;;  %v8894_v9 = vld [vmem:[#allocation2 + $0xe8] sm:$0xff]  ;;  %v8897_v10 = vld [vmem:[#allocation2 + $0xf0] sm:$0xff] }
  0xb1   : > { %767 = vmatmul.mubr.f32.gmra.mrb[8].mxu0 %v8777_v59  ;;  %7501 = vmatprep.subr.bf16.mxu1 %v7500_v16  ;;  %v8902_v11 = vld [vmem:[#allocation2 + $0xf8] sm:$0xff]  ;;  %v8905_v12 = vld [vmem:[#allocation2 + $0x100] sm:$0xff]  ;;  %v8910_v14 = vld [vmem:[#allocation2 + $0x108] sm:$0xff] }
  0xb2   : > { %772 = vmatprep.mubr.f32.mxu0 %v10766_v8  ;;  %7387 = vmatpush3.bf16.msra.mxu0 %v7384_v55  ;;  %v7524_v55 = vpack.c.bf16 %v2059_v53, %v2056_v52  ;;  %v8913_v15 = vld [vmem:[#allocation2 + $0x110] sm:$0xff]  ;;  %v8921_v17 = vld [vmem:[#allocation2 + $0x120] sm:$0xff]  ;;  %v8926_v19 = vld [vmem:[#allocation2 + $0x128] sm:$0xff] }
  0xb3   : > { %7389 = vmatprep.subr.bf16.mxu0 %v7388_v62  ;;  %6852 = vmatmul.mubr.f32.gmra.mrb[2].mxu1 %v8743_v27  ;;  %v8929_v20 = vld [vmem:[#allocation2 + $0x130] sm:$0xff]  ;;  %v8937_v22 = vld [vmem:[#allocation2 + $0x140] sm:$0xff]  ;;  %v8942_v24 = vld [vmem:[#allocation2 + $0x148] sm:$0xff] }
  0xb4   : > { %6854 = vmatprep.mubr.f32.mxu1 %v8757_v40  ;;  %7503 = vmatpush3.bf16.msra.mxu1 %v7500_v16  ;;  %v8918_v16 = vld [vmem:[#allocation2 + $0x118] sm:$0xff]  ;;  %v8953_v29 = vld [vmem:[#allocation2 + $0x160] sm:$0xff]  ;;  %v8961_v31 = vld [vmem:[#allocation2 + $0x170] sm:$0xff] }
  0xb5   : > { %773 = vmatmul.mubr.f32.gmra.mrb[10].mxu0 %v8785_v1  ;;  %7505 = vmatprep.subr.bf16.mxu1 %v7504_v21  ;;  %v8950_v28 = vld [vmem:[#allocation2 + $0x158] sm:$0xff]  ;;  %v9037_v35 = vld [vmem:[#allocation2 + $0x180] sm:$0xff]  ;;  %v9049_v37 = vld [vmem:[#allocation2 + $0x190] sm:$0xff] }
  0xb6   : > { %777 = vmatprep.mubr.f32.mxu0 %v10766_v8  ;;  %7391 = vmatpush3.bf16.msra.mxu0 %v7388_v62  ;;  %v536_v62 = vld [vmem:[#allocation4 + $0x8] sm:$0xff]  ;;  %v8966_v34 = vld [vmem:[#allocation2 + $0x178] sm:$0xff]  ;;  %v535_v41 = vld [vmem:[#allocation4] sm:$0xff] }
  0xb7   : > { %7393 = vmatprep.subr.bf16.mxu0 %v7392_v2  ;;  %6855 = vmatmul.mubr.f32.gmra.mrb[4].mxu1 %v8765_v48  ;;  %v538_v42 = vld [vmem:[#allocation4 + $0x18] sm:$0xff]  ;;  %v545_v46 = vld [vmem:[#allocation4 + $0x50] sm:$0xff]  ;;  %v544_v53 = vld [vmem:[#allocation4 + $0x48] sm:$0xff] }
  0xb8   : > { %6857 = vmatprep.mubr.f32.mxu1 %v8771_v54  ;;  %7507 = vmatpush3.bf16.msra.mxu1 %v7504_v21  ;;  %v8934_v21 = vld [vmem:[#allocation2 + $0x138] sm:$0xff]  ;;  %v7402_v47 = vpack.c.bf16 %v538_v42, %v535_v41  ;;  %v541_v52 = vld [vmem:[#allocation4 + $0x30] sm:$0xff] }
  0xb9   : > { %778 = vmatmul.mubr.f32.gmra.mrb[12].mxu0 %v8793_v4  ;;  %7509 = vmatprep.subr.bf16.mxu1 %v7508_v30  ;;  %v554_v41 = vld [vmem:[#allocation4 + $0x98] sm:$0xff]  ;;  %v557_v42 = vld [vmem:[#allocation4 + $0xb0] sm:$0xff] }
  0xba   : > { %783 = vmatprep.mubr.f32.mxu0 %v10766_v8  ;;  %7395 = vmatpush3.bf16.msra.mxu0 %v7392_v2  ;;  %v7400_v2 = vpack.c.bf16 %v539_v63, %v536_v62  ;;  %v551_v62 = vld [vmem:[#allocation4 + $0x80] sm:$0xff]  ;;  %v7406_v63 = vpack.c.bf16 %v544_v53, %v541_v52  ;;  %v556_v52 = vld [vmem:[#allocation4 + $0xa8] sm:$0xff] }
  0xbb   : > { %6858 = vmatmul.mubr.f32.gmra.mrb[6].mxu1 %v8777_v59  ;;  %7397 = vmatprep.subr.bf16.mxu0 %v7396_v26  ;;  %v563_v53 = vld [vmem:[#allocation4 + $0xe0] sm:$0xff] }
  0xbc   : > { %6860 = vmatprep.mubr.f32.mxu1 %v8785_v1  ;;  %7511 = vmatpush3.bf16.msra.mxu1 %v7508_v30  ;;  %v8958_v30 = vld [vmem:[#allocation2 + $0x168] sm:$0xff] }
  0xbd   : > { %784 = vmatmul.mubr.f32.gmra.mrb[14].mxu0 %v8801_v6  ;;  %7513 = vmatprep.subr.bf16.mxu1 %v7512_v36 }
  0xbe   : > { %789 = vmatprep.mubr.f32.mxu0 %v10766_v8  ;;  %7399 = vmatpush3.bf16.msra.mxu0 %v7396_v26  ;;  %v8945_v26 = vld [vmem:[#allocation2 + $0x150] sm:$0xff] }
  0xbf   : > { %6861 = vmatmul.mubr.f32.gmra.mrb[8].mxu1 %v8793_v4  ;;  %7401 = vmatprep.subr.bf16.mxu0 %v7400_v2 }
  0xc0   : > { %6863 = vmatprep.mubr.f32.mxu1 %v8801_v6  ;;  %7515 = vmatpush3.bf16.msra.mxu1 %v7512_v36  ;;  %v9043_v36 = vld [vmem:[#allocation2 + $0x188] sm:$0xff] }
  0xc1   : > { %790 = vmatmul.mubr.f32.gmra.mrb[16].mxu0 %v8807_v7  ;;  %7517 = vmatprep.subr.bf16.mxu1 %v7516_v43 }
  0xc2   : > { %794 = vmatprep.mubr.f32.mxu0 %v10766_v8 }
  0xc3   : > { %6864 = vmatmul.mubr.f32.gmra.mrb[10].mxu1 %v8807_v7 }
  0xc4   : > { %6866 = vmatprep.mubr.f32.mxu1 %v8815_v13  ;;  %7519 = vmatpush3.bf16.msra.mxu1 %v7516_v43  ;;  %v542_v43 = vld [vmem:[#allocation4 + $0x38] sm:$0xff] }
  0xc5   : > { %795 = vmatmul.mubr.f32.gmra.mrb[18].mxu0 %v8815_v13  ;;  %7521 = vmatprep.subr.bf16.mxu1 %v7520_v49 }
  0xc6   : > { %800 = vmatprep.mubr.f32.mxu0 %v10766_v8 }
  0xc7   : > { %6867 = vmatmul.mubr.f32.gmra.mrb[12].mxu1 %v8823_v18 }
  0xc8   : > { %6869 = vmatprep.mubr.f32.mxu1 %v8829_v25  ;;  %7523 = vmatpush3.bf16.msra.mxu1 %v7520_v49  ;;  %v7404_v49 = vpack.c.bf16 %v545_v46, %v542_v43  ;;  %v7412_v46 = vpack.c.bf16 %v557_v42, %v554_v41  ;;  %v569_v41 = vld [vmem:[#allocation4 + $0x110] sm:$0xff]  ;;  %v2011_v42 = vld [vmem:[#allocation2 + $0x1a8] sm:$0xff] }
  0xc9   : > { %801 = vmatmul.mubr.f32.gmra.mrb[20].mxu0 %v8823_v18  ;;  %7525 = vmatprep.subr.bf16.mxu1 %v7524_v55 }
  0xca   : > { %806 = vmatprep.mubr.f32.mxu0 %v10766_v8 }
  0xcb   : > { %6870 = vmatmul.mubr.f32.gmra.mrb[14].mxu1 %v8835_v32 }
  0xcc   : > { %6872 = vmatprep.mubr.f32.mxu1 %v8839_v33  ;;  %7527 = vmatpush3.bf16.msra.mxu1 %v7524_v55  ;;  %v548_v55 = vld [vmem:[#allocation4 + $0x68] sm:$0xff] }
  0xcd   : > { %807 = vmatmul.mubr.f32.gmra.mrb[22].mxu0 %v8829_v25  ;;  %v7408_v2 = vpack.c.bf16 %v551_v62, %v548_v55  ;;  %v2009_v55 = vld [vmem:[#allocation2 + $0x198] sm:$0xff]  ;;  %v2010_v62 = vld [vmem:[#allocation2 + $0x1a0] sm:$0xff] }
  0xce   : > { %811 = vmatprep.mubr.f32.mxu0 %v10766_v8 }
  0xcf   : > { %6873 = vmatmul.mubr.f32.gmra.mrb[16].mxu1 %v8845_v38 }
  0xd0   : > { %6875 = vmatprep.mubr.f32.mxu1 %v8849_v39 }
  0xd1   : > { %812 = vmatmul.mubr.f32.gmra.mrb[24].mxu0 %v8835_v32 }
  0xd2   : > { %817 = vmatprep.mubr.f32.mxu0 %v10766_v8 }
  0xd3   : > { %6876 = vmatmul.mubr.f32.gmra.mrb[18].mxu1 %v8854_v44 }
  0xd4   : > { %6878 = vmatprep.mubr.f32.mxu1 %v8857_v45 }
  0xd5   : > { %818 = vmatmul.mubr.f32.gmra.mrb[26].mxu0 %v8839_v33 }
  0xd6   : > { %823 = vmatprep.mubr.f32.mxu0 %v10766_v8 }
  0xd7   : > { %6879 = vmatmul.mubr.f32.gmra.mrb[20].mxu1 %v8862_v50 }
  0xd8   : > { %6881 = vmatprep.mubr.f32.mxu1 %v8865_v51 }
  0xd9   : > { %824 = vmatmul.mubr.f32.gmra.mrb[28].mxu0 %v8845_v38 }
  0xda   : > { %828 = vmatprep.mubr.f32.mxu0 %v10766_v8 }
  0xdb   : > { %6882 = vmatmul.mubr.f32.gmra.mrb[22].mxu1 %v8870_v56 }
  0xdc   : > { %6884 = vmatprep.mubr.f32.mxu1 %v8873_v57 }
  0xdd   : > { %829 = vmatmul.mubr.f32.gmra.mrb[30].mxu0 %v8849_v39 }
  0xde   : > { %834 = vmatprep.mubr.f32.mxu0 %v10766_v8 }
  0xdf   : > { %6885 = vmatmul.mubr.f32.gmra.mrb[24].mxu1 %v8878_v58 }
  0xe0   : > { %6887 = vmatprep.mubr.f32.mxu1 %v8881_v0 }
  0xe1   : > { %835 = vmatmul.mubr.f32.gmra.mrb[32].mxu0 %v8854_v44 }
  0xe2   : > { %840 = vmatprep.mubr.f32.mxu0 %v10766_v8 }
  0xe3   : > { %6888 = vmatmul.mubr.f32.gmra.mrb[26].mxu1 %v8886_v3 }
  0xe4   : > { %6890 = vmatprep.mubr.f32.mxu1 %v8889_v5 }
  0xe5   : > { %841 = vmatmul.mubr.f32.gmra.mrb[34].mxu0 %v8857_v45 }
  0xe6   : > { %845 = vmatprep.mubr.f32.mxu0 %v10766_v8 }
  0xe7   : > { %6891 = vmatmul.mubr.f32.gmra.mrb[28].mxu1 %v8894_v9 }
  0xe8   : > { %6893 = vmatprep.mubr.f32.mxu1 %v8897_v10 }
  0xe9   : > { %846 = vmatmul.mubr.f32.gmra.mrb[36].mxu0 %v8862_v50 }
  0xea   : > { %851 = vmatprep.mubr.f32.mxu0 %v10766_v8 }
  0xeb   : > { %6894 = vmatmul.mubr.f32.gmra.mrb[30].mxu1 %v8902_v11 }
  0xec   : > { %6896 = vmatprep.mubr.f32.mxu1 %v8905_v12 }
  0xed   : > { %852 = vmatmul.mubr.f32.gmra.mrb[38].mxu0 %v8865_v51 }
  0xee   : > { %857 = vmatprep.mubr.f32.mxu0 %v10766_v8 }
  0xef   : > { %6897 = vmatmul.mubr.f32.gmra.mrb[32].mxu1 %v8910_v14 }
  0xf0   : > { %6899 = vmatprep.mubr.f32.mxu1 %v8913_v15 }
  0xf1   : > { %858 = vmatmul.mubr.f32.gmra.mrb[40].mxu0 %v8870_v56 }
  0xf2   : > { %862 = vmatprep.mubr.f32.mxu0 %v10766_v8 }
  0xf3   : > { %6900 = vmatmul.mubr.f32.gmra.mrb[34].mxu1 %v8918_v16 }
  0xf4   : > { %6902 = vmatprep.mubr.f32.mxu1 %v8921_v17 }
  0xf5   : > { %863 = vmatmul.mubr.f32.gmra.mrb[42].mxu0 %v8873_v57 }
  0xf6   : > { %868 = vmatprep.mubr.f32.mxu0 %v10766_v8 }
  0xf7   : > { %6903 = vmatmul.mubr.f32.gmra.mrb[36].mxu1 %v8926_v19 }
  0xf8   : > { %6905 = vmatprep.mubr.f32.mxu1 %v8929_v20 }
  0xf9   : > { %869 = vmatmul.mubr.f32.gmra.mrb[44].mxu0 %v8878_v58 }
  0xfa   : > { %874 = vmatprep.mubr.f32.mxu0 %v10766_v8 }
  0xfb   : > { %6906 = vmatmul.mubr.f32.gmra.mrb[38].mxu1 %v8934_v21 }
  0xfc   : > { %6908 = vmatprep.mubr.f32.mxu1 %v8937_v22 }
  0xfd   : > { %875 = vmatmul.mubr.f32.gmra.mrb[46].mxu0 %v8881_v0 }
  0xfe   : > { %879 = vmatprep.mubr.f32.mxu0 %v10766_v8 }
  0xff   : > { %6909 = vmatmul.mubr.f32.gmra.mrb[40].mxu1 %v8942_v24 }
 0x100   : > { %6911 = vmatprep.mubr.f32.mxu1 %v8945_v26 }
 0x101   : > { %880 = vmatmul.mubr.f32.gmra.mrb[48].mxu0 %v8886_v3 }
 0x102   : > { %885 = vmatprep.mubr.f32.mxu0 %v10766_v8 }
 0x103   : > { %6912 = vmatmul.mubr.f32.gmra.mrb[42].mxu1 %v8950_v28 }
 0x104   : > { %6914 = vmatprep.mubr.f32.mxu1 %v8953_v29 }
 0x105   : > { %886 = vmatmul.mubr.f32.gmra.mrb[50].mxu0 %v8889_v5 }
 0x106   : > { %891 = vmatprep.mubr.f32.mxu0 %v10766_v8 }
 0x107   : > { %6915 = vmatmul.mubr.f32.gmra.mrb[44].mxu1 %v8958_v30 }
 0x108   : > { %6917 = vmatprep.mubr.f32.mxu1 %v8961_v31 }
 0x109   : > { %892 = vmatmul.mubr.f32.gmra.mrb[52].mxu0 %v8894_v9 }
 0x10a   : > { %896 = vmatprep.mubr.f32.mxu0 %v10766_v8 }
 0x10b   : > { %6918 = vmatmul.mubr.f32.gmra.mrb[46].mxu1 %v8966_v34 }
 0x10c   : > { %6952 = vmatprep.mubr.f32.mxu1 %v8771_v54 }
 0x10d   : > { %897 = vmatmul.mubr.f32.gmra.mrb[54].mxu0 %v8897_v10 }
 0x10e   : > { %902 = vmatprep.mubr.f32.mxu0 %v10766_v8 }
 0x10f   : > { %6953 = vmatmul.mubr.f32.vlgmr.msra.gmra.mrb[0].mxu1 %v8777_v59 }
 0x110   : > { %6955 = vmatprep.mubr.f32.mxu1 %v8785_v1 }
 0x111   : > { %903 = vmatmul.mubr.f32.gmra.mrb[56].mxu0 %v8902_v11 }
 0x112   : > { %908 = vmatprep.mubr.f32.mxu0 %v10766_v8 }
 0x113   : > { %6956 = vmatmul.mubr.f32.gmra.mrb[2].mxu1 %v8793_v4 }
 0x114   : > { %6958 = vmatprep.mubr.f32.mxu1 %v8801_v6 }
 0x115   : > { %909 = vmatmul.mubr.f32.gmra.mrb[58].mxu0 %v8905_v12 }
 0x116   : > { %913 = vmatprep.mubr.f32.mxu0 %v10766_v8 }
 0x117   : > { %6959 = vmatmul.mubr.f32.gmra.mrb[4].mxu1 %v8807_v7 }
 0x118   : > { %6961 = vmatprep.mubr.f32.mxu1 %v8815_v13 }
 0x119   : > { %914 = vmatmul.mubr.f32.gmra.mrb[60].mxu0 %v8910_v14 }
 0x11a   : > { %919 = vmatprep.mubr.f32.mxu0 %v10766_v8 }
 0x11b   : > { %6962 = vmatmul.mubr.f32.gmra.mrb[6].mxu1 %v8823_v18 }
 0x11c   : > { %6964 = vmatprep.mubr.f32.mxu1 %v8829_v25 }
 0x11d   : > { %920 = vmatmul.mubr.f32.gmra.mrb[62].mxu0 %v8913_v15 }
 0x11e   : > { %925 = vmatprep.mubr.f32.mxu0 %v10766_v8 }
 0x11f   : > { %6965 = vmatmul.mubr.f32.gmra.mrb[8].mxu1 %v8835_v32 }
 0x120   : > { %6967 = vmatprep.mubr.f32.mxu1 %v8839_v33 }
 0x121   : > { %926 = vmatmul.mubr.f32.gmra.mrb[64].mxu0 %v8918_v16 }
 0x122   : > { %930 = vmatprep.mubr.f32.mxu0 %v10766_v8 }
 0x123   : > { %6968 = vmatmul.mubr.f32.gmra.mrb[10].mxu1 %v8845_v38 }
 0x124   : > { %6970 = vmatprep.mubr.f32.mxu1 %v8849_v39 }
 0x125   : > { %931 = vmatmul.mubr.f32.gmra.mrb[66].mxu0 %v8921_v17 }
 0x126   : > { %936 = vmatprep.mubr.f32.mxu0 %v10766_v8 }
 0x127   : > { %6971 = vmatmul.mubr.f32.gmra.mrb[12].mxu1 %v8854_v44 }
 0x128   : > { %6973 = vmatprep.mubr.f32.mxu1 %v8857_v45 }
 0x129   : > { %937 = vmatmul.mubr.f32.gmra.mrb[68].mxu0 %v8926_v19 }
 0x12a   : > { %942 = vmatprep.mubr.f32.mxu0 %v10766_v8 }
 0x12b   : > { %6974 = vmatmul.mubr.f32.gmra.mrb[14].mxu1 %v8862_v50 }
 0x12c   : > { %6976 = vmatprep.mubr.f32.mxu1 %v8865_v51 }
 0x12d   : > { %943 = vmatmul.mubr.f32.gmra.mrb[70].mxu0 %v8929_v20 }
 0x12e   : > { %947 = vmatprep.mubr.f32.mxu0 %v10766_v8 }
 0x12f   : > { %6977 = vmatmul.mubr.f32.gmra.mrb[16].mxu1 %v8870_v56 }
 0x130   : > { %6979 = vmatprep.mubr.f32.mxu1 %v8873_v57 }
 0x131   : > { %948 = vmatmul.mubr.f32.gmra.mrb[72].mxu0 %v8934_v21 }
 0x132   : > { %953 = vmatprep.mubr.f32.mxu0 %v10766_v8 }
 0x133   : > { %6980 = vmatmul.mubr.f32.gmra.mrb[18].mxu1 %v8878_v58 }
 0x134   : > { %6982 = vmatprep.mubr.f32.mxu1 %v8881_v0 }
 0x135   : > { %954 = vmatmul.mubr.f32.gmra.mrb[74].mxu0 %v8937_v22 }
 0x136   : > { %959 = vmatprep.mubr.f32.mxu0 %v10766_v8 }
 0x137   : > { %6983 = vmatmul.mubr.f32.gmra.mrb[20].mxu1 %v8886_v3 }
 0x138   : > { %6985 = vmatprep.mubr.f32.mxu1 %v8889_v5 }
 0x139   : > { %960 = vmatmul.mubr.f32.gmra.mrb[76].mxu0 %v8942_v24 }
 0x13a   : > { %964 = vmatprep.mubr.f32.mxu0 %v10766_v8 }
 0x13b   : > { %6986 = vmatmul.mubr.f32.gmra.mrb[22].mxu1 %v8894_v9 }
 0x13c   : > { %6988 = vmatprep.mubr.f32.mxu1 %v8897_v10 }
 0x13d   : > { %965 = vmatmul.mubr.f32.gmra.mrb[78].mxu0 %v8945_v26 }
 0x13e   : > { %970 = vmatprep.mubr.f32.mxu0 %v10766_v8 }
 0x13f   : > { %6989 = vmatmul.mubr.f32.gmra.mrb[24].mxu1 %v8902_v11 }
 0x140   : > { %6991 = vmatprep.mubr.f32.mxu1 %v8905_v12 }
 0x141   : > { %971 = vmatmul.mubr.f32.gmra.mrb[80].mxu0 %v8950_v28 }
 0x142   : > { %976 = vmatprep.mubr.f32.mxu0 %v10766_v8 }
 0x143   : > { %6992 = vmatmul.mubr.f32.gmra.mrb[26].mxu1 %v8910_v14 }
 0x144   : > { %6994 = vmatprep.mubr.f32.mxu1 %v8913_v15 }
 0x145   : > { %977 = vmatmul.mubr.f32.gmra.mrb[82].mxu0 %v8953_v29 }
 0x146   : > { %981 = vmatprep.mubr.f32.mxu0 %v10766_v8 }
 0x147   : > { %6995 = vmatmul.mubr.f32.gmra.mrb[28].mxu1 %v8918_v16 }
 0x148   : > { %6997 = vmatprep.mubr.f32.mxu1 %v8921_v17 }
 0x149   : > { %982 = vmatmul.mubr.f32.gmra.mrb[84].mxu0 %v8958_v30 }
 0x14a   : > { %987 = vmatprep.mubr.f32.mxu0 %v10766_v8 }
 0x14b   : > { %6998 = vmatmul.mubr.f32.gmra.mrb[30].mxu1 %v8926_v19 }
 0x14c   : > { %7000 = vmatprep.mubr.f32.mxu1 %v8929_v20 }
 0x14d   : > { %988 = vmatmul.mubr.f32.gmra.mrb[86].mxu0 %v8961_v31 }
 0x14e   : > { %993 = vmatprep.mubr.f32.mxu0 %v10766_v8 }
 0x14f   : > { %7001 = vmatmul.mubr.f32.gmra.mrb[32].mxu1 %v8934_v21 }
 0x150   : > { %7003 = vmatprep.mubr.f32.mxu1 %v8937_v22 }
 0x151   : > { %994 = vmatmul.mubr.f32.gmra.mrb[88].mxu0 %v8966_v34 }
 0x152   : > { %998 = vmatprep.mubr.f32.mxu0 %v10766_v8 }
 0x153   : > { %7004 = vmatmul.mubr.f32.gmra.mrb[34].mxu1 %v8942_v24 }
 0x154   : > { %7006 = vmatprep.mubr.f32.mxu1 %v8945_v26 }
 0x155   : > { %999 = vmatmul.mubr.f32.gmra.mrb[90].mxu0 %v9037_v35 }
 0x156   : > { %1004 = vmatprep.mubr.f32.mxu0 %v10766_v8 }
 0x157   : > { %7007 = vmatmul.mubr.f32.gmra.mrb[36].mxu1 %v8950_v28 }
 0x158   : > { %7009 = vmatprep.mubr.f32.mxu1 %v8953_v29 }
 0x159   : > { %1005 = vmatmul.mubr.f32.gmra.mrb[92].mxu0 %v9043_v36 }
 0x15a   : > { %1010 = vmatprep.mubr.f32.mxu0 %v10766_v8  ;;  %v547_v8 = vld [vmem:[#allocation4 + $0x60] sm:$0xff] }
 0x15b   : > { %7010 = vmatmul.mubr.f32.gmra.mrb[38].mxu1 %v8958_v30 }
 0x15c   : > { %7012 = vmatprep.mubr.f32.mxu1 %v8961_v31 }
 0x15d   : > { %1011 = vmatmul.mubr.f32.gmra.mrb[94].mxu0 %v9049_v37 }
 0x15e   : > { %6744 = vmatprep.mubr.f32.mxu0 %v8743_v27  ;;  %v550_v27 = vld [vmem:[#allocation4 + $0x78] sm:$0xff] }
 0x15f   : > { %7013 = vmatmul.mubr.f32.gmra.mrb[40].mxu1 %v8966_v34  ;;  %v7410_v43 = vpack.c.bf16 %v550_v27, %v547_v8  ;;  %v566_v27 = vld [vmem:[#allocation4 + $0xf8] sm:$0xff] }
 0x160   : > { %7015 = vmatprep.mubr.f32.mxu1 %v9037_v35 }
 0x161   : > { %6745 = vmatmul.mubr.f32.vlgmr.msra.gmra.mrb[96].mxu0 %v8757_v40 }
 0x162   : > { %7403 = vmatpush1.bf16.msra.mxu0 %v7402_v47  ;;  %6747 = vmatprep.mubr.f32.mxu0 %v8765_v48  ;;  %v553_v47 = vld [vmem:[#allocation4 + $0x90] sm:$0xff] }
 0x163   : > { %7405 = vmatprep.subr.bf16.mxu0 %v7404_v49  ;;  %7016 = vmatmul.mubr.f32.gmra.mrb[42].mxu1 %v9043_v36  ;;  %v560_v49 = vld [vmem:[#allocation4 + $0xc8] sm:$0xff] }
 0x164   : > { %7018 = vmatprep.mubr.f32.mxu1 %v9049_v37  ;;  %v7416_v8 = vpack.c.bf16 %v563_v53, %v560_v49  ;;  %v571_v53 = vld [vmem:[#allocation4 + $0x120] sm:$0xff] }
 0x165   : > { %6748 = vmatmul.mubr.f32.gmra.mrb[98].mxu0 %v8771_v54  ;;  %v7420_v54 = vpack.c.bf16 %v569_v41, %v566_v27  ;;  %v580_v27 = vld [vmem:[#allocation4 + $0x168] sm:$0xff] }
 0x166   : > { %6750 = vmatprep.mubr.f32.mxu0 %v8777_v59  ;;  %7407 = vmatpush1.bf16.msra.mxu0 %v7406_v63  ;;  %v7414_v59 = vpack.c.bf16 %v556_v52, %v553_v47  ;;  %v559_v63 = vld [vmem:[#allocation4 + $0xc0] sm:$0xff]  ;;  %v2013_v41 = vld [vmem:[#allocation4 + $0x308] sm:$0xff] }
 0x167   : > { %7409 = vmatprep.subr.bf16.mxu0 %v7408_v2  ;;  %v562_v2 = vld [vmem:[#allocation4 + $0xd8] sm:$0xff]  ;;  %7019 = vmatmul.mubr.f32.gmra.mrb[44].mxu1 %v2009_v55  ;;  %v575_v47 = vld [vmem:[#allocation4 + $0x140] sm:$0xff] }
 0x168   : > { %7021 = vmatprep.mubr.f32.mxu1 %v2010_v62  ;;  %v574_v55 = vld [vmem:[#allocation4 + $0x138] sm:$0xff] }
 0x169   : > { %6751 = vmatmul.mubr.f32.gmra.mrb[100].mxu0 %v8785_v1  ;;  %v7418_v1 = vpack.c.bf16 %v562_v2, %v559_v63  ;;  %v578_v62 = vld [vmem:[#allocation4 + $0x158] sm:$0xff]  ;;  %v577_v2 = vld [vmem:[#allocation4 + $0x150] sm:$0xff] }
 0x16a   : > { %6753 = vmatprep.mubr.f32.mxu0 %v8793_v4  ;;  %7411 = vmatpush1.bf16.msra.mxu0 %v7410_v43  ;;  %v565_v4 = vld [vmem:[#allocation4 + $0xf0] sm:$0xff]  ;;  %v568_v43 = vld [vmem:[#allocation4 + $0x108] sm:$0xff] }
 0x16b   : > { %7413 = vmatprep.subr.bf16.mxu0 %v7412_v46  ;;  %7022 = vmatmul.mubr.f32.gmra.mrb[46].mxu1 %v2011_v42  ;;  %v572_v46 = vld [vmem:[#allocation4 + $0x128] sm:$0xff]  ;;  %v7422_v52 = vpack.c.bf16 %v568_v43, %v565_v4  ;;  %v2016_v42 = vld [vmem:[#allocation4 + $0x320] sm:$0xff]  ;;  %v2015_v43 = vld [vmem:[#allocation4 + $0x318] sm:$0xff] }
 0x16c   : > { %v7424_v49 = vpack.c.bf16 %v575_v47, %v572_v46  ;;  %v2012_v4 = vld [vmem:[#allocation4 + $0x300] sm:$0xff]  ;;  %v2019_v46 = vld [vmem:[#allocation4 + $0x338] sm:$0xff]  ;;  %v2022_v47 = vld [vmem:[#allocation4 + $0x350] sm:$0xff] }
 0x16d   : > { %6754 = vmatmul.mubr.f32.gmra.mrb[102].mxu0 %v8801_v6 }
 0x16e   : > { %6756 = vmatprep.mubr.f32.mxu0 %v8807_v7  ;;  %7415 = vmatpush1.bf16.msra.mxu0 %v7414_v59  ;;  %v581_v59 = vld [vmem:[#allocation4 + $0x170] sm:$0xff] }
 0x16f   : > { %7417 = vmatprep.subr.bf16.mxu0 %v7416_v8  ;;  %v7426_v8 = vpack.c.bf16 %v574_v55, %v571_v53  ;;  %v7428_v63 = vpack.c.bf16 %v581_v59, %v578_v62  ;;  %v2027_v53 = vld [vmem:[#allocation4 + $0x378] sm:$0xff] }
 0x170   : > { %v2031_v55 = vld [vmem:[#allocation4 + $0x398] sm:$0xff] }
 0x171   : > { %6757 = vmatmul.mubr.f32.gmra.mrb[104].mxu0 %v8815_v13 }
 0x172   : > { %6759 = vmatprep.mubr.f32.mxu0 %v8823_v18  ;;  %7419 = vmatpush1.bf16.msra.mxu0 %v7418_v1  ;;  %v7464_v1 = vpack.c.bf16 %v2016_v42, %v2013_v41  ;;  %v2036_v42 = vld [vmem:[#allocation4 + $0x3c0] sm:$0xff] }
 0x173   : > { %7421 = vmatprep.subr.bf16.mxu0 %v7420_v54  ;;  %v7430_v54 = vpack.c.bf16 %v580_v27, %v577_v2  ;;  %v2040_v2 = vld [vmem:[#allocation4 + $0x3e0] sm:$0xff] }
 0x175   : > { %6760 = vmatmul.mubr.f32.gmra.mrb[106].mxu0 %v8829_v25 }
 0x176   : > { %6762 = vmatprep.mubr.f32.mxu0 %v8835_v32  ;;  %7423 = vmatpush1.bf16.msra.mxu0 %v7422_v52  ;;  %v2018_v52 = vld [vmem:[#allocation4 + $0x330] sm:$0xff] }
 0x177   : > { %7425 = vmatprep.subr.bf16.mxu0 %v7424_v49  ;;  %v2025_v49 = vld [vmem:[#allocation4 + $0x368] sm:$0xff] }
 0x179   : > { %6763 = vmatmul.mubr.f32.gmra.mrb[108].mxu0 %v8839_v33 }
 0x17a   : > { %6765 = vmatprep.mubr.f32.mxu0 %v8845_v38  ;;  %7427 = vmatpush1.bf16.msra.mxu0 %v7426_v8  ;;  %v2030_v8 = vld [vmem:[#allocation4 + $0x390] sm:$0xff] }
 0x17b   : > { %7429 = vmatprep.subr.bf16.mxu0 %v7428_v63  ;;  %v2037_v63 = vld [vmem:[#allocation4 + $0x3c8] sm:$0xff] }
 0x17c   : > { %v7480_v41 = vpack.c.bf16 %v2040_v2, %v2037_v63 }
 0x17d   : > { %6766 = vmatmul.mubr.f32.gmra.mrb[110].mxu0 %v8849_v39 }
 0x17e   : > { %6768 = vmatprep.mubr.f32.mxu0 %v8854_v44  ;;  %7431 = vmatpush1.bf16.msra.mxu0 %v7430_v54  ;;  %v2043_v54 = vld [vmem:[#allocation4 + $0x3f8] sm:$0xff] }
 0x17f   : > { %7465 = vmatprep.subr.bf16.mxu0 %v7464_v1  ;;  %v2046_v1 = vld [vmem:[#allocation4 + $0x410] sm:$0xff] }
 0x181   : > { %6769 = vmatmul.mubr.f32.gmra.mrb[112].mxu0 %v8857_v45 }
 0x182   : > { %6771 = vmatprep.mubr.f32.mxu0 %v8862_v50 }
 0x185   : > { %6772 = vmatmul.mubr.f32.gmra.mrb[114].mxu0 %v8865_v51 }
 0x186   : > { %6774 = vmatprep.mubr.f32.mxu0 %v8870_v56 }
 0x189   : > { %6775 = vmatmul.mubr.f32.gmra.mrb[116].mxu0 %v8873_v57 }
 0x18a   : > { %6777 = vmatprep.mubr.f32.mxu0 %v8878_v58 }
 0x18d   : > { %6778 = vmatmul.mubr.f32.gmra.mrb[118].mxu0 %v8881_v0 }
 0x18e   : > { %6780 = vmatprep.mubr.f32.mxu0 %v8886_v3 }
 0x191   : > { %6781 = vmatmul.mubr.f32.gmra.mrb[120].mxu0 %v8889_v5 }
 0x192   : > { %6783 = vmatprep.mubr.f32.mxu0 %v8894_v9 }
 0x195   : > { %6784 = vmatmul.mubr.f32.gmra.mrb[122].mxu0 %v8897_v10 }
 0x196   : > { %6786 = vmatprep.mubr.f32.mxu0 %v8902_v11 }
 0x199   : > { %6787 = vmatmul.mubr.f32.gmra.mrb[124].mxu0 %v8905_v12 }
 0x19a   : > { %6789 = vmatprep.mubr.f32.mxu0 %v8910_v14 }
 0x19d   : > { %6790 = vmatmul.mubr.f32.gmra.mrb[126].mxu0 %v8913_v15 }
 0x19e   : > { %6792 = vmatprep.mubr.f32.mxu0 %v8918_v16 }
 0x1a1   : > { %6793 = vmatmul.mubr.f32.gmra.mrb[128].mxu0 %v8921_v17 }
 0x1a2   : > { %6795 = vmatprep.mubr.f32.mxu0 %v8926_v19 }
 0x1a5   : > { %6796 = vmatmul.mubr.f32.gmra.mrb[130].mxu0 %v8929_v20 }
 0x1a6   : > { %6798 = vmatprep.mubr.f32.mxu0 %v8934_v21 }
 0x1a9   : > { %6799 = vmatmul.mubr.f32.gmra.mrb[132].mxu0 %v8937_v22 }
 0x1aa   : > { %6801 = vmatprep.mubr.f32.mxu0 %v8942_v24 }
 0x1ad   : > { %6802 = vmatmul.mubr.f32.gmra.mrb[134].mxu0 %v8945_v26  ;;  %v10785_v26 = vmov 0.0  }
 0x1ae   : > { %6804 = vmatprep.mubr.f32.mxu0 %v8950_v28  ;;  %v7466_v28 = vpack.c.bf16 %v2015_v43, %v2012_v4  ;;  %v8313_v4 = vld [vmem:[#allocation2 + $0x18] sm:$0xff] }
 0x1b1   : > { %6805 = vmatmul.mubr.f32.gmra.mrb[136].mxu0 %v8953_v29  ;;  %v7468_v29 = vpack.c.bf16 %v2022_v47, %v2019_v46  ;;  %v7484_v46 = vpack.c.bf16 %v2046_v1, %v2043_v54  ;;  %v2042_v47 = vld [vmem:[#allocation4 + $0x3f0] sm:$0xff] }
 0x1b2   : > { %6807 = vmatprep.mubr.f32.mxu0 %v8958_v30  ;;  %v2021_v30 = vld [vmem:[#allocation4 + $0x348] sm:$0xff] }
 0x1b5   : > { %6808 = vmatmul.mubr.f32.gmra.mrb[138].mxu0 %v8961_v31  ;;  %v2028_v31 = vld [vmem:[#allocation4 + $0x380] sm:$0xff] }
 0x1b6   : > { %6810 = vmatprep.mubr.f32.mxu0 %v8966_v34  ;;  %v7470_v34 = vpack.c.bf16 %v2021_v30, %v2018_v52  ;;  %v2052_v52 = vld [vmem:[#allocation4 + $0x440] sm:$0xff] }
 0x1b9   : > { %6811 = vmatmul.mubr.f32.gmra.mrb[140].mxu0 %v9037_v35  ;;  %v7472_v35 = vpack.c.bf16 %v2028_v31, %v2025_v49  ;;  %v2048_v49 = vld [vmem:[#allocation4 + $0x420] sm:$0xff]  ;;  %v2051_v31 = vld [vmem:[#allocation4 + $0x438] sm:$0xff] }
 0x1ba   : > { %6813 = vmatprep.mubr.f32.mxu0 %v9043_v36  ;;  %v2024_v36 = vld [vmem:[#allocation4 + $0x360] sm:$0xff] }
 0x1bb   : > { %v7474_v62 = vpack.c.bf16 %v2027_v53, %v2024_v36  ;;  %v10788_v36 = vld [vmem:[#allocation12_spill] sm:$0xff] }
 0x1bd   : > { %6814 = vmatmul.mubr.f32.gmra.mrb[142].mxu0 %v9049_v37  ;;  %v2034_v37 = vld [vmem:[#allocation4 + $0x3b0] sm:$0xff] }
 0x1be   : > { %1385 = vmatprep.mubr.f32.mxu0 %v10785_v26  ;;  %v7476_v59 = vpack.c.bf16 %v2034_v37, %v2031_v55 }
 0x1c1   : > { %1386 = vmatmul.mubr.f32.vlgmr.msra.gmra.mrb[0].mxu0 %v8738_v23  ;;  %v2033_v23 = vld [vmem:[#allocation4 + $0x3a8] sm:$0xff] }
 0x1c2   : > { %7467 = vmatpush1.bf16.msra.mxu0 %v7466_v28  ;;  %1391 = vmatprep.mubr.f32.mxu0 %v10785_v26  ;;  %v7478_v27 = vpack.c.bf16 %v2033_v23, %v2030_v8  ;;  %v2058_v8 = vld [vmem:[#allocation4 + $0x470] sm:$0xff] }
 0x1c3   : > { %7469 = vmatprep.subr.bf16.mxu0 %v7468_v29  ;;  %v2049_v29 = vld [vmem:[#allocation4 + $0x428] sm:$0xff] }
 0x1c4   : > { %v7488_v30 = vpack.c.bf16 %v2052_v52, %v2049_v29 }
 0x1c5   : > { %1392 = vmatmul.mubr.f32.gmra.mrb[2].mxu0 %v8779_v60  ;;  %v2039_v60 = vld [vmem:[#allocation4 + $0x3d8] sm:$0xff] }
 0x1c6   : > { %1397 = vmatprep.mubr.f32.mxu0 %v10785_v26  ;;  %7471 = vmatpush1.bf16.msra.mxu0 %v7470_v34  ;;  %v7482_v43 = vpack.c.bf16 %v2039_v60, %v2036_v42  ;;  %v7490_v34 = vpack.c.bf16 %v2051_v31, %v2048_v49 }
 0x1c7   : > { %7473 = vmatprep.subr.bf16.mxu0 %v7472_v35  ;;  %v10786_v35 = vld [vmem:[#allocation10_spill] sm:$0xff] }
 0x1c9   : > { %1398 = vmatmul.mubr.f32.gmra.mrb[4].mxu0 %v8781_v61  ;;  %v2045_v61 = vld [vmem:[#allocation4 + $0x408] sm:$0xff] }
 0x1ca   : > { %1402 = vmatprep.mubr.f32.mxu0 %v10785_v26  ;;  %7475 = vmatpush1.bf16.msra.mxu0 %v7474_v62  ;;  %v7486_v28 = vpack.c.bf16 %v2045_v61, %v2042_v47 }
 0x1cb   : > { %7477 = vmatprep.subr.bf16.mxu0 %v7476_v59  ;;  %v2055_v59 = vld [vmem:[#allocation4 + $0x458] sm:$0xff] }
 0x1cc   : > { %v7492_v23 = vpack.c.bf16 %v2058_v8, %v2055_v59 }
 0x1cd   : > { %1403 = vmatmul.mubr.f32.gmra.mrb[6].mxu0 %v8313_v4 }
 0x1ce   : > { %1408 = vmatprep.mubr.f32.mxu0 %v10785_v26  ;;  %7479 = vmatpush1.bf16.msra.mxu0 %v7478_v27  ;;  %v2054_v27 = vld [vmem:[#allocation4 + $0x450] sm:$0xff] }
 0x1cf   : > { %7481 = vmatprep.subr.bf16.mxu0 %v7480_v41 }
 0x1d1   : > { %1409 = vmatmul.mubr.f32.gmra.mrb[8].mxu0 %v8757_v40  ;;  %v10787_v40 = vld [vmem:[#allocation11_spill] sm:$0xff] }
 0x1d2   : > { %1414 = vmatprep.mubr.f32.mxu0 %v10785_v26  ;;  %7483 = vmatpush1.bf16.msra.mxu0 %v7482_v43 }
 0x1d3   : > { %7485 = vmatprep.subr.bf16.mxu0 %v7484_v46 }
 0x1d5   : > { %1415 = vmatmul.mubr.f32.gmra.mrb[10].mxu0 %v8765_v48  ;;  %v10789_v48 = vld [vmem:[#allocation13_spill] sm:$0xff] }
 0x1d6   : > { %1419 = vmatprep.mubr.f32.mxu0 %v10785_v26  ;;  %7487 = vmatpush1.bf16.msra.mxu0 %v7486_v28 }
 0x1d7   : > { %7489 = vmatprep.subr.bf16.mxu0 %v7488_v30 }
 0x1d9   : > { %1420 = vmatmul.mubr.f32.gmra.mrb[12].mxu0 %v10786_v35 }
 0x1da   : > { %1425 = vmatprep.mubr.f32.mxu0 %v10785_v26  ;;  %7491 = vmatpush1.bf16.msra.mxu0 %v7490_v34 }
 0x1db   : > { %7493 = vmatprep.subr.bf16.mxu0 %v7492_v23 }
 0x1dd   : > { %1426 = vmatmul.mubr.f32.gmra.mrb[14].mxu0 %v10787_v40 }
 0x1de   : > { %1431 = vmatprep.mubr.f32.mxu0 %v10785_v26 }
 0x1e1   : > { %1432 = vmatmul.mubr.f32.gmra.mrb[16].mxu0 %v10788_v36 }
 0x1e2   : > { %1436 = vmatprep.mubr.f32.mxu0 %v10785_v26  ;;  %v9127_v53 = vpop.f32.mrb[0].mxu1 }
 0x1e3   : > { %v9130_v55 = vpop.f32.mrb[1].mxu1 }
 0x1e5   : > { %1437 = vmatmul.mubr.f32.gmra.mrb[18].mxu0 %v10789_v48 }
 0x1e6   : > { %1442 = vmatprep.mubr.f32.mxu0 %v10785_v26  ;;  %v9133_v37 = vpop.f32.mrb[2].mxu1 }
 0x1e7   : > { %v9136_v62 = vpop.f32.mrb[3].mxu1 }
 0x1e9   : > { %1443 = vmatmul.mubr.f32.gmra.mrb[20].mxu0 %v8801_v6  ;;  %v2057_v6 = vld [vmem:[#allocation4 + $0x468] sm:$0xff] }
 0x1ea   : > { %1448 = vmatprep.mubr.f32.mxu0 %v10785_v26  ;;  %v9139_v63 = vpop.f32.mrb[4].mxu1  ;;  %v7494_v41 = vpack.c.bf16 %v2057_v6, %v2054_v27 }
 0x1eb   : > { %v9142_v2 = vpop.f32.mrb[5].mxu1 }
 0x1ec   : > { %7495 = vmatpush1.bf16.msra.mxu0 %v7494_v41 }
 0x1ed   : > { %1449 = vmatmul.mubr.f32.gmra.mrb[22].mxu0 %v8807_v7 }
 0x1ee   : > { %1453 = vmatprep.mubr.f32.mxu0 %v10785_v26  ;;  %v9145_v42 = vpop.f32.mrb[6].mxu1 }
 0x1ef   : > { %v9148_v60 = vpop.f32.mrb[7].mxu1 }
 0x1f1   : > { %1454 = vmatmul.mubr.f32.gmra.mrb[24].mxu0 %v8815_v13 }
 0x1f2   : > { %1459 = vmatprep.mubr.f32.mxu0 %v10785_v26  ;;  %v9151_v7 = vpop.f32.mrb[8].mxu1 }
 0x1f3   : > { %v9154_v54 = vpop.f32.mrb[9].mxu1 }
 0x1f5   : > { %1460 = vmatmul.mubr.f32.gmra.mrb[26].mxu0 %v8823_v18 }
 0x1f6   : > { %1465 = vmatprep.mubr.f32.mxu0 %v10785_v26  ;;  %v9157_v1 = vpop.f32.mrb[10].mxu1 }
 0x1f7   : > { %v9160_v13 = vpop.f32.mrb[11].mxu1 }
 0x1f9   : > { %1466 = vmatmul.mubr.f32.gmra.mrb[28].mxu0 %v8829_v25 }
 0x1fa   : > { %1470 = vmatprep.mubr.f32.mxu0 %v10785_v26  ;;  %v9163_v4 = vpop.f32.mrb[12].mxu1 }
 0x1fb   : > { %v9166_v18 = vpop.f32.mrb[13].mxu1 }
 0x1fd   : > { %1471 = vmatmul.mubr.f32.gmra.mrb[30].mxu0 %v8835_v32 }
 0x1fe   : > { %1476 = vmatprep.mubr.f32.mxu0 %v10785_v26  ;;  %v9169_v43 = vpop.f32.mrb[14].mxu1 }
 0x1ff   : > { %v9172_v25 = vpop.f32.mrb[15].mxu1 }
 0x201   : > { %1477 = vmatmul.mubr.f32.gmra.mrb[32].mxu0 %v8839_v33 }
 0x202   : > { %1482 = vmatprep.mubr.f32.mxu0 %v10785_v26  ;;  %v9175_v46 = vpop.f32.mrb[16].mxu1 }
 0x203   : > { %v9178_v32 = vpop.f32.mrb[17].mxu1 }
 0x205   : > { %1483 = vmatmul.mubr.f32.gmra.mrb[34].mxu0 %v8845_v38 }
 0x206   : > { %1487 = vmatprep.mubr.f32.mxu0 %v10785_v26  ;;  %v9181_v47 = vpop.f32.mrb[18].mxu1 }
 0x207   : > { %v9184_v33 = vpop.f32.mrb[19].mxu1 }
 0x209   : > { %1488 = vmatmul.mubr.f32.gmra.mrb[36].mxu0 %v8849_v39 }
 0x20a   : > { %1493 = vmatprep.mubr.f32.mxu0 %v10785_v26  ;;  %v9187_v61 = vpop.f32.mrb[20].mxu1 }
 0x20b   : > { %v9190_v38 = vpop.f32.mrb[21].mxu1 }
 0x20d   : > { %1494 = vmatmul.mubr.f32.gmra.mrb[38].mxu0 %v8854_v44 }
 0x20e   : > { %1499 = vmatprep.mubr.f32.mxu0 %v10785_v26  ;;  %v9193_v28 = vpop.f32.mrb[22].mxu1 }
 0x20f   : > { %v9196_v39 = vpop.f32.mrb[23].mxu1 }
 0x211   : > { %1500 = vmatmul.mubr.f32.gmra.mrb[40].mxu0 %v8857_v45 }
 0x212   : > { %1504 = vmatprep.mubr.f32.mxu0 %v10785_v26  ;;  %v9199_v29 = vpop.f32.mrb[24].mxu1 }
 0x213   : > { %v9202_v44 = vpop.f32.mrb[25].mxu1 }
 0x215   : > { %1505 = vmatmul.mubr.f32.gmra.mrb[42].mxu0 %v8862_v50 }
 0x216   : > { %1510 = vmatprep.mubr.f32.mxu0 %v10785_v26  ;;  %v9205_v52 = vpop.f32.mrb[26].mxu1 }
 0x217   : > { %v9208_v45 = vpop.f32.mrb[27].mxu1 }
 0x219   : > { %1511 = vmatmul.mubr.f32.gmra.mrb[44].mxu0 %v8865_v51 }
 0x21a   : > { %1516 = vmatprep.mubr.f32.mxu0 %v10785_v26  ;;  %v9211_v30 = vpop.f32.mrb[28].mxu1 }
 0x21b   : > { %v9214_v50 = vpop.f32.mrb[29].mxu1 }
 0x21d   : > { %1517 = vmatmul.mubr.f32.gmra.mrb[46].mxu0 %v8870_v56 }
 0x21e   : > { %1521 = vmatprep.mubr.f32.mxu0 %v10785_v26  ;;  %v9217_v49 = vpop.f32.mrb[30].mxu1 }
 0x21f   : > { %v9220_v51 = vpop.f32.mrb[31].mxu1 }
 0x221   : > { %1522 = vmatmul.mubr.f32.gmra.mrb[48].mxu0 %v8873_v57 }
 0x222   : > { %1527 = vmatprep.mubr.f32.mxu0 %v10785_v26  ;;  %v9223_v31 = vpop.f32.mrb[32].mxu1 }
 0x223   : > { %v9226_v56 = vpop.f32.mrb[33].mxu1 }
 0x225   : > { %1528 = vmatmul.mubr.f32.gmra.mrb[50].mxu0 %v8878_v58 }
 0x226   : > { %1533 = vmatprep.mubr.f32.mxu0 %v10785_v26  ;;  %v9229_v34 = vpop.f32.mrb[34].mxu1 }
 0x227   : > { %v9232_v57 = vpop.f32.mrb[35].mxu1 }
 0x229   : > { %1534 = vmatmul.mubr.f32.gmra.mrb[52].mxu0 %v8881_v0 }
 0x22a   : > { %1538 = vmatprep.mubr.f32.mxu0 %v10785_v26  ;;  %v9235_v35 = vpop.f32.mrb[36].mxu1 }
 0x22b   : > { %v9238_v58 = vpop.f32.mrb[37].mxu1 }
 0x22d   : > { %1539 = vmatmul.mubr.f32.gmra.mrb[54].mxu0 %v8886_v3 }
 0x22e   : > { %1544 = vmatprep.mubr.f32.mxu0 %v10785_v26  ;;  %v9241_v40 = vpop.f32.mrb[38].mxu1 }
 0x22f   : > { %v9244_v0 = vpop.f32.mrb[39].mxu1 }
 0x230   : > { %10790 = vst [vmem:[#allocation10_spill] sm:$0xff] %v9244_v0 }
 0x231   : > { %1545 = vmatmul.mubr.f32.gmra.mrb[56].mxu0 %v8889_v5 }
 0x232   : > { %1550 = vmatprep.mubr.f32.mxu0 %v10785_v26  ;;  %v9250_v8 = vpop.f32.mrb[40].mxu1 }
 0x233   : > { %v9252_v5 = vpop.f32.mrb[41].mxu1 }
 0x234   : > { %v6746_v36 = vpop.f32.mrb[96].mxu0  ;;  %10791 = vst [vmem:[#allocation11_spill] sm:$0xff] %v9252_v5 }
 0x235   : > { %v7720_v48 = vadd.f32 %v9127_v53, %v6746_v36  ;;  %v1082_v59 = vpop.f32.mrb[97].mxu0  ;;  %1551 = vmatmul.mubr.f32.gmra.mrb[58].mxu0 %v8894_v9 }
 0x236   : > { %v7721_v3 = vadd.f32 %v9130_v55, %v1082_v59  ;;  %1555 = vmatprep.mubr.f32.mxu0 %v10785_v26  ;;  %v9261_v55 = vpop.f32.mrb[42].mxu1 }
 0x237   : > { %v3073_v23 = vrot.slane %v7720_v48, 2  ;;  %v9263_v36 = vpop.f32.mrb[43].mxu1 }
 0x238   : > { %v3072_v27 = vrot.slane %v7721_v3, 2  ;;  %v6749_v6 = vpop.f32.mrb[98].mxu0 }
 0x239   : > { %v7722_v41 = vadd.f32 %v9133_v37, %v6749_v6  ;;  %v1092_v0 = vpop.f32.mrb[99].mxu0  ;;  %1556 = vmatmul.mubr.f32.gmra.mrb[60].mxu0 %v8897_v10 }
 0x23a   : > { %v9257_v53 = vsel %vm3071_vm1, %v3072_v27, %v3073_v23  ;;  %v7723_v9 = vadd.f32 %v9136_v62, %v1092_v0  ;;  %1561 = vmatprep.mubr.f32.mxu0 %v10785_v26  ;;  %v9272_v62 = vpop.f32.mrb[44].mxu1 }
 0x23b   : > { %10792 = vst [vmem:[#allocation12_spill] sm:$0xff] %v9257_v53  ;;  %v9274_v27 = vpop.f32.mrb[45].mxu1  ;;  %v3077_v6 = vrot.slane %v7722_v41, 2 }
 0x23c   : > { %v3075_v48 = vrot.slane %v7723_v9, 2  ;;  %v6752_v59 = vpop.f32.mrb[100].mxu0 }
 0x23d   : > { %v7724_v3 = vadd.f32 %v9139_v63, %v6752_v59  ;;  %v1102_v5 = vpop.f32.mrb[101].mxu0  ;;  %1562 = vmatmul.mubr.f32.gmra.mrb[62].mxu0 %v8902_v11 }
 0x23e   : > { %v9268_v10 = vsel %vm3071_vm1, %v3073_v23, %v3075_v48  ;;  %v7725_v37 = vadd.f32 %v9142_v2, %v1102_v5  ;;  %1567 = vmatprep.mubr.f32.mxu0 %v10785_v26  ;;  %v9286_v5 = vpop.f32.mrb[46].mxu1 }
 0x23f   : > { %v3080_v0 = vrot.slane %v7724_v3, 2  ;;  %v9288_v48 = vpop.f32.mrb[47].mxu1 }
 0x240   : > { %v3078_v9 = vrot.slane %v7725_v37, 2  ;;  %v6755_v53 = vpop.f32.mrb[102].mxu0 }
 0x241   : > { %v7726_v63 = vadd.f32 %v9145_v42, %v6755_v53  ;;  %v1112_v59 = vpop.f32.mrb[103].mxu0  ;;  %1568 = vmatmul.mubr.f32.gmra.mrb[64].mxu0 %v8905_v12 }
 0x242   : > { %v9279_v11 = vsel %vm3071_vm1, %v3077_v6, %v3078_v9  ;;  %v9282_v2 = vsel %vm3071_vm1, %v3078_v9, %v3080_v0  ;;  %v7727_v23 = vadd.f32 %v9148_v60, %v1112_v59  ;;  %1572 = vmatprep.mubr.f32.mxu0 %v10785_v26 }
 0x243   : > { %v3083_v41 = vrot.slane %v7726_v63, 2 }
 0x244   : > { %v3082_v3 = vrot.slane %v7727_v23, 2  ;;  %v6758_v42 = vpop.f32.mrb[104].mxu0 }
 0x245   : > { %v7728_v53 = vadd.f32 %v9151_v7, %v6758_v42  ;;  %v1122_v12 = vpop.f32.mrb[105].mxu0  ;;  %1573 = vmatmul.mubr.f32.gmra.mrb[66].mxu0 %v8910_v14 }
 0x246   : > { %v9293_v37 = vsel %vm3071_vm1, %v3082_v3, %v3083_v41  ;;  %v7729_v0 = vadd.f32 %v9154_v54, %v1122_v12  ;;  %1578 = vmatprep.mubr.f32.mxu0 %v10785_v26 }
 0x247   : > { %v3087_v23 = vrot.slane %v7728_v53, 2 }
 0x248   : > { %v3085_v60 = vrot.slane %v7729_v0, 2  ;;  %v6761_v6 = vpop.f32.mrb[106].mxu0 }
 0x249   : > { %v7730_v9 = vadd.f32 %v9157_v1, %v6761_v6  ;;  %v1132_v63 = vpop.f32.mrb[107].mxu0  ;;  %1579 = vmatmul.mubr.f32.gmra.mrb[68].mxu0 %v8913_v15 }
 0x24a   : > { %v9300_v59 = vsel %vm3071_vm1, %v3083_v41, %v3085_v60  ;;  %v7731_v7 = vadd.f32 %v9160_v13, %v1132_v63  ;;  %1584 = vmatprep.mubr.f32.mxu0 %v10785_v26 }
 0x24b   : > { %v3090_v14 = vrot.slane %v7730_v9, 2 }
 0x24c   : > { %v3088_v3 = vrot.slane %v7731_v7, 2  ;;  %v6764_v54 = vpop.f32.mrb[108].mxu0 }
 0x24d   : > { %v7732_v42 = vadd.f32 %v9163_v4, %v6764_v54  ;;  %v1142_v12 = vpop.f32.mrb[109].mxu0  ;;  %1585 = vmatmul.mubr.f32.gmra.mrb[70].mxu0 %v8918_v16 }
 0x24e   : > { %v9307_v1 = vsel %vm3071_vm1, %v3087_v23, %v3088_v3  ;;  %v9310_v15 = vsel %vm3071_vm1, %v3088_v3, %v3090_v14  ;;  %v7733_v41 = vadd.f32 %v9166_v18, %v1142_v12  ;;  %1589 = vmatprep.mubr.f32.mxu0 %v10785_v26 }
 0x24f   : > { %v3093_v13 = vrot.slane %v7732_v42, 2 }
 0x250   : > { %v3092_v0 = vrot.slane %v7733_v41, 2  ;;  %v6767_v53 = vpop.f32.mrb[110].mxu0 }
 0x251   : > { %v7734_v60 = vadd.f32 %v9169_v43, %v6767_v53  ;;  %v1152_v6 = vpop.f32.mrb[111].mxu0  ;;  %1590 = vmatmul.mubr.f32.gmra.mrb[72].mxu0 %v8921_v17 }
 0x252   : > { %v9317_v16 = vsel %vm3071_vm1, %v3092_v0, %v3093_v13  ;;  %v7735_v4 = vadd.f32 %v9172_v25, %v1152_v6  ;;  %1595 = vmatprep.mubr.f32.mxu0 %v10785_v26 }
 0x253   : > { %v3097_v23 = vrot.slane %v7734_v60, 2 }
 0x254   : > { %v3095_v9 = vrot.slane %v7735_v4, 2  ;;  %v6770_v63 = vpop.f32.mrb[112].mxu0 }
 0x255   : > { %v7736_v18 = vadd.f32 %v9175_v46, %v6770_v63  ;;  %v1162_v7 = vpop.f32.mrb[113].mxu0  ;;  %1596 = vmatmul.mubr.f32.gmra.mrb[74].mxu0 %v8926_v19 }
 0x256   : > { %v9324_v14 = vsel %vm3071_vm1, %v3093_v13, %v3095_v9  ;;  %v7737_v43 = vadd.f32 %v9178_v32, %v1162_v7  ;;  %1601 = vmatprep.mubr.f32.mxu0 %v10785_v26 }
 0x257   : > { %v3100_v17 = vrot.slane %v7736_v18, 2 }
 0x258   : > { %v3098_v3 = vrot.slane %v7737_v43, 2  ;;  %v6773_v25 = vpop.f32.mrb[114].mxu0 }
 0x259   : > { %v7738_v54 = vadd.f32 %v9181_v47, %v6773_v25  ;;  %v1172_v42 = vpop.f32.mrb[115].mxu0  ;;  %1602 = vmatmul.mubr.f32.gmra.mrb[76].mxu0 %v8929_v20 }
 0x25a   : > { %v9331_v46 = vsel %vm3071_vm1, %v3097_v23, %v3098_v3  ;;  %v9334_v19 = vsel %vm3071_vm1, %v3098_v3, %v3100_v17  ;;  %v7739_v12 = vadd.f32 %v9184_v33, %v1172_v42  ;;  %1606 = vmatprep.mubr.f32.mxu0 %v10785_v26 }
 0x25b   : > { %v3103_v32 = vrot.slane %v7738_v54, 2 }
 0x25c   : > { %v3102_v41 = vrot.slane %v7739_v12, 2  ;;  %v6776_v13 = vpop.f32.mrb[116].mxu0 }
 0x25d   : > { %v7740_v0 = vadd.f32 %v9187_v61, %v6776_v13  ;;  %v1182_v53 = vpop.f32.mrb[117].mxu0  ;;  %1607 = vmatmul.mubr.f32.gmra.mrb[78].mxu0 %v8934_v21  ;;  %v9372_v13 = vld [vmem:[#allocation2 + $0x158] sm:$0xff] }
 0x25e   : > { %v9341_v20 = vsel %vm3071_vm1, %v3102_v41, %v3103_v32  ;;  %v7741_v47 = vadd.f32 %v9190_v38, %v1182_v53  ;;  %1612 = vmatprep.mubr.f32.mxu0 %v10785_v26 }
 0x25f   : > { %v3107_v63 = vrot.slane %v7740_v0, 2 }
 0x260   : > { %v3105_v60 = vrot.slane %v7741_v47, 2  ;;  %v6779_v6 = vpop.f32.mrb[118].mxu0 }
 0x261   : > { %v7742_v33 = vadd.f32 %v9193_v28, %v6779_v6  ;;  %v1192_v4 = vpop.f32.mrb[119].mxu0  ;;  %1613 = vmatmul.mubr.f32.gmra.mrb[80].mxu0 %v8937_v22 }
 0x262   : > { %v9348_v9 = vsel %vm3071_vm1, %v3103_v32, %v3105_v60  ;;  %v7743_v61 = vadd.f32 %v9196_v39, %v1192_v4  ;;  %1618 = vmatprep.mubr.f32.mxu0 %v10785_v26 }
 0x263   : > { %v3110_v21 = vrot.slane %v7742_v33, 2 }
 0x264   : > { %v3108_v18 = vrot.slane %v7743_v61, 2  ;;  %v6782_v38 = vpop.f32.mrb[120].mxu0 }
 0x265   : > { %v7744_v7 = vadd.f32 %v9199_v29, %v6782_v38  ;;  %v1202_v43 = vpop.f32.mrb[121].mxu0  ;;  %1619 = vmatmul.mubr.f32.gmra.mrb[82].mxu0 %v8942_v24  ;;  %v9363_v29 = vld [vmem:[#allocation2 + $0x150] sm:$0xff] }
 0x266   : > { %v9355_v28 = vsel %vm3071_vm1, %v3107_v63, %v3108_v18  ;;  %v9358_v22 = vsel %vm3071_vm1, %v3108_v18, %v3110_v21  ;;  %v7745_v17 = vadd.f32 %v9202_v44, %v1202_v43  ;;  %1623 = vmatprep.mubr.f32.mxu0 %v10785_v26 }
 0x267   : > { %v3113_v39 = vrot.slane %v7744_v7, 2  ;;  %v9393_v7 = vld [vmem:[#allocation2 + $0x168] sm:$0xff] }
 0x268   : > { %v3112_v23 = vrot.slane %v7745_v17, 2  ;;  %v6785_v3 = vpop.f32.mrb[122].mxu0 }
 0x269   : > { %v7746_v25 = vadd.f32 %v9205_v52, %v6785_v3  ;;  %v1212_v54 = vpop.f32.mrb[123].mxu0  ;;  %1624 = vmatmul.mubr.f32.gmra.mrb[84].mxu0 %v9363_v29 }
 0x26a   : > { %v9367_v24 = vsel %vm3071_vm1, %v3112_v23, %v3113_v39  ;;  %v7747_v42 = vadd.f32 %v9208_v45, %v1212_v54  ;;  %1629 = vmatprep.mubr.f32.mxu0 %v10785_v26 }
 0x26b   : > { %v3117_v45 = vrot.slane %v7746_v25, 2  ;;  %v9402_v25 = vld [vmem:[#allocation2 + $0x170] sm:$0xff] }
 0x26c   : > { %v3115_v44 = vrot.slane %v7747_v42, 2  ;;  %v6788_v12 = vpop.f32.mrb[124].mxu0 }
 0x26d   : > { %v7748_v32 = vadd.f32 %v9211_v30, %v6788_v12  ;;  %v1222_v41 = vpop.f32.mrb[125].mxu0  ;;  %1630 = vmatmul.mubr.f32.gmra.mrb[86].mxu0 %v9372_v13  ;;  %v9381_v30 = vld [vmem:[#allocation2 + $0x160] sm:$0xff] }
 0x26e   : > { %v9376_v52 = vsel %vm3071_vm1, %v3113_v39, %v3115_v44  ;;  %v7749_v0 = vadd.f32 %v9214_v50, %v1222_v41  ;;  %1635 = vmatprep.mubr.f32.mxu0 %v10785_v26 }
 0x26f   : > { %v3120_v53 = vrot.slane %v7748_v32, 2 }
 0x270   : > { %v3118_v47 = vrot.slane %v7749_v0, 2  ;;  %v6791_v60 = vpop.f32.mrb[126].mxu0 }
 0x271   : > { %v7750_v6 = vadd.f32 %v9217_v49, %v6791_v60  ;;  %v1232_v33 = vpop.f32.mrb[127].mxu0  ;;  %1636 = vmatmul.mubr.f32.gmra.mrb[88].mxu0 %v9381_v30 }
 0x272   : > { %v9385_v4 = vsel %vm3071_vm1, %v3117_v45, %v3118_v47  ;;  %v9388_v61 = vsel %vm3071_vm1, %v3118_v47, %v3120_v53  ;;  %v7751_v50 = vadd.f32 %v9220_v51, %v1232_v33  ;;  %1640 = vmatprep.mubr.f32.mxu0 %v10785_v26  ;;  %v8320_v33 = vld [vmem:[#allocation2 + $0x30] sm:$0xff] }
 0x273   : > { %v3123_v21 = vrot.slane %v7750_v6, 2 }
 0x274   : > { %v3122_v63 = vrot.slane %v7751_v50, 2  ;;  %v6794_v18 = vpop.f32.mrb[128].mxu0 }
 0x275   : > { %v7752_v49 = vadd.f32 %v9223_v31, %v6794_v18  ;;  %v1242_v38 = vpop.f32.mrb[129].mxu0  ;;  %1641 = vmatmul.mubr.f32.gmra.mrb[90].mxu0 %v9393_v7 }
 0x276   : > { %v9397_v43 = vsel %vm3071_vm1, %v3122_v63, %v3123_v21  ;;  %v7753_v17 = vadd.f32 %v9226_v56, %v1242_v38  ;;  %1646 = vmatprep.mubr.f32.mxu0 %v10785_v26 }
 0x277   : > { %v3127_v56 = vrot.slane %v7752_v49, 2 }
 0x278   : > { %v3125_v51 = vrot.slane %v7753_v17, 2  ;;  %v6797_v39 = vpop.f32.mrb[130].mxu0  ;;  %v8321_v17 = vld [vmem:[#allocation2 + $0x38] sm:$0xff] }
 0x279   : > { %v7754_v23 = vadd.f32 %v9229_v34, %v6797_v39  ;;  %v1252_v3 = vpop.f32.mrb[131].mxu0  ;;  %1647 = vmatmul.mubr.f32.gmra.mrb[92].mxu0 %v9402_v25  ;;  %v9411_v34 = vld [vmem:[#allocation2 + $0x178] sm:$0xff] }
 0x27a   : > { %v9406_v31 = vsel %vm3071_vm1, %v3123_v21, %v3125_v51  ;;  %v7755_v54 = vadd.f32 %v9232_v57, %v1252_v3  ;;  %1652 = vmatprep.mubr.f32.mxu0 %v10785_v26  ;;  %v10793_v21 = vld [vmem:[#allocation10_spill] sm:$0xff] }
 0x27b   : > { %v3130_v42 = vrot.slane %v7754_v23, 2 }
 0x27c   : > { %v3128_v44 = vrot.slane %v7755_v54, 2  ;;  %v6800_v12 = vpop.f32.mrb[132].mxu0 }
 0x27d   : > { %v7756_v32 = vadd.f32 %v9235_v35, %v6800_v12  ;;  %v1262_v41 = vpop.f32.mrb[133].mxu0  ;;  %1653 = vmatmul.mubr.f32.gmra.mrb[94].mxu0 %v9411_v34  ;;  %v8322_v12 = vld [vmem:[#allocation2 + $0x40] sm:$0xff] }
 0x27e   : > { %v9415_v0 = vsel %vm3071_vm1, %v3127_v56, %v3128_v44  ;;  %v9418_v53 = vsel %vm3071_vm1, %v3128_v44, %v3130_v42  ;;  %v7757_v57 = vadd.f32 %v9238_v58, %v1262_v41  ;;  %2124 = vmatprep.mubr.f32.mxu0 %v10785_v26 }
 0x27f   : > { %v3133_v45 = vrot.slane %v7756_v32, 2 }
 0x280   : > { %v3132_v47 = vrot.slane %v7757_v57, 2  ;;  %v6803_v60 = vpop.f32.mrb[134].mxu0 }
 0x281   : > { %v7758_v35 = vadd.f32 %v9241_v40, %v6803_v60  ;;  %v1272_v6 = vpop.f32.mrb[135].mxu0  ;;  %2125 = vmatmul.mubr.f32.vlgmr.msra.gmra.mrb[0].mxu0 %v8320_v33  ;;  %v10794_v40 = vld [vmem:[#allocation11_spill] sm:$0xff] }
 0x282   : > { %v9424_v50 = vsel %vm3071_vm1, %v3132_v47, %v3133_v45  ;;  %v7759_v63 = vadd.f32 %v10793_v21, %v1272_v6  ;;  %2130 = vmatprep.mubr.f32.mxu0 %v10785_v26 }
 0x283   : > { %v3137_v3 = vrot.slane %v7758_v35, 2 }
 0x284   : > { %v3135_v18 = vrot.slane %v7759_v63, 2  ;;  %v6806_v49 = vpop.f32.mrb[136].mxu0 }
 0x285   : > { %v7760_v58 = vadd.f32 %v9250_v8, %v6806_v49  ;;  %v1282_v38 = vpop.f32.mrb[137].mxu0  ;;  %2131 = vmatmul.mubr.f32.gmra.mrb[2].mxu0 %v8321_v17  ;;  %v8324_v49 = vld [vmem:[#allocation2 + $0x50] sm:$0xff] }
 0x286   : > { %v9430_v51 = vsel %vm3071_vm1, %v3133_v45, %v3135_v18  ;;  %v7761_v39 = vadd.f32 %v10794_v40, %v1282_v38  ;;  %2136 = vmatprep.mubr.f32.mxu0 %v10785_v26 }
 0x287   : > { %v3140_v23 = vrot.slane %v7760_v58, 2 }
 0x288   : > { %v3138_v54 = vrot.slane %v7761_v39, 2  ;;  %v6809_v42 = vpop.f32.mrb[138].mxu0 }
 0x289   : > { %v7762_v56 = vadd.f32 %v9261_v55, %v6809_v42  ;;  %v1292_v44 = vpop.f32.mrb[139].mxu0  ;;  %2137 = vmatmul.mubr.f32.gmra.mrb[4].mxu0 %v8322_v12  ;;  %v8323_v55 = vld [vmem:[#allocation2 + $0x48] sm:$0xff]  ;;  %v8330_v42 = vld [vmem:[#allocation2 + $0x80] sm:$0xff]  ;;  %v8333_v12 = vld [vmem:[#allocation2 + $0x98] sm:$0xff] }
 0x28a   : > { %v9436_v8 = vsel %vm3071_vm1, %v3137_v3, %v3138_v54  ;;  %v9439_v32 = vsel %vm3071_vm1, %v3138_v54, %v3140_v23  ;;  %v7763_v41 = vadd.f32 %v9263_v36, %v1292_v44  ;;  %2141 = vmatprep.mubr.f32.mxu0 %v10785_v26  ;;  %v8326_v23 = vld [vmem:[#allocation2 + $0x60] sm:$0xff]  ;;  %v8328_v3 = vld [vmem:[#allocation2 + $0x70] sm:$0xff]  ;;  %v8329_v54 = vld [vmem:[#allocation2 + $0x78] sm:$0xff] }
 0x28b   : > { %v3143_v57 = vrot.slane %v7762_v56, 2  ;;  %v8331_v56 = vld [vmem:[#allocation2 + $0x88] sm:$0xff]  ;;  %v8332_v44 = vld [vmem:[#allocation2 + $0x90] sm:$0xff] }
 0x28c   : > { %v3142_v45 = vrot.slane %v7763_v41, 2  ;;  %v6812_v47 = vpop.f32.mrb[140].mxu0  ;;  %v8334_v41 = vld [vmem:[#allocation2 + $0xa0] sm:$0xff] }
 0x28d   : > { %v7764_v60 = vadd.f32 %v9272_v62, %v6812_v47  ;;  %v1302_v35 = vpop.f32.mrb[141].mxu0  ;;  %2142 = vmatmul.mubr.f32.gmra.mrb[6].mxu0 %v8323_v55  ;;  %v3507_v47 = vld [vmem:[#allocation6 + $0x1a0] sm:$0xff]  ;;  %v3506_v55 = vld [vmem:[#allocation6 + $0x198] sm:$0xff] }
 0x28e   : > { %v9445_v6 = vsel %vm3071_vm1, %v3142_v45, %v3143_v57  ;;  %v7765_v33 = vadd.f32 %v9274_v27, %v1302_v35  ;;  %2147 = vmatprep.mubr.f32.mxu0 %v10785_v26  ;;  %v8325_v27 = vld [vmem:[#allocation2 + $0x58] sm:$0xff]  ;;  %v3504_v45 = vld [vmem:[#allocation6 + $0x188] sm:$0xff] }
 0x28f   : > { %v3147_v17 = vrot.slane %v7764_v60, 2  ;;  %v3503_v60 = vld [vmem:[#allocation6 + $0x180] sm:$0xff]  ;;  %v7528_v35 = vpack.c.bf16 %v3507_v47, %v3504_v45  ;;  %v3518_v47 = vld [vmem:[#allocation6 + $0x1f8] sm:$0xff] }
 0x290   : > { %v3145_v21 = vrot.slane %v7765_v33, 2  ;;  %v6815_v63 = vpop.f32.mrb[142].mxu0  ;;  %v3510_v33 = vld [vmem:[#allocation6 + $0x1b8] sm:$0xff]  ;;  %v3515_v45 = vld [vmem:[#allocation6 + $0x1e0] sm:$0xff] }
 0x291   : > { %v7766_v36 = vadd.f32 %v9286_v5, %v6815_v63  ;;  %v1312_v18 = vpop.f32.mrb[143].mxu0  ;;  %2148 = vmatmul.mubr.f32.gmra.mrb[8].mxu0 %v8324_v49  ;;  %v7530_v63 = vpack.c.bf16 %v3506_v55, %v3503_v60  ;;  %v3508_v49 = vld [vmem:[#allocation6 + $0x1a8] sm:$0xff]  ;;  %7529 = vmatprep.subr.bf16.mxu0 %v7528_v35  ;;  %v7538_v35 = vpack.c.bf16 %v3518_v47, %v3515_v45  ;;  %v3522_v55 = vld [vmem:[#allocation6 + $0x218] sm:$0xff]  ;;  %v3529_v45 = vld [vmem:[#allocation6 + $0x250] sm:$0xff] }
 0x292   : > { %v9451_v58 = vsel %vm3071_vm1, %v3143_v57, %v3145_v21  ;;  %v7767_v62 = vadd.f32 %v9288_v48, %v1312_v18  ;;  %2153 = vmatprep.mubr.f32.mxu0 %v10785_v26  ;;  %v8327_v48 = vld [vmem:[#allocation2 + $0x68] sm:$0xff]  ;;  %v3513_v21 = vld [vmem:[#allocation6 + $0x1d0] sm:$0xff] }
 0x293   : > { %v3150_v38 = vrot.slane %v7766_v36, 2  ;;  %v8335_v57 = vld [vmem:[#allocation2 + $0xa8] sm:$0xff]  ;;  %v7532_v36 = vpack.c.bf16 %v3513_v21, %v3510_v33  ;;  %v3505_v18 = vld [vmem:[#allocation6 + $0x190] sm:$0xff]  ;;  %7531 = vmatpush1.bf16.msra.mxu0 %v7530_v63  ;;  %v8342_v63 = vld [vmem:[#allocation2 + $0xe0] sm:$0xff] }
 0x294   : > { %v3148_v40 = vrot.slane %v7767_v62, 2  ;;  %v7560_v62 = vpack.c.bf16 %v3508_v49, %v3505_v18  ;;  %v3525_v33 = vld [vmem:[#allocation6 + $0x230] sm:$0xff]  ;;  %v3520_v18 = vld [vmem:[#allocation6 + $0x208] sm:$0xff] }
 0x295   : > { %2154 = vmatmul.mubr.f32.gmra.mrb[10].mxu0 %v8325_v27  ;;  %7533 = vmatprep.subr.bf16.mxu0 %v7532_v36  ;;  %v8339_v27 = vld [vmem:[#allocation2 + $0xc8] sm:$0xff]  ;;  %v3517_v21 = vld [vmem:[#allocation6 + $0x1f0] sm:$0xff]  ;;  %v7540_v36 = vpack.c.bf16 %v3525_v33, %v3522_v55 }
 0x296   : > { %v9456_v39 = vsel %vm3071_vm1, %v3147_v17, %v3148_v40  ;;  %v9459_v5 = vsel %vm3071_vm1, %v3148_v40, %v3150_v38  ;;  %2158 = vmatprep.mubr.f32.mxu0 %v10785_v26  ;;  %v8336_v38 = vld [vmem:[#allocation2 + $0xb0] sm:$0xff]  ;;  %7561 = vmatprep.subr.bf16.mxu1 %v7560_v62  ;;  %v8337_v17 = vld [vmem:[#allocation2 + $0xb8] sm:$0xff]  ;;  %v8338_v40 = vld [vmem:[#allocation2 + $0xc0] sm:$0xff] }
 0x297   : > { %7563 = vmatpush3.bf16.msra.mxu1 %v7560_v62  ;;  %v3521_v49 = vld [vmem:[#allocation6 + $0x210] sm:$0xff]  ;;  %v3524_v62 = vld [vmem:[#allocation6 + $0x228] sm:$0xff] }
 0x298   : > { %v8344_v47 = vld [vmem:[#allocation2 + $0xf0] sm:$0xff] }
 0x299   : > { %2159 = vmatmul.mubr.f32.gmra.mrb[12].mxu0 %v8326_v23  ;;  %v8340_v23 = vld [vmem:[#allocation2 + $0xd0] sm:$0xff] }
 0x29a   : > { %2164 = vmatprep.mubr.f32.mxu0 %v10785_v26  ;;  %v3533_v55 = vld [vmem:[#allocation6 + $0x270] sm:$0xff] }
 0x29d   : > { %2165 = vmatmul.mubr.f32.gmra.mrb[14].mxu0 %v8327_v48  ;;  %v3509_v48 = vld [vmem:[#allocation6 + $0x1b0] sm:$0xff] }
 0x29e   : > { %2170 = vmatprep.mubr.f32.mxu0 %v10785_v26 }
 0x2a1   : > { %2171 = vmatmul.mubr.f32.gmra.mrb[16].mxu0 %v8328_v3  ;;  %v3512_v3 = vld [vmem:[#allocation6 + $0x1c8] sm:$0xff] }
 0x2a2   : > { %2175 = vmatprep.mubr.f32.mxu0 %v10785_v26 }
 0x2a5   : > { %2176 = vmatmul.mubr.f32.gmra.mrb[18].mxu0 %v8329_v54  ;;  %v7534_v54 = vpack.c.bf16 %v3512_v3, %v3509_v48  ;;  %v8343_v48 = vld [vmem:[#allocation2 + $0xe8] sm:$0xff] }
 0x2a6   : > { %2181 = vmatprep.mubr.f32.mxu0 %v10785_v26 }
 0x2a7   : > { %7535 = vmatpush1.bf16.msra.mxu0 %v7534_v54  ;;  %v3526_v54 = vld [vmem:[#allocation6 + $0x238] sm:$0xff] }
 0x2a9   : > { %2182 = vmatmul.mubr.f32.gmra.mrb[20].mxu0 %v8330_v42  ;;  %v3516_v42 = vld [vmem:[#allocation6 + $0x1e8] sm:$0xff] }
 0x2aa   : > { %2187 = vmatprep.mubr.f32.mxu0 %v10785_v26 }
 0x2ad   : > { %2188 = vmatmul.mubr.f32.gmra.mrb[22].mxu0 %v8331_v56  ;;  %v3519_v56 = vld [vmem:[#allocation6 + $0x200] sm:$0xff] }
 0x2ae   : > { %2192 = vmatprep.mubr.f32.mxu0 %v10785_v26 }
 0x2b1   : > { %2193 = vmatmul.mubr.f32.gmra.mrb[24].mxu0 %v8332_v44  ;;  %v3511_v44 = vld [vmem:[#allocation6 + $0x1c0] sm:$0xff] }
 0x2b2   : > { %2198 = vmatprep.mubr.f32.mxu0 %v10785_v26 }
 0x2b5   : > { %2199 = vmatmul.mubr.f32.gmra.mrb[26].mxu0 %v8333_v12  ;;  %v8341_v12 = vld [vmem:[#allocation2 + $0xd8] sm:$0xff] }
 0x2b6   : > { %2204 = vmatprep.mubr.f32.mxu0 %v10785_v26 }
 0x2b9   : > { %2205 = vmatmul.mubr.f32.gmra.mrb[28].mxu0 %v8334_v41  ;;  %v7536_v41 = vpack.c.bf16 %v3519_v56, %v3516_v42  ;;  %v3527_v42 = vld [vmem:[#allocation6 + $0x240] sm:$0xff]  ;;  %v3530_v56 = vld [vmem:[#allocation6 + $0x258] sm:$0xff] }
 0x2ba   : > { %2209 = vmatprep.mubr.f32.mxu0 %v10785_v26 }
 0x2bb   : > { %7537 = vmatprep.subr.bf16.mxu0 %v7536_v41  ;;  %v3534_v41 = vld [vmem:[#allocation6 + $0x278] sm:$0xff] }
 0x2bc   : > { %7539 = vmatpush1.bf16.msra.mxu0 %v7538_v35  ;;  %v3532_v35 = vld [vmem:[#allocation6 + $0x268] sm:$0xff] }
 0x2bd   : > { %2210 = vmatmul.mubr.f32.gmra.mrb[30].mxu0 %v8335_v57  ;;  %v3514_v57 = vld [vmem:[#allocation6 + $0x1d8] sm:$0xff]  ;;  %7541 = vmatprep.subr.bf16.mxu0 %v7540_v36  ;;  %v7576_v33 = vpack.c.bf16 %v3532_v35, %v3529_v45  ;;  %v3540_v36 = vld [vmem:[#allocation6 + $0x2a8] sm:$0xff] }
 0x2be   : > { %2215 = vmatprep.mubr.f32.mxu0 %v10785_v26  ;;  %v7564_v60 = vpack.c.bf16 %v3514_v57, %v3511_v44  ;;  %v3537_v57 = vld [vmem:[#allocation6 + $0x290] sm:$0xff]  ;;  %v3550_v35 = vld [vmem:[#allocation6 + $0x2f8] sm:$0xff] }
 0x2c0   : > { %7565 = vmatprep.subr.bf16.mxu1 %v7564_v60 }
 0x2c1   : > { %2216 = vmatmul.mubr.f32.gmra.mrb[32].mxu0 %v8336_v38  ;;  %7567 = vmatpush3.bf16.msra.mxu1 %v7564_v60  ;;  %v7568_v38 = vpack.c.bf16 %v3520_v18, %v3517_v21  ;;  %v7548_v60 = vpack.c.bf16 %v3537_v57, %v3534_v41  ;;  %v3536_v21 = vld [vmem:[#allocation6 + $0x288] sm:$0xff]  ;;  %v3543_v18 = vld [vmem:[#allocation6 + $0x2c0] sm:$0xff]  ;;  %v3545_v41 = vld [vmem:[#allocation6 + $0x2d0] sm:$0xff] }
 0x2c2   : > { %2221 = vmatprep.mubr.f32.mxu0 %v10785_v26  ;;  %v3548_v57 = vld [vmem:[#allocation6 + $0x2e8] sm:$0xff] }
 0x2c3   : > { %7569 = vmatprep.subr.bf16.mxu1 %v7568_v38 }
 0x2c5   : > { %2222 = vmatmul.mubr.f32.gmra.mrb[34].mxu0 %v8337_v17  ;;  %v7542_v17 = vpack.c.bf16 %v3524_v62, %v3521_v49  ;;  %7571 = vmatpush3.bf16.msra.mxu1 %v7568_v38  ;;  %v3535_v49 = vld [vmem:[#allocation6 + $0x280] sm:$0xff]  ;;  %v8345_v62 = vld [vmem:[#allocation2 + $0xf8] sm:$0xff]  ;;  %v7552_v38 = vpack.c.bf16 %v3543_v18, %v3540_v36  ;;  %v8351_v18 = vld [vmem:[#allocation2 + $0x128] sm:$0xff] }
 0x2c6   : > { %2226 = vmatprep.mubr.f32.mxu0 %v10785_v26  ;;  %v8350_v36 = vld [vmem:[#allocation2 + $0x120] sm:$0xff] }
 0x2c7   : > { %7543 = vmatpush1.bf16.msra.mxu0 %v7542_v17  ;;  %v3538_v17 = vld [vmem:[#allocation6 + $0x298] sm:$0xff] }
 0x2c9   : > { %2227 = vmatmul.mubr.f32.gmra.mrb[36].mxu0 %v8338_v40  ;;  %v3528_v40 = vld [vmem:[#allocation6 + $0x248] sm:$0xff] }
 0x2ca   : > { %2232 = vmatprep.mubr.f32.mxu0 %v10785_v26 }
 0x2cd   : > { %2233 = vmatmul.mubr.f32.gmra.mrb[38].mxu0 %v8339_v27  ;;  %v3531_v27 = vld [vmem:[#allocation6 + $0x260] sm:$0xff] }
 0x2ce   : > { %2238 = vmatprep.mubr.f32.mxu0 %v10785_v26  ;;  %v7544_v3 = vpack.c.bf16 %v3531_v27, %v3528_v40  ;;  %v3539_v40 = vld [vmem:[#allocation6 + $0x2a0] sm:$0xff]  ;;  %v3542_v27 = vld [vmem:[#allocation6 + $0x2b8] sm:$0xff] }
 0x2d0   : > { %7545 = vmatprep.subr.bf16.mxu0 %v7544_v3  ;;  %v3546_v3 = vld [vmem:[#allocation6 + $0x2d8] sm:$0xff] }
 0x2d1   : > { %2239 = vmatmul.mubr.f32.gmra.mrb[40].mxu0 %v8340_v23  ;;  %v3523_v23 = vld [vmem:[#allocation6 + $0x220] sm:$0xff] }
 0x2d2   : > { %2243 = vmatprep.mubr.f32.mxu0 %v10785_v26  ;;  %v7572_v44 = vpack.c.bf16 %v3526_v54, %v3523_v23  ;;  %v7580_v23 = vpack.c.bf16 %v3538_v17, %v3535_v49  ;;  %v3549_v54 = vld [vmem:[#allocation6 + $0x2f0] sm:$0xff]  ;;  %v8355_v17 = vld [vmem:[#allocation2 + $0x148] sm:$0xff] }
 0x2d3   : > { %v8352_v49 = vld [vmem:[#allocation2 + $0x130] sm:$0xff] }
 0x2d4   : > { %7573 = vmatprep.subr.bf16.mxu1 %v7572_v44 }
 0x2d5   : > { %2244 = vmatmul.mubr.f32.gmra.mrb[42].mxu0 %v8341_v12  ;;  %v7546_v12 = vpack.c.bf16 %v3530_v56, %v3527_v42  ;;  %7575 = vmatpush3.bf16.msra.mxu1 %v7572_v44  ;;  %v3541_v42 = vld [vmem:[#allocation6 + $0x2b0] sm:$0xff]  ;;  %v8346_v56 = vld [vmem:[#allocation2 + $0x100] sm:$0xff]  ;;  %v7556_v44 = vpack.c.bf16 %v3549_v54, %v3546_v3 }
 0x2d6   : > { %2249 = vmatprep.mubr.f32.mxu0 %v10785_v26  ;;  %7577 = vmatprep.subr.bf16.mxu1 %v7576_v33 }
 0x2d7   : > { %7547 = vmatpush1.bf16.msra.mxu0 %v7546_v12  ;;  %v3544_v12 = vld [vmem:[#allocation6 + $0x2c8] sm:$0xff] }
 0x2d8   : > { %7549 = vmatprep.subr.bf16.mxu0 %v7548_v60  ;;  %v7584_v45 = vpack.c.bf16 %v3544_v12, %v3541_v42  ;;  %v3547_v60 = vld [vmem:[#allocation6 + $0x2e0] sm:$0xff] }
 0x2d9   : > { %2250 = vmatmul.mubr.f32.gmra.mrb[44].mxu0 %v8342_v63  ;;  %v7550_v63 = vpack.c.bf16 %v3536_v21, %v3533_v55  ;;  %7579 = vmatpush3.bf16.msra.mxu1 %v7576_v33  ;;  %v8347_v55 = vld [vmem:[#allocation2 + $0x108] sm:$0xff]  ;;  %v7588_v33 = vpack.c.bf16 %v3550_v35, %v3547_v60  ;;  %v8348_v21 = vld [vmem:[#allocation2 + $0x110] sm:$0xff] }
 0x2da   : > { %2255 = vmatprep.mubr.f32.mxu0 %v10785_v26  ;;  %7581 = vmatprep.subr.bf16.mxu1 %v7580_v23  ;;  %v10795_v35 = vld [vmem:[#allocation12_spill] sm:$0xff] }
 0x2db   : > { %7551 = vmatpush1.bf16.msra.mxu0 %v7550_v63  ;;  %v8349_v63 = vld [vmem:[#allocation2 + $0x118] sm:$0xff] }
 0x2dc   : > { %7553 = vmatprep.subr.bf16.mxu0 %v7552_v38  ;;  %v8354_v38 = vld [vmem:[#allocation2 + $0x140] sm:$0xff] }
 0x2dd   : > { %2256 = vmatmul.mubr.f32.gmra.mrb[46].mxu0 %v8343_v48  ;;  %v7554_v48 = vpack.c.bf16 %v3542_v27, %v3539_v40  ;;  %7583 = vmatpush3.bf16.msra.mxu1 %v7580_v23  ;;  %v3408_v23 = vld [vmem:[#allocation6 + $0x8] sm:$0xff] }
 0x2de   : > { %2260 = vmatprep.mubr.f32.mxu0 %v10785_v26  ;;  %7585 = vmatprep.subr.bf16.mxu1 %v7584_v45 }
 0x2df   : > { %7555 = vmatpush1.bf16.msra.mxu0 %v7554_v48  ;;  %v3411_v48 = vld [vmem:[#allocation6 + $0x20] sm:$0xff] }
 0x2e0   : > { %7557 = vmatprep.subr.bf16.mxu0 %v7556_v44  ;;  %v7592_v54 = vpack.c.bf16 %v3411_v48, %v3408_v23 }
 0x2e1   : > { %2261 = vmatmul.mubr.f32.gmra.mrb[48].mxu0 %v8344_v47  ;;  %v7558_v47 = vpack.c.bf16 %v3548_v57, %v3545_v41  ;;  %7587 = vmatpush3.bf16.msra.mxu1 %v7584_v45 }
 0x2e2   : > { %2266 = vmatprep.mubr.f32.mxu0 %v10785_v26  ;;  %7589 = vmatprep.subr.bf16.mxu1 %v7588_v33 }
 0x2e3   : > { %7559 = vmatpush1.bf16.msra.mxu0 %v7558_v47  ;;  %v9514_v47 = vld [vmem:[%s10758_s2] ss:$0 sm:$0xff] }
 0x2e5   : > { %2267 = vmatmul.mubr.f32.gmra.mrb[50].mxu0 %v8345_v62  ;;  %7591 = vmatpush3.bf16.msra.mxu1 %v7588_v33  ;;  %v8353_v62 = vld [vmem:[#allocation2 + $0x138] sm:$0xff]  ;;  %v9520_v33 = vld [vmem:[%s10759_s3] ss:$0 sm:$0xff] }
 0x2e6   : > { %2272 = vmatprep.mubr.f32.mxu0 %v10785_v26  ;;  %7593 = vmatprep.subr.bf16.mxu1 %v7592_v54 }
 0x2e9   : > { %2273 = vmatmul.mubr.f32.gmra.mrb[52].mxu0 %v8346_v56 }
 0x2ea   : > { %2277 = vmatprep.mubr.f32.mxu0 %v10785_v26 }
 0x2ed   : > { %2278 = vmatmul.mubr.f32.gmra.mrb[54].mxu0 %v8347_v55 }
 0x2ee   : > { %2283 = vmatprep.mubr.f32.mxu0 %v10785_v26 }
 0x2f1   : > { %2284 = vmatmul.mubr.f32.gmra.mrb[56].mxu0 %v8348_v21 }
 0x2f2   : > { %2289 = vmatprep.mubr.f32.mxu0 %v10785_v26 }
 0x2f5   : > { %2290 = vmatmul.mubr.f32.gmra.mrb[58].mxu0 %v8349_v63 }
 0x2f6   : > { %2294 = vmatprep.mubr.f32.mxu0 %v10785_v26 }
 0x2f9   : > { %2295 = vmatmul.mubr.f32.gmra.mrb[60].mxu0 %v8350_v36 }
 0x2fa   : > { %2300 = vmatprep.mubr.f32.mxu0 %v10785_v26 }
 0x2fd   : > { %2301 = vmatmul.mubr.f32.gmra.mrb[62].mxu0 %v8351_v18 }
 0x2fe   : > { %2306 = vmatprep.mubr.f32.mxu0 %v10785_v26 }
 0x301   : > { %2307 = vmatmul.mubr.f32.gmra.mrb[64].mxu0 %v8352_v49 }
 0x302   : > { %2311 = vmatprep.mubr.f32.mxu0 %v10785_v26 }
 0x305   : > { %2312 = vmatmul.mubr.f32.gmra.mrb[66].mxu0 %v8353_v62 }
 0x306   : > { %2317 = vmatprep.mubr.f32.mxu0 %v10785_v26 }
 0x309   : > { %2318 = vmatmul.mubr.f32.gmra.mrb[68].mxu0 %v8354_v38 }
 0x30a   : > { %2323 = vmatprep.mubr.f32.mxu0 %v10785_v26 }
 0x30d   : > { %2324 = vmatmul.mubr.f32.gmra.mrb[70].mxu0 %v8355_v17 }
 0x30e   : > { %2328 = vmatprep.mubr.f32.mxu0 %v10785_v26 }
 0x311   : > { %2329 = vmatmul.mubr.f32.gmra.mrb[72].mxu0 %v9363_v29  ;;  %v8356_v29 = vld [vmem:[#allocation2 + $0x180] sm:$0xff] }
 0x312   : > { %2334 = vmatprep.mubr.f32.mxu0 %v10785_v26 }
 0x315   : > { %2335 = vmatmul.mubr.f32.gmra.mrb[74].mxu0 %v9372_v13  ;;  %v8357_v13 = vld [vmem:[#allocation2 + $0x188] sm:$0xff] }
 0x316   : > { %2340 = vmatprep.mubr.f32.mxu0 %v10785_v26 }
 0x319   : > { %2341 = vmatmul.mubr.f32.gmra.mrb[76].mxu0 %v9381_v30  ;;  %v8358_v30 = vld [vmem:[#allocation2 + $0x190] sm:$0xff] }
 0x31a   : > { %2345 = vmatprep.mubr.f32.mxu0 %v10785_v26 }
 0x31d   : > { %2346 = vmatmul.mubr.f32.gmra.mrb[78].mxu0 %v9393_v7  ;;  %v8359_v7 = vld [vmem:[#allocation2 + $0x198] sm:$0xff] }
 0x31e   : > { %2351 = vmatprep.mubr.f32.mxu0 %v10785_v26 }
 0x321   : > { %2352 = vmatmul.mubr.f32.gmra.mrb[80].mxu0 %v9402_v25  ;;  %v8360_v25 = vld [vmem:[#allocation2 + $0x1a0] sm:$0xff] }
 0x322   : > { %2357 = vmatprep.mubr.f32.mxu0 %v10785_v26 }
 0x325   : > { %2358 = vmatmul.mubr.f32.gmra.mrb[82].mxu0 %v9411_v34  ;;  %v8361_v34 = vld [vmem:[#allocation2 + $0x1a8] sm:$0xff] }
 0x326   : > { %2362 = vmatprep.mubr.f32.mxu0 %v10785_v26 }
 0x329   : > { %2363 = vmatmul.mubr.f32.gmra.mrb[84].mxu0 %v8356_v29 }
 0x32a   : > { %2368 = vmatprep.mubr.f32.mxu0 %v10785_v26 }
 0x32d   : > { %2369 = vmatmul.mubr.f32.gmra.mrb[86].mxu0 %v8357_v13 }
 0x32e   : > { %2374 = vmatprep.mubr.f32.mxu0 %v10785_v26 }
 0x331   : > { %2375 = vmatmul.mubr.f32.gmra.mrb[88].mxu0 %v8358_v30 }
 0x332   : > { %2379 = vmatprep.mubr.f32.mxu0 %v10785_v26 }
 0x335   : > { %2380 = vmatmul.mubr.f32.gmra.mrb[90].mxu0 %v8359_v7 }
 0x336   : > { %2385 = vmatprep.mubr.f32.mxu0 %v10785_v26 }
 0x339   : > { %2386 = vmatmul.mubr.f32.gmra.mrb[92].mxu0 %v8360_v25 }
 0x33a   : > { %2391 = vmatprep.mubr.f32.mxu0 %v10785_v26 }
 0x33d   : > { %2392 = vmatmul.mubr.f32.gmra.mrb[94].mxu0 %v8361_v34 }
 0x33e   : > { %3615 = vmatprep.mubr.f32.mxu0 %v10785_v26 }
 0x354   : > { %v2126_v40 = vpop.f32.mrb[0].mxu0 }
 0x355   : > { %v2128_v27 = vpop.f32.mrb[1].mxu0 }
 0x356   : > { %v2879_v56 = vrot.slane %v2128_v27, 1 }
 0x358   : > { %v2132_v3 = vpop.f32.mrb[2].mxu0 }
 0x359   : > { %v2134_v42 = vpop.f32.mrb[3].mxu0 }
 0x35a   : > { %v2880_v44 = vrot.slane %v2134_v42, 1 }
 0x35c   : > { %v2881_v12 = vsel %vm2878_vm2, %v2879_v56, %v2880_v44  ;;  %v2138_v41 = vpop.f32.mrb[4].mxu0 }
 0x35d   : > { %v2991_v57 = vadd.f32 %v2881_v12, %v2126_v40  ;;  %v2139_v45 = vpop.f32.mrb[5].mxu0 }
 0x35e   : > { %v2882_v60 = vrot.slane %v2139_v45, 1  ;;  %v3407_v45 = vld [vmem:[#allocation6] sm:$0xff] }
 0x35f   : > { %v3184_v55 = vadd.f32 %v10795_v35, %v2991_v57 }
 0x360   : > { %v2883_v21 = vsel %vm2878_vm2, %v2880_v44, %v2882_v60  ;;  %v2143_v63 = vpop.f32.mrb[6].mxu0  ;;  %v3410_v60 = vld [vmem:[#allocation6 + $0x18] sm:$0xff] }
 0x361   : > { %v3223_v36 = vmul.f32 %v9514_v47, %v3184_v55  ;;  %v2992_v18 = vadd.f32 %v2883_v21, %v2132_v3  ;;  %v2145_v49 = vpop.f32.mrb[7].mxu0  ;;  %v3414_v21 = vld [vmem:[#allocation6 + $0x38] sm:$0xff] }
 0x362   : > { %v2884_v7 = vrot.slane %v2145_v49, 1 }
 0x363   : > { %v3262_v62 = vadd.f32 %v9520_v33, %v3223_v36  ;;  %v3185_v38 = vadd.f32 %v9268_v10, %v2992_v18 }
 0x364   : > { %v2149_v17 = vpop.f32.mrb[8].mxu0 }
 0x365   : > { %v3294_v29 = vmax.f32 %v3262_v62, 0.0  ;;  %v3224_v13 = vmul.f32 %v9514_v47, %v3185_v38  ;;  %v2151_v30 = vpop.f32.mrb[9].mxu0  ;;  %v7594_v62 = vpack.c.bf16 %v3410_v60, %v3407_v45  ;;  %v3413_v38 = vld [vmem:[#allocation6 + $0x30] sm:$0xff] }
 0x366   : > { %v2885_v25 = vrot.slane %v2151_v30, 1 }
 0x367   : > { %3327 = vst [vmem:[#allocation3 + $0x19] sm:$0xff] %v3294_v29  ;;  %v3263_v34 = vadd.f32 %v9520_v33, %v3224_v13 }
 0x368   : > { %v2886_v40 = vsel %vm2878_vm2, %v2884_v7, %v2885_v25  ;;  %v2155_v27 = vpop.f32.mrb[10].mxu0 }
 0x369   : > { %v3295_v23 = vmax.f32 %v3263_v34, 0.0  ;;  %v2993_v48 = vadd.f32 %v2886_v40, %v2143_v63  ;;  %v2156_v3 = vpop.f32.mrb[11].mxu0  ;;  %v3417_v63 = vld [vmem:[#allocation6 + $0x50] sm:$0xff]  ;;  %v3420_v34 = vld [vmem:[#allocation6 + $0x68] sm:$0xff]  ;;  %v3423_v40 = vld [vmem:[#allocation6 + $0x80] sm:$0xff] }
 0x36a   : > { %v2887_v54 = vrot.slane %v2156_v3, 1  ;;  %v7596_v7 = vpack.c.bf16 %v3417_v63, %v3414_v21 }
 0x36b   : > { %3328 = vst [vmem:[#allocation3 + $0x21] sm:$0xff] %v3295_v23  ;;  %v3186_v10 = vadd.f32 %v9279_v11, %v2993_v48 }
 0x36c   : > { %v2888_v42 = vsel %vm2878_vm2, %v2885_v25, %v2887_v54  ;;  %v2160_v56 = vpop.f32.mrb[12].mxu0  ;;  %v3416_v25 = vld [vmem:[#allocation6 + $0x48] sm:$0xff] }
 0x36d   : > { %v3225_v44 = vmul.f32 %v9514_v47, %v3186_v10  ;;  %v2994_v12 = vadd.f32 %v2888_v42, %v2149_v17  ;;  %v2162_v41 = vpop.f32.mrb[13].mxu0  ;;  %v7598_v10 = vpack.c.bf16 %v3416_v25, %v3413_v38 }
 0x36e   : > { %v3455_v57 = vld [vmem:[#allocation3 + $0x18] sm:$0xff]  ;;  %v2889_v17 = vrot.slane %v2162_v41, 1  ;;  %v3422_v41 = vld [vmem:[#allocation6 + $0x78] sm:$0xff] }
 0x36f   : > { %v3264_v35 = vadd.f32 %v9520_v33, %v3225_v44  ;;  %v3187_v55 = vadd.f32 %v9282_v2, %v2994_v12  ;;  %3616 = vmatmul.mubr.f32.vlgmr.msra.gmra.mrb[144].mxu0 %v3455_v57  ;;  %7056 = vmatprep.mubr.f32.mxu1 %v3455_v57  ;;  %v7600_v44 = vpack.c.bf16 %v3423_v40, %v3420_v34  ;;  %v3419_v12 = vld [vmem:[#allocation6 + $0x60] sm:$0xff] }
 0x370   : > { %v2166_v36 = vpop.f32.mrb[14].mxu0  ;;  %3621 = vmatprep.mubr.f32.mxu0 %v10785_v26  ;;  %v7602_v21 = vpack.c.bf16 %v3422_v41, %v3419_v12 }
 0x371   : > { %v3296_v11 = vmax.f32 %v3264_v35, 0.0  ;;  %v3226_v18 = vmul.f32 %v9514_v47, %v3187_v55  ;;  %v2168_v49 = vpop.f32.mrb[15].mxu0 }
 0x372   : > { %v2890_v29 = vrot.slane %v2168_v49, 1  ;;  %v3456_v13 = vld [vmem:[#allocation3 + $0x20] sm:$0xff]  ;;  %v3457_v30 = vld [vmem:[#allocation3 + $0x28] sm:$0xff] }
 0x373   : > { %3329 = vst [vmem:[#allocation3 + $0x31] sm:$0xff] %v3296_v11  ;;  %v3265_v2 = vadd.f32 %v9520_v33, %v3226_v18  ;;  %3622 = vmatmul.mubr.f32.gmra.mrb[146].mxu0 %v3456_v13  ;;  %7057 = vmatmul.mubr.f32.vlgmr.msra.gmra.mrb[48].mxu1 %v3456_v13  ;;  %v3429_v49 = vld [vmem:[#allocation6 + $0xb0] sm:$0xff] }
 0x374   : > { %v2891_v27 = vsel %vm2878_vm2, %v2889_v17, %v2890_v29  ;;  %v2172_v23 = vpop.f32.mrb[16].mxu0  ;;  %7059 = vmatprep.mubr.f32.mxu1 %v3457_v30  ;;  %3627 = vmatprep.mubr.f32.mxu0 %v10785_v26 }
 0x375   : > { %v3297_v48 = vmax.f32 %v3265_v2, 0.0  ;;  %v2995_v3 = vadd.f32 %v2891_v27, %v2160_v56  ;;  %v2173_v54 = vpop.f32.mrb[17].mxu0  ;;  %7595 = vmatpush1.bf16.msra.mxu1 %v7594_v62  ;;  %v3425_v62 = vld [vmem:[#allocation6 + $0x90] sm:$0xff] }
 0x376   : > { %v2892_v42 = vrot.slane %v2173_v54, 1  ;;  %7597 = vmatprep.subr.bf16.mxu1 %v7596_v7 }
 0x377   : > { %3330 = vst [vmem:[#allocation3 + $0x39] sm:$0xff] %v3297_v48  ;;  %v3188_v57 = vadd.f32 %v9293_v37, %v2995_v3  ;;  %3628 = vmatmul.mubr.f32.gmra.mrb[148].mxu0 %v3457_v30  ;;  %v3426_v37 = vld [vmem:[#allocation6 + $0x98] sm:$0xff] }
 0x378   : > { %v2893_v45 = vsel %vm2878_vm2, %v2890_v29, %v2892_v42  ;;  %v2177_v60 = vpop.f32.mrb[18].mxu0  ;;  %3632 = vmatprep.mubr.f32.mxu0 %v10785_v26  ;;  %v7604_v17 = vpack.c.bf16 %v3429_v49, %v3426_v37  ;;  %v3428_v29 = vld [vmem:[#allocation6 + $0xa8] sm:$0xff] }
 0x379   : > { %v3227_v35 = vmul.f32 %v9514_v47, %v3188_v57  ;;  %v2996_v56 = vadd.f32 %v2893_v45, %v2166_v36  ;;  %v2179_v55 = vpop.f32.mrb[19].mxu0  ;;  %7599 = vmatpush1.bf16.msra.mxu1 %v7598_v10  ;;  %v7606_v7 = vpack.c.bf16 %v3428_v29, %v3425_v62 }
 0x37a   : > { %v3458_v63 = vld [vmem:[#allocation3 + $0x30] sm:$0xff]  ;;  %7601 = vmatprep.subr.bf16.mxu1 %v7600_v44  ;;  %v2894_v25 = vrot.slane %v2179_v55, 1  ;;  %v3432_v55 = vld [vmem:[#allocation6 + $0xc8] sm:$0xff] }
 0x37b   : > { %v3266_v11 = vadd.f32 %v9520_v33, %v3227_v35  ;;  %v3189_v18 = vadd.f32 %v9300_v59, %v2996_v56  ;;  %3633 = vmatmul.mubr.f32.gmra.mrb[150].mxu0 %v3458_v63  ;;  %7060 = vmatmul.mubr.f32.gmra.mrb[50].mxu1 %v3458_v63 }
 0x37c   : > { %v2183_v38 = vpop.f32.mrb[20].mxu0  ;;  %3638 = vmatprep.mubr.f32.mxu0 %v10785_v26 }
 0x37d   : > { %v3298_v36 = vmax.f32 %v3266_v11, 0.0  ;;  %v3228_v13 = vmul.f32 %v9514_v47, %v3189_v18  ;;  %v2185_v30 = vpop.f32.mrb[21].mxu0  ;;  %7603 = vmatpush1.bf16.msra.mxu1 %v7602_v21  ;;  %v3435_v21 = vld [vmem:[#allocation6 + $0xe0] sm:$0xff]  ;;  %v3434_v18 = vld [vmem:[#allocation6 + $0xd8] sm:$0xff] }
 0x37e   : > { %v2895_v2 = vrot.slane %v2185_v30, 1  ;;  %v3459_v34 = vld [vmem:[#allocation3 + $0x38] sm:$0xff]  ;;  %v3460_v59 = vld [vmem:[#allocation3 + $0x40] sm:$0xff]  ;;  %7605 = vmatprep.subr.bf16.mxu1 %v7604_v17  ;;  %v7608_v11 = vpack.c.bf16 %v3435_v21, %v3432_v55 }
 0x37f   : > { %3331 = vst [vmem:[#allocation3 + $0x49] sm:$0xff] %v3298_v36  ;;  %v3267_v40 = vadd.f32 %v9520_v33, %v3228_v13  ;;  %3639 = vmatmul.mubr.f32.gmra.mrb[152].mxu0 %v3459_v34  ;;  %7062 = vmatprep.mubr.f32.mxu1 %v3459_v34 }
 0x380   : > { %v2896_v27 = vsel %vm2878_vm2, %v2894_v25, %v2895_v2  ;;  %v2189_v23 = vpop.f32.mrb[22].mxu0  ;;  %7063 = vmatmul.mubr.f32.gmra.mrb[52].mxu1 %v3460_v59  ;;  %3644 = vmatprep.mubr.f32.mxu0 %v10785_v26 }
 0x381   : > { %v3299_v48 = vmax.f32 %v3267_v40, 0.0  ;;  %v2997_v3 = vadd.f32 %v2896_v27, %v2177_v60  ;;  %v2190_v54 = vpop.f32.mrb[23].mxu0  ;;  %7607 = vmatpush1.bf16.msra.mxu1 %v7606_v7 }
 0x382   : > { %v2897_v10 = vrot.slane %v2190_v54, 1  ;;  %7609 = vmatprep.subr.bf16.mxu1 %v7608_v11 }
 0x383   : > { %3332 = vst [vmem:[#allocation3 + $0x51] sm:$0xff] %v3299_v48  ;;  %v3190_v42 = vadd.f32 %v9307_v1, %v2997_v3  ;;  %3645 = vmatmul.mubr.f32.gmra.mrb[154].mxu0 %v3460_v59  ;;  %v3431_v1 = vld [vmem:[#allocation6 + $0xc0] sm:$0xff] }
 0x384   : > { %v2898_v44 = vsel %vm2878_vm2, %v2895_v2, %v2897_v10  ;;  %v2194_v12 = vpop.f32.mrb[24].mxu0  ;;  %3649 = vmatprep.mubr.f32.mxu0 %v10785_v26 }
 0x385   : > { %v3229_v41 = vmul.f32 %v9514_v47, %v3190_v42  ;;  %v2998_v57 = vadd.f32 %v2898_v44, %v2183_v38  ;;  %v2196_v45 = vpop.f32.mrb[25].mxu0  ;;  %v7610_v38 = vpack.c.bf16 %v3434_v18, %v3431_v1 }
 0x386   : > { %v3461_v35 = vld [vmem:[#allocation3 + $0x48] sm:$0xff]  ;;  %v2899_v17 = vrot.slane %v2196_v45, 1 }
 0x387   : > { %v3268_v56 = vadd.f32 %v9520_v33, %v3229_v41  ;;  %v3191_v60 = vadd.f32 %v9310_v15, %v2998_v57  ;;  %3650 = vmatmul.mubr.f32.gmra.mrb[156].mxu0 %v3461_v35  ;;  %7065 = vmatprep.mubr.f32.mxu1 %v3461_v35  ;;  %v3441_v41 = vld [vmem:[#allocation6 + $0x110] sm:$0xff]  ;;  %v3440_v35 = vld [vmem:[#allocation6 + $0x108] sm:$0xff] }
 0x388   : > { %v2200_v63 = vpop.f32.mrb[26].mxu0  ;;  %3655 = vmatprep.mubr.f32.mxu0 %v10785_v26  ;;  %7611 = vmatpush1.bf16.msra.mxu1 %v7610_v38 }
 0x389   : > { %v3300_v37 = vmax.f32 %v3268_v56, 0.0  ;;  %v3230_v49 = vmul.f32 %v9514_v47, %v3191_v60  ;;  %v2202_v62 = vpop.f32.mrb[27].mxu0 }
 0x38a   : > { %v2900_v29 = vrot.slane %v2202_v62, 1  ;;  %v3462_v36 = vld [vmem:[#allocation3 + $0x50] sm:$0xff]  ;;  %v3463_v13 = vld [vmem:[#allocation3 + $0x58] sm:$0xff] }
 0x38b   : > { %3333 = vst [vmem:[#allocation3 + $0x61] sm:$0xff] %v3300_v37  ;;  %v3269_v15 = vadd.f32 %v9520_v33, %v3230_v49  ;;  %3656 = vmatmul.mubr.f32.gmra.mrb[158].mxu0 %v3462_v36  ;;  %7066 = vmatmul.mubr.f32.gmra.mrb[54].mxu1 %v3462_v36 }
 0x38c   : > { %v2901_v30 = vsel %vm2878_vm2, %v2899_v17, %v2900_v29  ;;  %v2206_v7 = vpop.f32.mrb[28].mxu0  ;;  %7068 = vmatprep.mubr.f32.mxu1 %v3463_v13  ;;  %3661 = vmatprep.mubr.f32.mxu0 %v10785_v26 }
 0x38d   : > { %v3301_v25 = vmax.f32 %v3269_v15, 0.0  ;;  %v2999_v2 = vadd.f32 %v2901_v30, %v2194_v12  ;;  %v2207_v34 = vpop.f32.mrb[29].mxu0  ;;  %v3438_v12 = vld [vmem:[#allocation6 + $0xf8] sm:$0xff] }
 0x38e   : > { %v2902_v59 = vrot.slane %v2207_v34, 1  ;;  %v7612_v45 = vpack.c.bf16 %v3441_v41, %v3438_v12 }
 0x38f   : > { %3334 = vst [vmem:[#allocation3 + $0x69] sm:$0xff] %v3301_v25  ;;  %v3192_v40 = vadd.f32 %v9317_v16, %v2999_v2  ;;  %3662 = vmatmul.mubr.f32.gmra.mrb[160].mxu0 %v3463_v13  ;;  %v3437_v16 = vld [vmem:[#allocation6 + $0xf0] sm:$0xff] }
 0x390   : > { %v2903_v27 = vsel %vm2878_vm2, %v2900_v29, %v2902_v59  ;;  %v2211_v23 = vpop.f32.mrb[30].mxu0  ;;  %3666 = vmatprep.mubr.f32.mxu0 %v10785_v26  ;;  %v7614_v21 = vpack.c.bf16 %v3440_v35, %v3437_v16  ;;  %7613 = vmatprep.subr.bf16.mxu1 %v7612_v45  ;;  %v3449_v16 = vld [vmem:[#allocation6 + $0x150] sm:$0xff] }
 0x391   : > { %v3231_v48 = vmul.f32 %v9514_v47, %v3192_v40  ;;  %v3000_v3 = vadd.f32 %v2903_v27, %v2200_v63  ;;  %v2213_v54 = vpop.f32.mrb[31].mxu0  ;;  %v3444_v40 = vld [vmem:[#allocation6 + $0x128] sm:$0xff]  ;;  %v3447_v27 = vld [vmem:[#allocation6 + $0x140] sm:$0xff] }
 0x392   : > { %v3464_v10 = vld [vmem:[#allocation3 + $0x60] sm:$0xff]  ;;  %v2904_v1 = vrot.slane %v2213_v54, 1  ;;  %7615 = vmatpush1.bf16.msra.mxu1 %v7614_v21  ;;  %v3450_v54 = vld [vmem:[#allocation6 + $0x158] sm:$0xff] }
 0x393   : > { %v3270_v42 = vadd.f32 %v9520_v33, %v3231_v48  ;;  %v3193_v44 = vadd.f32 %v9324_v14, %v3000_v3  ;;  %3667 = vmatmul.mubr.f32.gmra.mrb[162].mxu0 %v3464_v10  ;;  %7069 = vmatmul.mubr.f32.gmra.mrb[56].mxu1 %v3464_v10  ;;  %v7616_v48 = vpack.c.bf16 %v3447_v27, %v3444_v40  ;;  %v3446_v3 = vld [vmem:[#allocation6 + $0x138] sm:$0xff]  ;;  %v3453_v10 = vld [vmem:[#allocation6 + $0x170] sm:$0xff] }
 0x394   : > { %v2217_v57 = vpop.f32.mrb[32].mxu0  ;;  %3672 = vmatprep.mubr.f32.mxu0 %v10785_v26 }
 0x395   : > { %v3302_v56 = vmax.f32 %v3270_v42, 0.0  ;;  %v3232_v60 = vmul.f32 %v9514_v47, %v3193_v44  ;;  %v2219_v55 = vpop.f32.mrb[33].mxu0  ;;  %7617 = vmatprep.subr.bf16.mxu1 %v7616_v48 }
 0x396   : > { %v2905_v63 = vrot.slane %v2219_v55, 1  ;;  %v3465_v11 = vld [vmem:[#allocation3 + $0x68] sm:$0xff]  ;;  %v3466_v18 = vld [vmem:[#allocation3 + $0x70] sm:$0xff] }
 0x397   : > { %3335 = vst [vmem:[#allocation3 + $0x79] sm:$0xff] %v3302_v56  ;;  %v3271_v14 = vadd.f32 %v9520_v33, %v3232_v60  ;;  %3673 = vmatmul.mubr.f32.gmra.mrb[164].mxu0 %v3465_v11  ;;  %7071 = vmatprep.mubr.f32.mxu1 %v3465_v11  ;;  %v7620_v56 = vpack.c.bf16 %v3453_v10, %v3450_v54  ;;  %v3452_v60 = vld [vmem:[#allocation6 + $0x168] sm:$0xff] }
 0x398   : > { %v2906_v37 = vsel %vm2878_vm2, %v2904_v1, %v2905_v63  ;;  %v2223_v49 = vpop.f32.mrb[34].mxu0  ;;  %7072 = vmatmul.mubr.f32.gmra.mrb[58].mxu1 %v3466_v18  ;;  %3678 = vmatprep.mubr.f32.mxu0 %v10785_v26 }
 0x399   : > { %v3303_v62 = vmax.f32 %v3271_v14, 0.0  ;;  %v3001_v38 = vadd.f32 %v2906_v37, %v2211_v23  ;;  %v2224_v17 = vpop.f32.mrb[35].mxu0  ;;  %v7622_v14 = vpack.c.bf16 %v3452_v60, %v3449_v16 }
 0x39a   : > { %v2907_v29 = vrot.slane %v2224_v17, 1 }
 0x39b   : > { %3336 = vst [vmem:[#allocation3 + $0x81] sm:$0xff] %v3303_v62  ;;  %v3194_v36 = vadd.f32 %v9331_v46, %v3001_v38  ;;  %3679 = vmatmul.mubr.f32.gmra.mrb[166].mxu0 %v3466_v18  ;;  %v3443_v46 = vld [vmem:[#allocation6 + $0x120] sm:$0xff] }
 0x39c   : > { %v2908_v13 = vsel %vm2878_vm2, %v2905_v63, %v2907_v29  ;;  %v2228_v15 = vpop.f32.mrb[36].mxu0  ;;  %3683 = vmatprep.mubr.f32.mxu0 %v10785_v26  ;;  %v7618_v41 = vpack.c.bf16 %v3446_v3, %v3443_v46 }
 0x39d   : > { %v3233_v30 = vmul.f32 %v9514_v47, %v3194_v36  ;;  %v3002_v7 = vadd.f32 %v2908_v13, %v2217_v57  ;;  %v2230_v25 = vpop.f32.mrb[37].mxu0 }
 0x39e   : > { %v3467_v2 = vld [vmem:[#allocation3 + $0x78] sm:$0xff]  ;;  %v2909_v57 = vrot.slane %v2230_v25, 1  ;;  %7619 = vmatpush1.bf16.msra.mxu1 %v7618_v41 }
 0x39f   : > { %v3272_v34 = vadd.f32 %v9520_v33, %v3233_v30  ;;  %v3195_v59 = vadd.f32 %v9334_v19, %v3002_v7  ;;  %3684 = vmatmul.mubr.f32.gmra.mrb[168].mxu0 %v3467_v2  ;;  %7074 = vmatprep.mubr.f32.mxu1 %v3467_v2  ;;  %v3409_v7 = vld [vmem:[#allocation6 + $0x10] sm:$0xff]  ;;  %v3412_v25 = vld [vmem:[#allocation6 + $0x28] sm:$0xff] }
 0x3a0   : > { %v2234_v23 = vpop.f32.mrb[38].mxu0  ;;  %3689 = vmatprep.mubr.f32.mxu0 %v10785_v26  ;;  %7621 = vmatprep.subr.bf16.mxu1 %v7620_v56  ;;  %v9603_v40 = vpack.c.bf16 %v3412_v25, %v3409_v7 }
 0x3a1   : > { %v3304_v42 = vmax.f32 %v3272_v34, 0.0  ;;  %v3234_v44 = vmul.f32 %v9514_v47, %v3195_v59  ;;  %v2236_v12 = vpop.f32.mrb[39].mxu0 }
 0x3a2   : > { %v2910_v19 = vrot.slane %v2236_v12, 1  ;;  %v9580_v45 = vld [vmem:[#allocation3 + $0x80] sm:$0xff]  ;;  %v9582_v35 = vld [vmem:[#allocation3 + $0x88] sm:$0xff]  ;;  %7623 = vmatpush1.bf16.msra.mxu1 %v7622_v14 }
 0x3a3   : > { %3337 = vst [vmem:[#allocation3 + $0x91] sm:$0xff] %v3304_v42  ;;  %v3273_v55 = vadd.f32 %v9520_v33, %v3234_v44  ;;  %3690 = vmatmul.mubr.f32.gmra.mrb[170].mxu0 %v9580_v45  ;;  %7075 = vmatmul.mubr.f32.gmra.mrb[60].mxu1 %v9580_v45 }
 0x3a4   : > { %v2911_v21 = vsel %vm2878_vm2, %v2909_v57, %v2910_v19  ;;  %v2240_v1 = vpop.f32.mrb[40].mxu0  ;;  %7077 = vmatprep.mubr.f32.mxu1 %v9582_v35  ;;  %3695 = vmatprep.mubr.f32.mxu0 %v10785_v26 }
 0x3a5   : > { %v3305_v63 = vmax.f32 %v3273_v55, 0.0  ;;  %v3003_v11 = vadd.f32 %v2911_v21, %v2228_v15  ;;  %v2241_v18 = vpop.f32.mrb[41].mxu0  ;;  %7625 = vmatprep.subr.bf16.mxu1 %v9603_v40 }
 0x3a6   : > { %v2912_v37 = vrot.slane %v2241_v18, 1 }
 0x3a7   : > { %3338 = vst [vmem:[#allocation3 + $0x99] sm:$0xff] %v3305_v63  ;;  %v3196_v49 = vadd.f32 %v9341_v20, %v3003_v11  ;;  %3696 = vmatmul.mubr.f32.gmra.mrb[172].mxu0 %v9582_v35 }
 0x3a8   : > { %v2913_v62 = vsel %vm2878_vm2, %v2910_v19, %v2912_v37  ;;  %v2245_v38 = vpop.f32.mrb[42].mxu0  ;;  %3700 = vmatprep.mubr.f32.mxu0 %v10785_v26 }
 0x3a9   : > { %v3235_v17 = vmul.f32 %v9514_v47, %v3196_v49  ;;  %v3004_v29 = vadd.f32 %v2913_v62, %v2234_v23  ;;  %v2247_v36 = vpop.f32.mrb[43].mxu0 }
 0x3aa   : > { %v9595_v13 = vld [vmem:[#allocation3 + $0x90] sm:$0xff]  ;;  %v2914_v27 = vrot.slane %v2247_v36, 1 }
 0x3ab   : > { %v3274_v15 = vadd.f32 %v9520_v33, %v3235_v17  ;;  %v3197_v30 = vadd.f32 %v9348_v9, %v3004_v29  ;;  %3701 = vmatmul.mubr.f32.gmra.mrb[174].mxu0 %v9595_v13  ;;  %7078 = vmatmul.mubr.f32.gmra.mrb[62].mxu1 %v9595_v13 }
 0x3ac   : > { %v2251_v20 = vpop.f32.mrb[44].mxu0  ;;  %3706 = vmatprep.mubr.f32.mxu0 %v10785_v26 }
 0x3ad   : > { %v3306_v2 = vmax.f32 %v3274_v15, 0.0  ;;  %v3236_v34 = vmul.f32 %v9514_v47, %v3197_v30  ;;  %v2253_v59 = vpop.f32.mrb[45].mxu0 }
 0x3ae   : > { %v2915_v46 = vrot.slane %v2253_v59, 1  ;;  %v9605_v23 = vld [vmem:[#allocation3 + $0x98] sm:$0xff]  ;;  %v9607_v9 = vld [vmem:[#allocation3 + $0xa0] sm:$0xff] }
 0x3af   : > { %3339 = vst [vmem:[#allocation3 + $0xa9] sm:$0xff] %v3306_v2  ;;  %v3275_v48 = vadd.f32 %v9520_v33, %v3236_v34  ;;  %3707 = vmatmul.mubr.f32.gmra.mrb[176].mxu0 %v9605_v23  ;;  %7080 = vmatprep.mubr.f32.mxu1 %v9605_v23 }
 0x3b0   : > { %v2916_v3 = vsel %vm2878_vm2, %v2914_v27, %v2915_v46  ;;  %v2257_v54 = vpop.f32.mrb[46].mxu0  ;;  %7081 = vmatmul.mubr.f32.gmra.mrb[64].mxu1 %v9607_v9  ;;  %3712 = vmatprep.mubr.f32.mxu0 %v10785_v26 }
 0x3b1   : > { %v3307_v10 = vmax.f32 %v3275_v48, 0.0  ;;  %v3005_v42 = vadd.f32 %v2916_v3, %v2245_v38  ;;  %v2258_v44 = vpop.f32.mrb[47].mxu0 }
 0x3b2   : > { %v2917_v12 = vrot.slane %v2258_v44, 1 }
 0x3b3   : > { %3340 = vst [vmem:[#allocation3 + $0xb1] sm:$0xff] %v3307_v10  ;;  %v3198_v41 = vadd.f32 %v9355_v28, %v3005_v42  ;;  %3713 = vmatmul.mubr.f32.gmra.mrb[178].mxu0 %v9607_v9 }
 0x3b4   : > { %v2918_v16 = vsel %vm2878_vm2, %v2915_v46, %v2917_v12  ;;  %v2262_v57 = vpop.f32.mrb[48].mxu0  ;;  %3717 = vmatprep.mubr.f32.mxu0 %v10785_v26 }
 0x3b5   : > { %v3237_v19 = vmul.f32 %v9514_v47, %v3198_v41  ;;  %v3006_v56 = vadd.f32 %v2918_v16, %v2251_v20  ;;  %v2264_v60 = vpop.f32.mrb[49].mxu0 }
 0x3b6   : > { %v9621_v55 = vld [vmem:[#allocation3 + $0xa8] sm:$0xff]  ;;  %v2919_v14 = vrot.slane %v2264_v60, 1 }
 0x3b7   : > { %v3276_v21 = vadd.f32 %v9520_v33, %v3237_v19  ;;  %v3199_v1 = vadd.f32 %v9358_v22, %v3006_v56  ;;  %3718 = vmatmul.mubr.f32.gmra.mrb[180].mxu0 %v9621_v55  ;;  %7083 = vmatprep.mubr.f32.mxu1 %v9621_v55 }
 0x3b8   : > { %v2268_v28 = vpop.f32.mrb[50].mxu0  ;;  %3723 = vmatprep.mubr.f32.mxu0 %v10785_v26 }
 0x3b9   : > { %v3308_v63 = vmax.f32 %v3276_v21, 0.0  ;;  %v3238_v11 = vmul.f32 %v9514_v47, %v3199_v1  ;;  %v2270_v18 = vpop.f32.mrb[51].mxu0 }
 0x3ba   : > { %v2920_v37 = vrot.slane %v2270_v18, 1  ;;  %v9629_v49 = vld [vmem:[#allocation3 + $0xb0] sm:$0xff]  ;;  %v9631_v62 = vld [vmem:[#allocation3 + $0xb8] sm:$0xff] }
 0x3bb   : > { %3341 = vst [vmem:[#allocation3 + $0xc1] sm:$0xff] %v3308_v63  ;;  %v3277_v22 = vadd.f32 %v9520_v33, %v3238_v11  ;;  %3724 = vmatmul.mubr.f32.gmra.mrb[182].mxu0 %v9629_v49  ;;  %7084 = vmatmul.mubr.f32.gmra.mrb[66].mxu1 %v9629_v49 }
 0x3bc   : > { %v2921_v38 = vsel %vm2878_vm2, %v2919_v14, %v2920_v37  ;;  %v2274_v17 = vpop.f32.mrb[52].mxu0  ;;  %7086 = vmatprep.mubr.f32.mxu1 %v9631_v62  ;;  %3729 = vmatprep.mubr.f32.mxu0 %v10785_v26 }
 0x3bd   : > { %v3309_v29 = vmax.f32 %v3277_v22, 0.0  ;;  %v3007_v36 = vadd.f32 %v2921_v38, %v2262_v57  ;;  %v2275_v15 = vpop.f32.mrb[53].mxu0 }
 0x3be   : > { %v2922_v30 = vrot.slane %v2275_v15, 1 }
 0x3bf   : > { %3342 = vst [vmem:[#allocation3 + $0xc9] sm:$0xff] %v3309_v29  ;;  %v3200_v20 = vadd.f32 %v9367_v24, %v3007_v36  ;;  %3730 = vmatmul.mubr.f32.gmra.mrb[184].mxu0 %v9631_v62 }
 0x3c0   : > { %v2923_v7 = vsel %vm2878_vm2, %v2920_v37, %v2922_v30  ;;  %v2279_v25 = vpop.f32.mrb[54].mxu0  ;;  %3734 = vmatprep.mubr.f32.mxu0 %v10785_v26 }
 0x3c1   : > { %v3239_v2 = vmul.f32 %v9514_v47, %v3200_v20  ;;  %v3008_v34 = vadd.f32 %v2923_v7, %v2268_v28  ;;  %v2281_v59 = vpop.f32.mrb[55].mxu0 }
 0x3c2   : > { %v9644_v27 = vld [vmem:[#allocation3 + $0xc0] sm:$0xff]  ;;  %v2924_v42 = vrot.slane %v2281_v59, 1 }
 0x3c3   : > { %v3278_v46 = vadd.f32 %v9520_v33, %v3239_v2  ;;  %v3201_v48 = vadd.f32 %v9376_v52, %v3008_v34  ;;  %3735 = vmatmul.mubr.f32.gmra.mrb[186].mxu0 %v9644_v27  ;;  %7087 = vmatmul.mubr.f32.gmra.mrb[68].mxu1 %v9644_v27 }
 0x3c4   : > { %v2285_v24 = vpop.f32.mrb[56].mxu0  ;;  %3740 = vmatprep.mubr.f32.mxu0 %v10785_v26 }
 0x3c5   : > { %v3310_v3 = vmax.f32 %v3278_v46, 0.0  ;;  %v3240_v54 = vmul.f32 %v9514_v47, %v3201_v48  ;;  %v2287_v10 = vpop.f32.mrb[57].mxu0 }
 0x3c6   : > { %v2925_v44 = vrot.slane %v2287_v10, 1  ;;  %v9652_v12 = vld [vmem:[#allocation3 + $0xc8] sm:$0xff]  ;;  %v9654_v41 = vld [vmem:[#allocation3 + $0xd0] sm:$0xff] }
 0x3c7   : > { %3343 = vst [vmem:[#allocation3 + $0xd9] sm:$0xff] %v3310_v3  ;;  %v3279_v52 = vadd.f32 %v9520_v33, %v3240_v54  ;;  %3741 = vmatmul.mubr.f32.gmra.mrb[188].mxu0 %v9652_v12  ;;  %7089 = vmatprep.mubr.f32.mxu1 %v9652_v12 }
 0x3c8   : > { %v2926_v16 = vsel %vm2878_vm2, %v2924_v42, %v2925_v44  ;;  %v2291_v57 = vpop.f32.mrb[58].mxu0  ;;  %7090 = vmatmul.mubr.f32.gmra.mrb[70].mxu1 %v9654_v41  ;;  %3746 = vmatprep.mubr.f32.mxu0 %v10785_v26 }
 0x3c9   : > { %v3311_v19 = vmax.f32 %v3279_v52, 0.0  ;;  %v3009_v56 = vadd.f32 %v2926_v16, %v2279_v25  ;;  %v2292_v60 = vpop.f32.mrb[59].mxu0 }
 0x3ca   : > { %v2927_v21 = vrot.slane %v2292_v60, 1 }
 0x3cb   : > { %3344 = vst [vmem:[#allocation3 + $0xe1] sm:$0xff] %v3311_v19  ;;  %v3202_v1 = vadd.f32 %v9385_v4, %v3009_v56  ;;  %3747 = vmatmul.mubr.f32.gmra.mrb[190].mxu0 %v9654_v41 }
 0x3cc   : > { %v2928_v28 = vsel %vm2878_vm2, %v2925_v44, %v2927_v21  ;;  %v2296_v63 = vpop.f32.mrb[60].mxu0  ;;  %3751 = vmatprep.mubr.f32.mxu0 %v10785_v26 }
 0x3cd   : > { %v3241_v11 = vmul.f32 %v9514_v47, %v3202_v1  ;;  %v3010_v18 = vadd.f32 %v2928_v28, %v2285_v24  ;;  %v2298_v14 = vpop.f32.mrb[61].mxu0 }
 0x3ce   : > { %v9667_v37 = vld [vmem:[#allocation3 + $0xd8] sm:$0xff]  ;;  %v2929_v15 = vrot.slane %v2298_v14, 1 }
 0x3cf   : > { %v3280_v22 = vadd.f32 %v9520_v33, %v3241_v11  ;;  %v3203_v38 = vadd.f32 %v9388_v61, %v3010_v18  ;;  %3752 = vmatmul.mubr.f32.gmra.mrb[192].mxu0 %v9667_v37  ;;  %7092 = vmatprep.mubr.f32.mxu1 %v9667_v37 }
 0x3d0   : > { %v2302_v4 = vpop.f32.mrb[62].mxu0  ;;  %3757 = vmatprep.mubr.f32.mxu0 %v10785_v26 }
 0x3d1   : > { %v3312_v17 = vmax.f32 %v3280_v22, 0.0  ;;  %v3242_v29 = vmul.f32 %v9514_v47, %v3203_v38  ;;  %v2304_v36 = vpop.f32.mrb[63].mxu0 }
 0x3d2   : > { %v2930_v30 = vrot.slane %v2304_v36, 1  ;;  %v9675_v20 = vld [vmem:[#allocation3 + $0xe0] sm:$0xff]  ;;  %v9677_v7 = vld [vmem:[#allocation3 + $0xe8] sm:$0xff] }
 0x3d3   : > { %3345 = vst [vmem:[#allocation3 + $0xf1] sm:$0xff] %v3312_v17  ;;  %v3281_v61 = vadd.f32 %v9520_v33, %v3242_v29  ;;  %3758 = vmatmul.mubr.f32.gmra.mrb[194].mxu0 %v9675_v20  ;;  %7093 = vmatmul.mubr.f32.gmra.mrb[72].mxu1 %v9675_v20 }
 0x3d4   : > { %v2931_v25 = vsel %vm2878_vm2, %v2929_v15, %v2930_v30  ;;  %v2308_v2 = vpop.f32.mrb[64].mxu0  ;;  %7095 = vmatprep.mubr.f32.mxu1 %v9677_v7  ;;  %3763 = vmatprep.mubr.f32.mxu0 %v10785_v26 }
 0x3d5   : > { %v3313_v34 = vmax.f32 %v3281_v61, 0.0  ;;  %v3011_v59 = vadd.f32 %v2931_v25, %v2296_v63  ;;  %v2309_v46 = vpop.f32.mrb[65].mxu0 }
 0x3d6   : > { %v2932_v48 = vrot.slane %v2309_v46, 1 }
 0x3d7   : > { %3346 = vst [vmem:[#allocation3 + $0xf9] sm:$0xff] %v3313_v34  ;;  %v3204_v24 = vadd.f32 %v9397_v43, %v3011_v59  ;;  %3764 = vmatmul.mubr.f32.gmra.mrb[196].mxu0 %v9677_v7 }
 0x3d8   : > { %v2933_v3 = vsel %vm2878_vm2, %v2930_v30, %v2932_v48  ;;  %v2313_v54 = vpop.f32.mrb[66].mxu0  ;;  %3768 = vmatprep.mubr.f32.mxu0 %v10785_v26 }
 0x3d9   : > { %v3243_v10 = vmul.f32 %v9514_v47, %v3204_v24  ;;  %v3012_v42 = vadd.f32 %v2933_v3, %v2302_v4  ;;  %v2315_v44 = vpop.f32.mrb[67].mxu0 }
 0x3da   : > { %v9690_v52 = vld [vmem:[#allocation3 + $0xf0] sm:$0xff]  ;;  %v2934_v21 = vrot.slane %v2315_v44, 1 }
 0x3db   : > { %v3282_v16 = vadd.f32 %v9520_v33, %v3243_v10  ;;  %v3205_v57 = vadd.f32 %v9406_v31, %v3012_v42  ;;  %3769 = vmatmul.mubr.f32.gmra.mrb[198].mxu0 %v9690_v52  ;;  %7096 = vmatmul.mubr.f32.gmra.mrb[74].mxu1 %v9690_v52 }
 0x3dc   : > { %v2319_v43 = vpop.f32.mrb[68].mxu0  ;;  %3774 = vmatprep.mubr.f32.mxu0 %v10785_v26 }
 0x3dd   : > { %v3314_v19 = vmax.f32 %v3282_v16, 0.0  ;;  %v3244_v56 = vmul.f32 %v9514_v47, %v3205_v57  ;;  %v2321_v60 = vpop.f32.mrb[69].mxu0 }
 0x3de   : > { %v2935_v1 = vrot.slane %v2321_v60, 1  ;;  %v9698_v28 = vld [vmem:[#allocation3 + $0xf8] sm:$0xff]  ;;  %v9700_v63 = vld [vmem:[#allocation3 + $0x100] sm:$0xff] }
 0x3df   : > { %3347 = vst [vmem:[#allocation3 + $0x109] sm:$0xff] %v3314_v19  ;;  %v3283_v31 = vadd.f32 %v9520_v33, %v3244_v56  ;;  %3775 = vmatmul.mubr.f32.gmra.mrb[200].mxu0 %v9698_v28  ;;  %7098 = vmatprep.mubr.f32.mxu1 %v9698_v28 }
 0x3e0   : > { %v2936_v11 = vsel %vm2878_vm2, %v2934_v21, %v2935_v1  ;;  %v2325_v18 = vpop.f32.mrb[70].mxu0  ;;  %7099 = vmatmul.mubr.f32.gmra.mrb[76].mxu1 %v9700_v63  ;;  %3780 = vmatprep.mubr.f32.mxu0 %v10785_v26 }
 0x3e1   : > { %v3315_v14 = vmax.f32 %v3283_v31, 0.0  ;;  %v3013_v22 = vadd.f32 %v2936_v11, %v2313_v54  ;;  %v2326_v38 = vpop.f32.mrb[71].mxu0 }
 0x3e2   : > { %v2937_v4 = vrot.slane %v2326_v38, 1 }
 0x3e3   : > { %3348 = vst [vmem:[#allocation3 + $0x111] sm:$0xff] %v3315_v14  ;;  %v3206_v17 = vadd.f32 %v9415_v0, %v3013_v22  ;;  %3781 = vmatmul.mubr.f32.gmra.mrb[202].mxu0 %v9700_v63 }
 0x3e4   : > { %v2938_v29 = vsel %vm2878_vm2, %v2935_v1, %v2937_v4  ;;  %v2330_v36 = vpop.f32.mrb[72].mxu0  ;;  %3785 = vmatprep.mubr.f32.mxu0 %v10785_v26 }
 0x3e5   : > { %v3245_v15 = vmul.f32 %v9514_v47, %v3206_v17  ;;  %v3014_v30 = vadd.f32 %v2938_v29, %v2319_v43  ;;  %v2332_v61 = vpop.f32.mrb[73].mxu0 }
 0x3e6   : > { %v9713_v25 = vld [vmem:[#allocation3 + $0x108] sm:$0xff]  ;;  %v2939_v24 = vrot.slane %v2332_v61, 1 }
 0x3e7   : > { %v3284_v2 = vadd.f32 %v9520_v33, %v3245_v15  ;;  %v3207_v34 = vadd.f32 %v9418_v53, %v3014_v30  ;;  %3786 = vmatmul.mubr.f32.gmra.mrb[204].mxu0 %v9713_v25  ;;  %7101 = vmatprep.mubr.f32.mxu1 %v9713_v25 }
 0x3e8   : > { %v2336_v0 = vpop.f32.mrb[74].mxu0  ;;  %3791 = vmatprep.mubr.f32.mxu0 %v10785_v26 }
 0x3e9   : > { %v3316_v59 = vmax.f32 %v3284_v2, 0.0  ;;  %v3246_v46 = vmul.f32 %v9514_v47, %v3207_v34  ;;  %v2338_v48 = vpop.f32.mrb[75].mxu0 }
 0x3ea   : > { %v2940_v3 = vrot.slane %v2338_v48, 1  ;;  %v9721_v54 = vld [vmem:[#allocation3 + $0x110] sm:$0xff]  ;;  %v9723_v10 = vld [vmem:[#allocation3 + $0x118] sm:$0xff] }
 0x3eb   : > { %3349 = vst [vmem:[#allocation3 + $0x121] sm:$0xff] %v3316_v59  ;;  %v3285_v53 = vadd.f32 %v9520_v33, %v3246_v46  ;;  %3792 = vmatmul.mubr.f32.gmra.mrb[206].mxu0 %v9721_v54  ;;  %7102 = vmatmul.mubr.f32.gmra.mrb[78].mxu1 %v9721_v54 }
 0x3ec   : > { %v2941_v42 = vsel %vm2878_vm2, %v2939_v24, %v2940_v3  ;;  %v2342_v44 = vpop.f32.mrb[76].mxu0  ;;  %7104 = vmatprep.mubr.f32.mxu1 %v9723_v10  ;;  %3797 = vmatprep.mubr.f32.mxu0 %v10785_v26  ;;  %v9761_v24 = vld [vmem:[%s10758_s2] ss:$0 sm:$0xff] }
 0x3ed   : > { %v3317_v16 = vmax.f32 %v3285_v53, 0.0  ;;  %v3015_v57 = vadd.f32 %v2941_v42, %v2330_v36  ;;  %v2343_v43 = vpop.f32.mrb[77].mxu0 }
 0x3ee   : > { %v2942_v19 = vrot.slane %v2343_v43, 1 }
 0x3ef   : > { %3350 = vst [vmem:[#allocation3 + $0x129] sm:$0xff] %v3317_v16  ;;  %v3208_v56 = vadd.f32 %v9424_v50, %v3015_v57  ;;  %3798 = vmatmul.mubr.f32.gmra.mrb[208].mxu0 %v9723_v10 }
 0x3f0   : > { %v2943_v60 = vsel %vm2878_vm2, %v2940_v3, %v2942_v19  ;;  %v2347_v21 = vpop.f32.mrb[78].mxu0  ;;  %3802 = vmatprep.mubr.f32.mxu0 %v10785_v26 }
 0x3f1   : > { %v3247_v1 = vmul.f32 %v9514_v47, %v3208_v56  ;;  %v3016_v31 = vadd.f32 %v2943_v60, %v2336_v0  ;;  %v2349_v11 = vpop.f32.mrb[79].mxu0 }
 0x3f2   : > { %v9736_v18 = vld [vmem:[#allocation3 + $0x120] sm:$0xff]  ;;  %v2944_v29 = vrot.slane %v2349_v11, 1 }
 0x3f3   : > { %v3286_v14 = vadd.f32 %v9520_v33, %v3247_v1  ;;  %v3209_v22 = vadd.f32 %v9430_v51, %v3016_v31  ;;  %3803 = vmatmul.mubr.f32.gmra.mrb[210].mxu0 %v9736_v18  ;;  %7105 = vmatmul.mubr.f32.gmra.mrb[80].mxu1 %v9736_v18 }
 0x3f4   : > { %v2353_v50 = vpop.f32.mrb[80].mxu0  ;;  %3808 = vmatprep.mubr.f32.mxu0 %v10785_v26 }
 0x3f5   : > { %v3318_v38 = vmax.f32 %v3286_v14, 0.0  ;;  %v3248_v4 = vmul.f32 %v9514_v47, %v3209_v22  ;;  %v2355_v17 = vpop.f32.mrb[81].mxu0 }
 0x3f6   : > { %v2945_v36 = vrot.slane %v2355_v17, 1  ;;  %v9744_v15 = vld [vmem:[#allocation3 + $0x128] sm:$0xff]  ;;  %v9746_v30 = vld [vmem:[#allocation3 + $0x130] sm:$0xff] }
 0x3f7   : > { %3351 = vst [vmem:[#allocation3 + $0x139] sm:$0xff] %v3318_v38  ;;  %v3287_v51 = vadd.f32 %v9520_v33, %v3248_v4  ;;  %3809 = vmatmul.mubr.f32.gmra.mrb[212].mxu0 %v9744_v15  ;;  %7107 = vmatprep.mubr.f32.mxu1 %v9744_v15 }
 0x3f8   : > { %v2946_v61 = vsel %vm2878_vm2, %v2944_v29, %v2945_v36  ;;  %v2359_v2 = vpop.f32.mrb[82].mxu0  ;;  %7108 = vmatmul.mubr.f32.gmra.mrb[82].mxu1 %v9746_v30  ;;  %3814 = vmatprep.mubr.f32.mxu0 %v10785_v26 }
 0x3f9   : > { %v3319_v47 = vmax.f32 %v3287_v51, 0.0  ;;  %v3017_v34 = vadd.f32 %v2946_v61, %v2347_v21  ;;  %v2360_v0 = vpop.f32.mrb[83].mxu0 }
 0x3fa   : > { %v2947_v59 = vrot.slane %v2360_v0, 1 }
 0x3fb   : > { %3352 = vst [vmem:[#allocation3 + $0x141] sm:$0xff] %v3319_v47  ;;  %v3210_v46 = vadd.f32 %v9436_v8, %v3017_v34  ;;  %3815 = vmatmul.mubr.f32.gmra.mrb[214].mxu0 %v9746_v30  ;;  %v9769_v8 = vld [vmem:[%s10759_s3] ss:$0 sm:$0xff] }
 0x3fc   : > { %v2948_v33 = vsel %vm2878_vm2, %v2945_v36, %v2947_v59  ;;  %v2364_v48 = vpop.f32.mrb[84].mxu0  ;;  %3819 = vmatprep.mubr.f32.mxu0 %v10785_v26 }
 0x3fd   : > { %v3249_v3 = vmul.f32 %v9761_v24, %v3210_v46  ;;  %v3018_v53 = vadd.f32 %v2948_v33, %v2353_v50  ;;  %v2366_v42 = vpop.f32.mrb[85].mxu0 }
 0x3fe   : > { %v9764_v44 = vld [vmem:[#allocation3 + $0x138] sm:$0xff]  ;;  %v2949_v21 = vrot.slane %v2366_v42, 1 }
 0x3ff   : > { %v3288_v16 = vadd.f32 %v9769_v8, %v3249_v3  ;;  %v3211_v57 = vadd.f32 %v9439_v32, %v3018_v53  ;;  %3820 = vmatmul.mubr.f32.gmra.mrb[216].mxu0 %v9764_v44  ;;  %7110 = vmatprep.mubr.f32.mxu1 %v9764_v44 }
 0x400   : > { %v2370_v43 = vpop.f32.mrb[86].mxu0  ;;  %3825 = vmatprep.mubr.f32.mxu0 %v10785_v26 }
 0x401   : > { %v3320_v19 = vmax.f32 %v3288_v16, 0.0  ;;  %v3250_v56 = vmul.f32 %v9761_v24, %v3211_v57  ;;  %v2372_v60 = vpop.f32.mrb[87].mxu0 }
 0x402   : > { %v2950_v1 = vrot.slane %v2372_v60, 1  ;;  %v9777_v31 = vld [vmem:[#allocation3 + $0x140] sm:$0xff]  ;;  %v9779_v11 = vld [vmem:[#allocation3 + $0x148] sm:$0xff] }
 0x403   : > { %3353 = vst [vmem:[#allocation3 + $0x151] sm:$0xff] %v3320_v19  ;;  %v3289_v32 = vadd.f32 %v9769_v8, %v3250_v56  ;;  %3826 = vmatmul.mubr.f32.gmra.mrb[218].mxu0 %v9777_v31  ;;  %7111 = vmatmul.mubr.f32.gmra.mrb[84].mxu1 %v9777_v31 }
 0x404   : > { %v2951_v14 = vsel %vm2878_vm2, %v2949_v21, %v2950_v1  ;;  %v2376_v22 = vpop.f32.mrb[88].mxu0  ;;  %7113 = vmatprep.mubr.f32.mxu1 %v9779_v11  ;;  %3831 = vmatprep.mubr.f32.mxu0 %v10785_v26 }
 0x405   : > { %v3321_v50 = vmax.f32 %v3289_v32, 0.0  ;;  %v3019_v38 = vadd.f32 %v2951_v14, %v2364_v48  ;;  %v2377_v4 = vpop.f32.mrb[89].mxu0 }
 0x406   : > { %v2952_v17 = vrot.slane %v2377_v4, 1 }
 0x407   : > { %3354 = vst [vmem:[#allocation3 + $0x159] sm:$0xff] %v3321_v50  ;;  %v3212_v29 = vadd.f32 %v9445_v6, %v3019_v38  ;;  %3832 = vmatmul.mubr.f32.gmra.mrb[220].mxu0 %v9779_v11 }
 0x408   : > { %v2953_v36 = vsel %vm2878_vm2, %v2950_v1, %v2952_v17  ;;  %v2381_v51 = vpop.f32.mrb[90].mxu0  ;;  %3836 = vmatprep.mubr.f32.mxu0 %v10785_v26 }
 0x409   : > { %v3251_v61 = vmul.f32 %v9761_v24, %v3212_v29  ;;  %v3020_v2 = vadd.f32 %v2953_v36, %v2370_v43  ;;  %v2383_v47 = vpop.f32.mrb[91].mxu0 }
 0x40a   : > { %v9792_v34 = vld [vmem:[#allocation3 + $0x150] sm:$0xff]  ;;  %v2954_v3 = vrot.slane %v2383_v47, 1  ;;  %v3418_v47 = vld [vmem:[#allocation6 + $0x58] sm:$0xff] }
 0x40b   : > { %v3290_v0 = vadd.f32 %v9769_v8, %v3251_v61  ;;  %v3213_v59 = vadd.f32 %v9451_v58, %v3020_v2  ;;  %3837 = vmatmul.mubr.f32.gmra.mrb[222].mxu0 %v9792_v34  ;;  %7114 = vmatmul.mubr.f32.gmra.mrb[86].mxu1 %v9792_v34  ;;  %v3415_v2 = vld [vmem:[#allocation6 + $0x40] sm:$0xff] }
 0x40c   : > { %v2387_v6 = vpop.f32.mrb[92].mxu0  ;;  %3842 = vmatprep.mubr.f32.mxu0 %v10785_v26 }
 0x40d   : > { %v3322_v46 = vmax.f32 %v3290_v0, 0.0  ;;  %v3252_v33 = vmul.f32 %v9761_v24, %v3213_v59  ;;  %v2389_v48 = vpop.f32.mrb[93].mxu0  ;;  %v9837_v0 = vld [vmem:[#allocation3] sm:$0xff]  ;;  %v7628_v59 = vpack.c.bf16 %v3418_v47, %v3415_v2 }
 0x40e   : > { %v2955_v53 = vrot.slane %v2389_v48, 1  ;;  %v9800_v42 = vld [vmem:[#allocation3 + $0x158] sm:$0xff]  ;;  %v9802_v16 = vld [vmem:[#allocation3 + $0x160] sm:$0xff] }
 0x40f   : > { %3355 = vst [vmem:[#allocation3 + $0x169] sm:$0xff] %v3322_v46  ;;  %v3291_v58 = vadd.f32 %v9769_v8, %v3252_v33  ;;  %3843 = vmatmul.mubr.f32.gmra.mrb[224].mxu0 %v9800_v42  ;;  %7116 = vmatprep.mubr.f32.mxu1 %v9800_v42  ;;  %v3424_v46 = vld [vmem:[#allocation6 + $0x88] sm:$0xff]  ;;  %v9842_v33 = vld [vmem:[#allocation3 + $0x8] sm:$0xff]  ;;  %v9880_v47 = vld [vmem:[#allocation3 + $0x40] sm:$0xff] }
 0x410   : > { %v2956_v57 = vsel %vm2878_vm2, %v2954_v3, %v2955_v53  ;;  %v2393_v43 = vpop.f32.mrb[94].mxu0  ;;  %7117 = vmatmul.mubr.f32.gmra.mrb[88].mxu1 %v9802_v16  ;;  %3848 = vmatprep.mubr.f32.mxu0 %v10785_v26  ;;  %v3427_v3 = vld [vmem:[#allocation6 + $0xa0] sm:$0xff] }
 0x411   : > { %v3323_v19 = vmax.f32 %v3291_v58, 0.0  ;;  %v3021_v56 = vadd.f32 %v2956_v57, %v2381_v51  ;;  %v2394_v60 = vpop.f32.mrb[95].mxu0  ;;  %v9846_v58 = vld [vmem:[#allocation3 + $0x10] sm:$0xff]  ;;  %v3433_v43 = vld [vmem:[#allocation6 + $0xd0] sm:$0xff] }
 0x412   : > { %v2957_v21 = vrot.slane %v2394_v60, 1  ;;  %v3439_v60 = vld [vmem:[#allocation6 + $0x100] sm:$0xff] }
 0x413   : > { %3356 = vst [vmem:[#allocation3 + $0x171] sm:$0xff] %v3323_v19  ;;  %v3214_v1 = vadd.f32 %v9456_v39, %v3021_v56  ;;  %3849 = vmatmul.mubr.f32.gmra.mrb[226].mxu0 %v9802_v16  ;;  %v3436_v19 = vld [vmem:[#allocation6 + $0xe8] sm:$0xff] }
 0x414   : > { %v2958_v32 = vsel %vm2878_vm2, %v2955_v53, %v2957_v21  ;;  %3853 = vmatprep.mubr.f32.mxu0 %v10785_v26  ;;  %v3430_v53 = vld [vmem:[#allocation6 + $0xb8] sm:$0xff]  ;;  %v9850_v56 = vld [vmem:[#allocation3 + $0x18] sm:$0xff] }
 0x415   : > { %v3253_v14 = vmul.f32 %v9761_v24, %v3214_v1  ;;  %v3022_v22 = vadd.f32 %v2958_v32, %v2387_v6  ;;  %v3421_v6 = vld [vmem:[#allocation6 + $0x70] sm:$0xff]  ;;  %v7636_v57 = vpack.c.bf16 %v3430_v53, %v3427_v3  ;;  %v3442_v21 = vld [vmem:[#allocation6 + $0x118] sm:$0xff]  ;;  %v9896_v53 = vld [vmem:[#allocation3 + $0x50] sm:$0xff] }
 0x416   : > { %v9815_v50 = vld [vmem:[#allocation3 + $0x168] sm:$0xff]  ;;  %v7632_v48 = vpack.c.bf16 %v3424_v46, %v3421_v6  ;;  %v7644_v1 = vpack.c.bf16 %v3442_v21, %v3439_v60  ;;  %v9854_v32 = vld [vmem:[#allocation3 + $0x20] sm:$0xff]  ;;  %v9902_v21 = vld [vmem:[#allocation3 + $0x58] sm:$0xff] }
 0x417   : > { %v3292_v38 = vadd.f32 %v9769_v8, %v3253_v14  ;;  %v3215_v4 = vadd.f32 %v9459_v5, %v3022_v22  ;;  %3854 = vmatmul.mubr.f32.gmra.mrb[228].mxu0 %v9815_v50  ;;  %7119 = vmatprep.mubr.f32.mxu1 %v9815_v50  ;;  %v3445_v14 = vld [vmem:[#allocation6 + $0x130] sm:$0xff]  ;;  %v3448_v22 = vld [vmem:[#allocation6 + $0x148] sm:$0xff]  ;;  %v9888_v46 = vld [vmem:[#allocation3 + $0x48] sm:$0xff] }
 0x418   : > { %3859 = vmatprep.mubr.f32.mxu0 %v10785_v26 }
 0x419   : > { %v3324_v39 = vmax.f32 %v3292_v38, 0.0  ;;  %v3254_v17 = vmul.f32 %v9761_v24, %v3215_v4  ;;  %v7648_v38 = vpack.c.bf16 %v3448_v22, %v3445_v14  ;;  %v9858_v4 = vld [vmem:[#allocation3 + $0x28] sm:$0xff]  ;;  %v9910_v22 = vld [vmem:[#allocation3 + $0x60] sm:$0xff] }
 0x41a   : > { %v9823_v29 = vld [vmem:[#allocation3 + $0x170] sm:$0xff]  ;;  %v9825_v36 = vld [vmem:[#allocation3 + $0x178] sm:$0xff] }
 0x41b   : > { %3357 = vst [vmem:[#allocation3 + $0x181] sm:$0xff] %v3324_v39  ;;  %v3293_v51 = vadd.f32 %v9769_v8, %v3254_v17  ;;  %3860 = vmatmul.mubr.f32.gmra.mrb[230].mxu0 %v9823_v29  ;;  %7120 = vmatmul.mubr.f32.gmra.mrb[90].mxu1 %v9823_v29 }
 0x41c   : > { %7122 = vmatprep.mubr.f32.mxu1 %v9825_v36  ;;  %3865 = vmatprep.mubr.f32.mxu0 %v10785_v26 }
 0x41d   : > { %v3325_v5 = vmax.f32 %v3293_v51, 0.0  ;;  %v9866_v51 = vld [vmem:[#allocation3 + $0x30] sm:$0xff] }
 0x41f   : > { %3358 = vst [vmem:[#allocation3 + $0x189] sm:$0xff] %v3325_v5  ;;  %3866 = vmatmul.mubr.f32.gmra.mrb[232].mxu0 %v9825_v36 }
 0x420   : > { %3870 = vmatprep.mubr.f32.mxu0 %v10785_v26 }
 0x422   : > { %v3500_v24 = vld [vmem:[#allocation3 + $0x180] sm:$0xff] }
 0x423   : > { %3871 = vmatmul.mubr.f32.gmra.mrb[234].mxu0 %v3500_v24  ;;  %7123 = vmatmul.mubr.f32.gmra.mrb[92].mxu1 %v3500_v24 }
 0x424   : > { %3876 = vmatprep.mubr.f32.mxu0 %v10785_v26 }
 0x426   : > { %v3501_v8 = vld [vmem:[#allocation3 + $0x188] sm:$0xff]  ;;  %v3502_v61 = vld [vmem:[#allocation3 + $0x190] sm:$0xff] }
 0x427   : > { %3877 = vmatmul.mubr.f32.gmra.mrb[236].mxu0 %v3501_v8  ;;  %7125 = vmatprep.mubr.f32.mxu1 %v3501_v8  ;;  %v9874_v8 = vld [vmem:[#allocation3 + $0x38] sm:$0xff] }
 0x428   : > { %7126 = vmatmul.mubr.f32.gmra.mrb[94].mxu1 %v3502_v61  ;;  %3882 = vmatprep.mubr.f32.mxu0 %v10785_v26 }
 0x429   : > { %4257 = vmatprep.mubr.f32.mxu1 %v10785_v26 }
 0x42b   : > { %3883 = vmatmul.mubr.f32.gmra.mrb[238].mxu0 %v3502_v61 }
 0x42c   : > { %4258 = vmatmul.mubr.f32.vlgmr.msra.gmra.mrb[96].mxu1 %v9837_v0 }
 0x42d   : > { %7627 = vmatpush3.bf16.msra.mxu1 %v9603_v40  ;;  %4263 = vmatprep.mubr.f32.mxu1 %v10785_v26  ;;  %v7640_v40 = vpack.c.bf16 %v3436_v19, %v3433_v43  ;;  %v3454_v43 = vld [vmem:[#allocation6 + $0x178] sm:$0xff] }
 0x42e   : > { %7629 = vmatprep.subr.bf16.mxu1 %v7628_v59 }
 0x430   : > { %4264 = vmatmul.mubr.f32.gmra.mrb[98].mxu1 %v9842_v33 }
 0x431   : > { %4269 = vmatprep.mubr.f32.mxu1 %v10785_v26  ;;  %7631 = vmatpush3.bf16.msra.mxu1 %v7628_v59 }
 0x432   : > { %7633 = vmatprep.subr.bf16.mxu1 %v7632_v48 }
 0x434   : > { %4270 = vmatmul.mubr.f32.gmra.mrb[100].mxu1 %v9846_v58 }
 0x435   : > { %4274 = vmatprep.mubr.f32.mxu1 %v10785_v26  ;;  %7635 = vmatpush3.bf16.msra.mxu1 %v7632_v48 }
 0x436   : > { %7637 = vmatprep.subr.bf16.mxu1 %v7636_v57 }
 0x438   : > { %4275 = vmatmul.mubr.f32.gmra.mrb[102].mxu1 %v9850_v56 }
 0x439   : > { %4280 = vmatprep.mubr.f32.mxu1 %v10785_v26  ;;  %7639 = vmatpush3.bf16.msra.mxu1 %v7636_v57  ;;  %v3451_v57 = vld [vmem:[#allocation6 + $0x160] sm:$0xff] }
 0x43a   : > { %7641 = vmatprep.subr.bf16.mxu1 %v7640_v40  ;;  %v7652_v19 = vpack.c.bf16 %v3454_v43, %v3451_v57  ;;  %v9918_v57 = vld [vmem:[#allocation3 + $0x68] sm:$0xff] }
 0x43c   : > { %4281 = vmatmul.mubr.f32.gmra.mrb[104].mxu1 %v9854_v32 }
 0x43d   : > { %4286 = vmatprep.mubr.f32.mxu1 %v10785_v26  ;;  %7643 = vmatpush3.bf16.msra.mxu1 %v7640_v40 }
 0x43e   : > { %7645 = vmatprep.subr.bf16.mxu1 %v7644_v1 }
 0x440   : > { %4287 = vmatmul.mubr.f32.gmra.mrb[106].mxu1 %v9858_v4 }
 0x441   : > { %4291 = vmatprep.mubr.f32.mxu1 %v10785_v26  ;;  %7647 = vmatpush3.bf16.msra.mxu1 %v7644_v1 }
 0x442   : > { %v9862_v39 = vpop.f32.mrb[144].mxu0  ;;  %7649 = vmatprep.subr.bf16.mxu1 %v7648_v38 }
 0x443   : > { %v9864_v17 = vpop.f32.mrb[145].mxu0 }
 0x444   : > { %4292 = vmatmul.mubr.f32.gmra.mrb[108].mxu1 %v9866_v51 }
 0x445   : > { %4297 = vmatprep.mubr.f32.mxu1 %v10785_v26  ;;  %7651 = vmatpush3.bf16.msra.mxu1 %v7648_v38 }
 0x446   : > { %v9870_v5 = vpop.f32.mrb[146].mxu0  ;;  %7653 = vmatprep.subr.bf16.mxu1 %v7652_v19 }
 0x447   : > { %v9872_v24 = vpop.f32.mrb[147].mxu0 }
 0x448   : > { %4298 = vmatmul.mubr.f32.gmra.mrb[110].mxu1 %v9874_v8 }
 0x449   : > { %4303 = vmatprep.mubr.f32.mxu1 %v10785_v26  ;;  %7655 = vmatpush3.bf16.msra.mxu1 %v7652_v19 }
 0x44a   : > { %v3629_v61 = vpop.f32.mrb[148].mxu0 }
 0x44b   : > { %v9878_v2 = vpop.f32.mrb[149].mxu0 }
 0x44c   : > { %4304 = vmatmul.mubr.f32.gmra.mrb[112].mxu1 %v9880_v47 }
 0x44d   : > { %4308 = vmatprep.mubr.f32.mxu1 %v10785_v26 }
 0x44e   : > { %v9884_v59 = vpop.f32.mrb[150].mxu0 }
 0x44f   : > { %v9886_v6 = vpop.f32.mrb[151].mxu0 }
 0x450   : > { %4309 = vmatmul.mubr.f32.gmra.mrb[114].mxu1 %v9888_v46 }
 0x451   : > { %4314 = vmatprep.mubr.f32.mxu1 %v10785_v26 }
 0x452   : > { %v9892_v48 = vpop.f32.mrb[152].mxu0 }
 0x453   : > { %10796 = vst [vmem:[#allocation13_spill] sm:$0xff] %v9892_v48  ;;  %v9894_v3 = vpop.f32.mrb[153].mxu0 }
 0x454   : > { %10797 = vst [vmem:[#allocation10_spill] sm:$0xff] %v9894_v3  ;;  %4315 = vmatmul.mubr.f32.gmra.mrb[116].mxu1 %v9896_v53 }
 0x455   : > { %4320 = vmatprep.mubr.f32.mxu1 %v10785_v26 }
 0x456   : > { %v3646_v40 = vpop.f32.mrb[154].mxu0 }
 0x457   : > { %v9900_v60 = vpop.f32.mrb[155].mxu0  ;;  %v9924_v40 = vld [vmem:[#allocation3 + $0x70] sm:$0xff] }
 0x458   : > { %10798 = vst [vmem:[#allocation11_spill] sm:$0xff] %v9900_v60  ;;  %4321 = vmatmul.mubr.f32.gmra.mrb[118].mxu1 %v9902_v21  ;;  %v4888_v60 = vld [vmem:[#allocation6 + $0x320] sm:$0xff] }
 0x459   : > { %4325 = vmatprep.mubr.f32.mxu1 %v10785_v26 }
 0x45a   : > { %v9906_v1 = vpop.f32.mrb[156].mxu0 }
 0x45b   : > { %10799 = vst [vmem:[#allocation12_spill] sm:$0xff] %v9906_v1  ;;  %v9908_v14 = vpop.f32.mrb[157].mxu0 }
 0x45c   : > { %10800 = vst [vmem:[#allocation14_spill] sm:$0xff] %v9908_v14  ;;  %4326 = vmatmul.mubr.f32.gmra.mrb[120].mxu1 %v9910_v22 }
 0x45d   : > { %4331 = vmatprep.mubr.f32.mxu1 %v10785_v26 }
 0x45e   : > { %v9914_v38 = vpop.f32.mrb[158].mxu0 }
 0x45f   : > { %10801 = vst [vmem:[#allocation15_spill] sm:$0xff] %v9914_v38  ;;  %v9916_v61 = vpop.f32.mrb[159].mxu0 }
 0x460   : > { %10802 = vst [vmem:[#allocation16_spill] sm:$0xff] %v9916_v61  ;;  %4332 = vmatmul.mubr.f32.gmra.mrb[122].mxu1 %v9918_v57  ;;  %v9932_v61 = vld [vmem:[#allocation3 + $0x78] sm:$0xff] }
 0x461   : > { %4337 = vmatprep.mubr.f32.mxu1 %v10785_v26 }
 0x462   : > { %v3663_v43 = vpop.f32.mrb[160].mxu0 }
 0x463   : > { %v9922_v19 = vpop.f32.mrb[161].mxu0 }
 0x464   : > { %10803 = vst [vmem:[#allocation17_spill] sm:$0xff] %v9922_v19  ;;  %4338 = vmatmul.mubr.f32.gmra.mrb[124].mxu1 %v9924_v40  ;;  %v4885_v19 = vld [vmem:[#allocation6 + $0x308] sm:$0xff] }
 0x465   : > { %4342 = vmatprep.mubr.f32.mxu1 %v10785_v26  ;;  %v7656_v3 = vpack.c.bf16 %v4888_v60, %v4885_v19 }
 0x466   : > { %v9928_v14 = vpop.f32.mrb[162].mxu0 }
 0x467   : > { %10804 = vst [vmem:[#allocation18_spill] sm:$0xff] %v9928_v14  ;;  %v9930_v38 = vpop.f32.mrb[163].mxu0  ;;  %7657 = vmatprep.subr.bf16.mxu1 %v7656_v3 }
 0x468   : > { %10805 = vst [vmem:[#allocation19_spill] sm:$0xff] %v9930_v38  ;;  %4343 = vmatmul.mubr.f32.gmra.mrb[126].mxu1 %v9932_v61 }
 0x469   : > { %4348 = vmatprep.mubr.f32.mxu1 %v10785_v26 }
 0x46a   : > { %v9936_v1 = vpop.f32.mrb[164].mxu0 }
 0x46b   : > { %10806 = vst [vmem:[#allocation20_spill] sm:$0xff] %v9936_v1  ;;  %v9938_v43 = vpop.f32.mrb[165].mxu0 }
 0x46c   : > { %10807 = vst [vmem:[#allocation21_spill] sm:$0xff] %v9938_v43  ;;  %4349 = vmatmul.mubr.f32.gmra.mrb[128].mxu1 %v9580_v45 }
 0x46d   : > { %4354 = vmatprep.mubr.f32.mxu1 %v10785_v26 }
 0x46e   : > { %v3680_v14 = vpop.f32.mrb[166].mxu0 }
 0x46f   : > { %v9942_v48 = vpop.f32.mrb[167].mxu0 }
 0x470   : > { %4355 = vmatmul.mubr.f32.gmra.mrb[130].mxu1 %v9582_v35 }
 0x471   : > { %4359 = vmatprep.mubr.f32.mxu1 %v10785_v26 }
 0x472   : > { %v9946_v38 = vpop.f32.mrb[168].mxu0 }
 0x473   : > { %v9948_v1 = vpop.f32.mrb[169].mxu0 }
 0x474   : > { %4360 = vmatmul.mubr.f32.gmra.mrb[132].mxu1 %v9595_v13 }
 0x475   : > { %4365 = vmatprep.mubr.f32.mxu1 %v10785_v26 }
 0x476   : > { %v9952_v45 = vpop.f32.mrb[170].mxu0 }
 0x477   : > { %v9954_v43 = vpop.f32.mrb[171].mxu0 }
 0x478   : > { %4366 = vmatmul.mubr.f32.gmra.mrb[134].mxu1 %v9605_v23 }
 0x479   : > { %4371 = vmatprep.mubr.f32.mxu1 %v10785_v26 }
 0x47a   : > { %v3697_v3 = vpop.f32.mrb[172].mxu0 }
 0x47b   : > { %v9958_v35 = vpop.f32.mrb[173].mxu0 }
 0x47c   : > { %4372 = vmatmul.mubr.f32.gmra.mrb[136].mxu1 %v9607_v9 }
 0x47d   : > { %4376 = vmatprep.mubr.f32.mxu1 %v10785_v26 }
 0x47e   : > { %v9962_v60 = vpop.f32.mrb[174].mxu0 }
 0x47f   : > { %v9964_v13 = vpop.f32.mrb[175].mxu0 }
 0x480   : > { %4377 = vmatmul.mubr.f32.gmra.mrb[138].mxu1 %v9621_v55 }
 0x481   : > { %4382 = vmatprep.mubr.f32.mxu1 %v10785_v26 }
 0x482   : > { %v9968_v14 = vpop.f32.mrb[176].mxu0 }
 0x483   : > { %v9970_v23 = vpop.f32.mrb[177].mxu0 }
 0x484   : > { %10808 = vst [vmem:[#allocation22_spill] sm:$0xff] %v9970_v23  ;;  %4383 = vmatmul.mubr.f32.gmra.mrb[140].mxu1 %v9629_v49 }
 0x485   : > { %4388 = vmatprep.mubr.f32.mxu1 %v10785_v26 }
 0x486   : > { %v3714_v19 = vpop.f32.mrb[178].mxu0 }
 0x487   : > { %v9974_v9 = vpop.f32.mrb[179].mxu0 }
 0x488   : > { %10809 = vst [vmem:[#allocation23_spill] sm:$0xff] %v9974_v9  ;;  %4389 = vmatmul.mubr.f32.gmra.mrb[142].mxu1 %v9631_v62  ;;  %v10320_v9 = vld [vmem:[#allocation3 + $0x1a0] sm:$0xff] }
 0x489   : > { %4393 = vmatprep.mubr.f32.mxu1 %v10785_v26 }
 0x48a   : > { %v9978_v3 = vpop.f32.mrb[180].mxu0 }
 0x48b   : > { %10810 = vst [vmem:[#allocation24_spill] sm:$0xff] %v9978_v3  ;;  %v9980_v55 = vpop.f32.mrb[181].mxu0  ;;  %v10316_v3 = vld [vmem:[#allocation3 + $0x198] sm:$0xff] }
 0x48c   : > { %10811 = vst [vmem:[#allocation25_spill] sm:$0xff] %v9980_v55  ;;  %4394 = vmatmul.mubr.f32.gmra.mrb[144].mxu1 %v9644_v27 }
 0x48d   : > { %4399 = vmatprep.mubr.f32.mxu1 %v10785_v26 }
 0x48e   : > { %v9984_v23 = vpop.f32.mrb[182].mxu0 }
 0x48f   : > { %10812 = vst [vmem:[#allocation26_spill] sm:$0xff] %v9984_v23  ;;  %v9986_v49 = vpop.f32.mrb[183].mxu0  ;;  %v10312_v23 = vld [vmem:[#allocation3 + $0x190] sm:$0xff] }
 0x490   : > { %10813 = vst [vmem:[#allocation27_spill] sm:$0xff] %v9986_v49  ;;  %4400 = vmatmul.mubr.f32.gmra.mrb[146].mxu1 %v9652_v12 }
 0x491   : > { %4405 = vmatprep.mubr.f32.mxu1 %v10785_v26 }
 0x492   : > { %v3731_v19 = vpop.f32.mrb[184].mxu0 }
 0x493   : > { %v9990_v62 = vpop.f32.mrb[185].mxu0 }
 0x494   : > { %10814 = vst [vmem:[#allocation28_spill] sm:$0xff] %v9990_v62  ;;  %4406 = vmatmul.mubr.f32.gmra.mrb[148].mxu1 %v9654_v41 }
 0x495   : > { %4410 = vmatprep.mubr.f32.mxu1 %v10785_v26 }
 0x496   : > { %v9994_v55 = vpop.f32.mrb[186].mxu0 }
 0x497   : > { %10815 = vst [vmem:[#allocation29_spill] sm:$0xff] %v9994_v55  ;;  %v9996_v27 = vpop.f32.mrb[187].mxu0  ;;  %v4897_v55 = vld [vmem:[#allocation6 + $0x368] sm:$0xff] }
 0x498   : > { %10816 = vst [vmem:[#allocation30_spill] sm:$0xff] %v9996_v27  ;;  %4411 = vmatmul.mubr.f32.gmra.mrb[150].mxu1 %v9667_v37 }
 0x499   : > { %4416 = vmatprep.mubr.f32.mxu1 %v10785_v26 }
 0x49a   : > { %v10000_v49 = vpop.f32.mrb[188].mxu0 }
 0x49b   : > { %10817 = vst [vmem:[#allocation31_spill] sm:$0xff] %v10000_v49  ;;  %v10002_v12 = vpop.f32.mrb[189].mxu0 }
 0x49c   : > { %10818 = vst [vmem:[#allocation32_spill] sm:$0xff] %v10002_v12  ;;  %4417 = vmatmul.mubr.f32.gmra.mrb[152].mxu1 %v9675_v20 }
 0x49d   : > { %4422 = vmatprep.mubr.f32.mxu1 %v10785_v26 }
 0x49e   : > { %v3748_v19 = vpop.f32.mrb[190].mxu0 }
 0x49f   : > { %v10006_v41 = vpop.f32.mrb[191].mxu0 }
 0x4a0   : > { %10819 = vst [vmem:[#allocation33_spill] sm:$0xff] %v10006_v41  ;;  %4423 = vmatmul.mubr.f32.gmra.mrb[154].mxu1 %v9677_v7  ;;  %v4893_v41 = vld [vmem:[#allocation6 + $0x348] sm:$0xff] }
 0x4a1   : > { %4427 = vmatprep.mubr.f32.mxu1 %v10785_v26 }
 0x4a2   : > { %v10010_v27 = vpop.f32.mrb[192].mxu0 }
 0x4a3   : > { %10820 = vst [vmem:[#allocation34_spill] sm:$0xff] %v10010_v27  ;;  %v10012_v37 = vpop.f32.mrb[193].mxu0 }
 0x4a4   : > { %10821 = vst [vmem:[#allocation35_spill] sm:$0xff] %v10012_v37  ;;  %4428 = vmatmul.mubr.f32.gmra.mrb[156].mxu1 %v9690_v52 }
 0x4a5   : > { %4433 = vmatprep.mubr.f32.mxu1 %v10785_v26 }
 0x4a6   : > { %v10016_v12 = vpop.f32.mrb[194].mxu0 }
 0x4a7   : > { %10822 = vst [vmem:[#allocation36_spill] sm:$0xff] %v10016_v12  ;;  %v10018_v20 = vpop.f32.mrb[195].mxu0  ;;  %v4894_v12 = vld [vmem:[#allocation6 + $0x350] sm:$0xff] }
 0x4a8   : > { %10823 = vst [vmem:[#allocation37_spill] sm:$0xff] %v10018_v20  ;;  %4434 = vmatmul.mubr.f32.gmra.mrb[158].mxu1 %v9698_v28 }
 0x4a9   : > { %4439 = vmatprep.mubr.f32.mxu1 %v10785_v26 }
 0x4aa   : > { %v3765_v19 = vpop.f32.mrb[196].mxu0 }
 0x4ab   : > { %v10022_v7 = vpop.f32.mrb[197].mxu0 }
 0x4ac   : > { %10824 = vst [vmem:[#allocation38_spill] sm:$0xff] %v10022_v7  ;;  %4440 = vmatmul.mubr.f32.gmra.mrb[160].mxu1 %v9700_v63 }
 0x4ad   : > { %4444 = vmatprep.mubr.f32.mxu1 %v10785_v26 }
 0x4ae   : > { %v10026_v37 = vpop.f32.mrb[198].mxu0 }
 0x4af   : > { %10825 = vst [vmem:[#allocation39_spill] sm:$0xff] %v10026_v37  ;;  %v10028_v52 = vpop.f32.mrb[199].mxu0  ;;  %v4887_v37 = vld [vmem:[#allocation6 + $0x318] sm:$0xff] }
 0x4b0   : > { %10826 = vst [vmem:[#allocation40_spill] sm:$0xff] %v10028_v52  ;;  %4445 = vmatmul.mubr.f32.gmra.mrb[162].mxu1 %v9713_v25 }
 0x4b1   : > { %4450 = vmatprep.mubr.f32.mxu1 %v10785_v26 }
 0x4b2   : > { %v10032_v20 = vpop.f32.mrb[200].mxu0 }
 0x4b3   : > { %10827 = vst [vmem:[#allocation41_spill] sm:$0xff] %v10032_v20  ;;  %v10034_v28 = vpop.f32.mrb[201].mxu0 }
 0x4b4   : > { %10828 = vst [vmem:[#allocation42_spill] sm:$0xff] %v10034_v28  ;;  %4451 = vmatmul.mubr.f32.gmra.mrb[164].mxu1 %v9721_v54 }
 0x4b5   : > { %4456 = vmatprep.mubr.f32.mxu1 %v10785_v26 }
 0x4b6   : > { %v3782_v19 = vpop.f32.mrb[202].mxu0 }
 0x4b7   : > { %v10038_v63 = vpop.f32.mrb[203].mxu0 }
 0x4b8   : > { %10829 = vst [vmem:[#allocation43_spill] sm:$0xff] %v10038_v63  ;;  %4457 = vmatmul.mubr.f32.gmra.mrb[166].mxu1 %v9723_v10 }
 0x4b9   : > { %4461 = vmatprep.mubr.f32.mxu1 %v10785_v26 }
 0x4ba   : > { %v10042_v52 = vpop.f32.mrb[204].mxu0 }
 0x4bb   : > { %10830 = vst [vmem:[#allocation44_spill] sm:$0xff] %v10042_v52  ;;  %v10044_v25 = vpop.f32.mrb[205].mxu0 }
 0x4bc   : > { %10831 = vst [vmem:[#allocation45_spill] sm:$0xff] %v10044_v25  ;;  %4462 = vmatmul.mubr.f32.gmra.mrb[168].mxu1 %v9736_v18 }
 0x4bd   : > { %4467 = vmatprep.mubr.f32.mxu1 %v10785_v26 }
 0x4be   : > { %v10048_v28 = vpop.f32.mrb[206].mxu0 }
 0x4bf   : > { %10832 = vst [vmem:[#allocation46_spill] sm:$0xff] %v10048_v28  ;;  %v10050_v20 = vpop.f32.mrb[207].mxu0 }
 0x4c0   : > { %10833 = vst [vmem:[#allocation47_spill] sm:$0xff] %v10050_v20  ;;  %4468 = vmatmul.mubr.f32.gmra.mrb[170].mxu1 %v9744_v15 }
 0x4c1   : > { %4473 = vmatprep.mubr.f32.mxu1 %v10785_v26 }
 0x4c2   : > { %v3799_v19 = vpop.f32.mrb[208].mxu0 }
 0x4c3   : > { %v10054_v63 = vpop.f32.mrb[209].mxu0 }
 0x4c4   : > { %10834 = vst [vmem:[#allocation48_spill] sm:$0xff] %v10054_v63  ;;  %4474 = vmatmul.mubr.f32.gmra.mrb[172].mxu1 %v9746_v30 }
 0x4c5   : > { %4478 = vmatprep.mubr.f32.mxu1 %v10785_v26 }
 0x4c6   : > { %v10058_v25 = vpop.f32.mrb[210].mxu0 }
 0x4c7   : > { %10835 = vst [vmem:[#allocation49_spill] sm:$0xff] %v10058_v25  ;;  %v10060_v52 = vpop.f32.mrb[211].mxu0 }
 0x4c8   : > { %10836 = vst [vmem:[#allocation50_spill] sm:$0xff] %v10060_v52  ;;  %4479 = vmatmul.mubr.f32.gmra.mrb[174].mxu1 %v9764_v44 }
 0x4c9   : > { %4484 = vmatprep.mubr.f32.mxu1 %v10785_v26 }
 0x4ca   : > { %v10064_v20 = vpop.f32.mrb[212].mxu0 }
 0x4cb   : > { %10837 = vst [vmem:[#allocation51_spill] sm:$0xff] %v10064_v20  ;;  %v10066_v28 = vpop.f32.mrb[213].mxu0 }
 0x4cc   : > { %10838 = vst [vmem:[#allocation52_spill] sm:$0xff] %v10066_v28  ;;  %4485 = vmatmul.mubr.f32.gmra.mrb[176].mxu1 %v9777_v31 }
 0x4cd   : > { %4490 = vmatprep.mubr.f32.mxu1 %v10785_v26 }
 0x4ce   : > { %v3816_v19 = vpop.f32.mrb[214].mxu0 }
 0x4cf   : > { %v10070_v63 = vpop.f32.mrb[215].mxu0 }
 0x4d0   : > { %10839 = vst [vmem:[#allocation53_spill] sm:$0xff] %v10070_v63  ;;  %4491 = vmatmul.mubr.f32.gmra.mrb[178].mxu1 %v9779_v11 }
 0x4d1   : > { %4495 = vmatprep.mubr.f32.mxu1 %v10785_v26 }
 0x4d2   : > { %v10074_v52 = vpop.f32.mrb[216].mxu0 }
 0x4d3   : > { %10840 = vst [vmem:[#allocation54_spill] sm:$0xff] %v10074_v52  ;;  %v10076_v25 = vpop.f32.mrb[217].mxu0 }
 0x4d4   : > { %10841 = vst [vmem:[#allocation55_spill] sm:$0xff] %v10076_v25  ;;  %4496 = vmatmul.mubr.f32.gmra.mrb[180].mxu1 %v9792_v34 }
 0x4d5   : > { %4501 = vmatprep.mubr.f32.mxu1 %v10785_v26 }
 0x4d6   : > { %v10080_v28 = vpop.f32.mrb[218].mxu0 }
 0x4d7   : > { %10842 = vst [vmem:[#allocation56_spill] sm:$0xff] %v10080_v28  ;;  %v10082_v20 = vpop.f32.mrb[219].mxu0 }
 0x4d8   : > { %10843 = vst [vmem:[#allocation57_spill] sm:$0xff] %v10082_v20  ;;  %4502 = vmatmul.mubr.f32.gmra.mrb[182].mxu1 %v9800_v42 }
 0x4d9   : > { %4507 = vmatprep.mubr.f32.mxu1 %v10785_v26 }
 0x4da   : > { %v3833_v19 = vpop.f32.mrb[220].mxu0 }
 0x4db   : > { %v10086_v63 = vpop.f32.mrb[221].mxu0 }
 0x4dc   : > { %10844 = vst [vmem:[#allocation58_spill] sm:$0xff] %v10086_v63  ;;  %4508 = vmatmul.mubr.f32.gmra.mrb[184].mxu1 %v9802_v16  ;;  %v4884_v63 = vld [vmem:[#allocation6 + $0x300] sm:$0xff] }
 0x4dd   : > { %4512 = vmatprep.mubr.f32.mxu1 %v10785_v26 }
 0x4de   : > { %v10090_v25 = vpop.f32.mrb[222].mxu0 }
 0x4df   : > { %10845 = vst [vmem:[#allocation59_spill] sm:$0xff] %v10090_v25  ;;  %v10092_v52 = vpop.f32.mrb[223].mxu0  ;;  %v4891_v25 = vld [vmem:[#allocation6 + $0x338] sm:$0xff] }
 0x4e0   : > { %10846 = vst [vmem:[#allocation60_spill] sm:$0xff] %v10092_v52  ;;  %4513 = vmatmul.mubr.f32.gmra.mrb[186].mxu1 %v9815_v50  ;;  %v7658_v52 = vpack.c.bf16 %v4887_v37, %v4884_v63  ;;  %v4896_v37 = vld [vmem:[#allocation6 + $0x360] sm:$0xff]  ;;  %v4899_v63 = vld [vmem:[#allocation6 + $0x378] sm:$0xff] }
 0x4e1   : > { %4518 = vmatprep.mubr.f32.mxu1 %v10785_v26 }
 0x4e2   : > { %v10096_v20 = vpop.f32.mrb[224].mxu0 }
 0x4e3   : > { %10847 = vst [vmem:[#allocation61_spill] sm:$0xff] %v10096_v20  ;;  %v10098_v28 = vpop.f32.mrb[225].mxu0  ;;  %v7660_v20 = vpack.c.bf16 %v4894_v12, %v4891_v25  ;;  %v4903_v12 = vld [vmem:[#allocation6 + $0x398] sm:$0xff]  ;;  %v4906_v25 = vld [vmem:[#allocation6 + $0x3b0] sm:$0xff] }
 0x4e4   : > { %10848 = vst [vmem:[#allocation62_spill] sm:$0xff] %v10098_v28  ;;  %4519 = vmatmul.mubr.f32.gmra.mrb[188].mxu1 %v9823_v29  ;;  %v4890_v28 = vld [vmem:[#allocation6 + $0x330] sm:$0xff] }
 0x4e5   : > { %4524 = vmatprep.mubr.f32.mxu1 %v10785_v26 }
 0x4e6   : > { %v3850_v19 = vpop.f32.mrb[226].mxu0 }
 0x4e7   : > { %v10102_v7 = vpop.f32.mrb[227].mxu0  ;;  %v4900_v19 = vld [vmem:[#allocation6 + $0x380] sm:$0xff] }
 0x4e8   : > { %10849 = vst [vmem:[#allocation63_spill] sm:$0xff] %v10102_v7  ;;  %4525 = vmatmul.mubr.f32.gmra.mrb[190].mxu1 %v9825_v36  ;;  %v7662_v7 = vpack.c.bf16 %v4893_v41, %v4890_v28  ;;  %v4902_v41 = vld [vmem:[#allocation6 + $0x390] sm:$0xff]  ;;  %v4905_v28 = vld [vmem:[#allocation6 + $0x3a8] sm:$0xff] }
 0x4e9   : > { %7160 = vmatprep.mubr.f32.mxu1 %v9837_v0  ;;  %v7664_v0 = vpack.c.bf16 %v4900_v19, %v4897_v55  ;;  %v4909_v55 = vld [vmem:[#allocation6 + $0x3c8] sm:$0xff]  ;;  %v7670_v19 = vpack.c.bf16 %v4905_v28, %v4902_v41 }
 0x4ea   : > { %v10106_v27 = vpop.f32.mrb[228].mxu0  ;;  %v4917_v41 = vld [vmem:[#allocation6 + $0x408] sm:$0xff] }
 0x4eb   : > { %10850 = vst [vmem:[#allocation64_spill] sm:$0xff] %v10106_v27  ;;  %v10108_v49 = vpop.f32.mrb[229].mxu0  ;;  %v4921_v28 = vld [vmem:[#allocation6 + $0x428] sm:$0xff] }
 0x4ec   : > { %10851 = vst [vmem:[#allocation65_spill] sm:$0xff] %v10108_v49  ;;  %7161 = vmatmul.mubr.f32.vlgmr.msra.gmra.mrb[48].mxu1 %v9842_v33  ;;  %v7666_v33 = vpack.c.bf16 %v4899_v63, %v4896_v37  ;;  %v4911_v37 = vld [vmem:[#allocation6 + $0x3d8] sm:$0xff] }
 0x4ed   : > { %7659 = vmatpush1.bf16.msra.mxu1 %v7658_v52  ;;  %7163 = vmatprep.mubr.f32.mxu1 %v9846_v58  ;;  %v7668_v58 = vpack.c.bf16 %v4906_v25, %v4903_v12  ;;  %v4915_v63 = vld [vmem:[#allocation6 + $0x3f8] sm:$0xff]  ;;  %v4918_v12 = vld [vmem:[#allocation6 + $0x410] sm:$0xff] }
 0x4ee   : > { %v10112_v62 = vpop.f32.mrb[230].mxu0  ;;  %7661 = vmatprep.subr.bf16.mxu1 %v7660_v20  ;;  %v4912_v20 = vld [vmem:[#allocation6 + $0x3e0] sm:$0xff]  ;;  %v10308_v49 = vld [vmem:[#allocation3 + $0x188] sm:$0xff] }
 0x4ef   : > { %10852 = vst [vmem:[#allocation66_spill] sm:$0xff] %v10112_v62  ;;  %v10114_v27 = vpop.f32.mrb[231].mxu0  ;;  %10860 = vst [vmem:[#allocation74_spill] sm:$0xff] %v10308_v49 }
 0x4f0   : > { %10853 = vst [vmem:[#allocation67_spill] sm:$0xff] %v10114_v27  ;;  %7164 = vmatmul.mubr.f32.gmra.mrb[50].mxu1 %v9850_v56  ;;  %v10304_v27 = vld [vmem:[#allocation3 + $0x180] sm:$0xff] }
 0x4f1   : > { %7166 = vmatprep.mubr.f32.mxu1 %v9854_v32  ;;  %7663 = vmatpush1.bf16.msra.mxu1 %v7662_v7  ;;  %v7672_v32 = vpack.c.bf16 %v4912_v20, %v4909_v55  ;;  %v4908_v7 = vld [vmem:[#allocation6 + $0x3c0] sm:$0xff] }
 0x4f2   : > { %v3867_v52 = vpop.f32.mrb[232].mxu0  ;;  %7665 = vmatprep.subr.bf16.mxu1 %v7664_v0  ;;  %v4924_v55 = vld [vmem:[#allocation6 + $0x440] sm:$0xff] }
 0x4f3   : > { %v10118_v62 = vpop.f32.mrb[233].mxu0  ;;  %v4914_v52 = vld [vmem:[#allocation6 + $0x3f0] sm:$0xff] }
 0x4f4   : > { %10854 = vst [vmem:[#allocation68_spill] sm:$0xff] %v10118_v62  ;;  %7167 = vmatmul.mubr.f32.gmra.mrb[52].mxu1 %v9858_v4  ;;  %v7674_v4 = vpack.c.bf16 %v4911_v37, %v4908_v7  ;;  %v7678_v20 = vpack.c.bf16 %v4917_v41, %v4914_v52  ;;  %v4920_v7 = vld [vmem:[#allocation6 + $0x420] sm:$0xff]  ;;  %v4923_v37 = vld [vmem:[#allocation6 + $0x438] sm:$0xff]  ;;  %v4886_v52 = vld [vmem:[#allocation6 + $0x310] sm:$0xff] }
 0x4f5   : > { %7169 = vmatprep.mubr.f32.mxu1 %v9866_v51  ;;  %7667 = vmatpush1.bf16.msra.mxu1 %v7666_v33  ;;  %v7676_v33 = vpack.c.bf16 %v4918_v12, %v4915_v63  ;;  %v4930_v63 = vld [vmem:[#allocation6 + $0x470] sm:$0xff]  ;;  %v7682_v12 = vpack.c.bf16 %v4923_v37, %v4920_v7  ;;  %v8369_v37 = vld [vmem:[#allocation3 + $0xa8] sm:$0xff]  ;;  %v10300_v62 = vld [vmem:[#allocation3 + $0x178] sm:$0xff] }
 0x4f6   : > { %v10122_v56 = vpop.f32.mrb[234].mxu0  ;;  %7669 = vmatprep.subr.bf16.mxu1 %v7668_v58  ;;  %v8368_v7 = vld [vmem:[#allocation3 + $0xa0] sm:$0xff] }
 0x4f7   : > { %10855 = vst [vmem:[#allocation69_spill] sm:$0xff] %v10122_v56  ;;  %v10124_v0 = vpop.f32.mrb[235].mxu0  ;;  %v4926_v56 = vld [vmem:[#allocation6 + $0x450] sm:$0xff] }
 0x4f8   : > { %10856 = vst [vmem:[#allocation70_spill] sm:$0xff] %v10124_v0  ;;  %7170 = vmatmul.mubr.f32.gmra.mrb[54].mxu1 %v9874_v8 }
 0x4f9   : > { %7172 = vmatprep.mubr.f32.mxu1 %v9880_v47  ;;  %7671 = vmatpush1.bf16.msra.mxu1 %v7670_v19  ;;  %v7680_v19 = vpack.c.bf16 %v4924_v55, %v4921_v28  ;;  %v8364_v28 = vld [vmem:[#allocation3 + $0x80] sm:$0xff]  ;;  %v8365_v55 = vld [vmem:[#allocation3 + $0x88] sm:$0xff] }
 0x4fa   : > { %v10128_v25 = vpop.f32.mrb[236].mxu0  ;;  %7673 = vmatprep.subr.bf16.mxu1 %v7672_v32  ;;  %v4927_v32 = vld [vmem:[#allocation6 + $0x458] sm:$0xff] }
 0x4fb   : > { %10857 = vst [vmem:[#allocation71_spill] sm:$0xff] %v10128_v25  ;;  %v10130_v58 = vpop.f32.mrb[237].mxu0 }
 0x4fc   : > { %10858 = vst [vmem:[#allocation72_spill] sm:$0xff] %v10130_v58  ;;  %7173 = vmatmul.mubr.f32.gmra.mrb[56].mxu1 %v9888_v46  ;;  %v7684_v58 = vpack.c.bf16 %v4930_v63, %v4927_v32  ;;  %v8370_v32 = vld [vmem:[#allocation3 + $0xb0] sm:$0xff]  ;;  %v8373_v63 = vld [vmem:[#allocation3 + $0xc8] sm:$0xff] }
 0x4fd   : > { %7175 = vmatprep.mubr.f32.mxu1 %v9896_v53  ;;  %7675 = vmatpush1.bf16.msra.mxu1 %v7674_v4  ;;  %v4929_v4 = vld [vmem:[#allocation6 + $0x468] sm:$0xff] }
 0x4fe   : > { %v3884_v0 = vpop.f32.mrb[238].mxu0  ;;  %7677 = vmatprep.subr.bf16.mxu1 %v7676_v33  ;;  %v7686_v33 = vpack.c.bf16 %v4929_v4, %v4926_v56  ;;  %v8371_v56 = vld [vmem:[#allocation3 + $0xb8] sm:$0xff] }
 0x4ff   : > { %v10134_v25 = vpop.f32.mrb[239].mxu0  ;;  %v4889_v0 = vld [vmem:[#allocation6 + $0x328] sm:$0xff] }
 0x500   : > { %10859 = vst [vmem:[#allocation73_spill] sm:$0xff] %v10134_v25  ;;  %7176 = vmatmul.mubr.f32.gmra.mrb[58].mxu1 %v9902_v21  ;;  %v7688_v41 = vpack.c.bf16 %v4889_v0, %v4886_v52  ;;  %v8375_v4 = vld [vmem:[#allocation3 + $0xd8] sm:$0xff]  ;;  %v8376_v52 = vld [vmem:[#allocation3 + $0xe0] sm:$0xff]  ;;  %v8377_v0 = vld [vmem:[#allocation3 + $0xe8] sm:$0xff] }
 0x501   : > { %7178 = vmatprep.mubr.f32.mxu1 %v9910_v22  ;;  %7679 = vmatpush1.bf16.msra.mxu1 %v7678_v20  ;;  %v8366_v20 = vld [vmem:[#allocation3 + $0x90] sm:$0xff] }
 0x502   : > { %7681 = vmatprep.subr.bf16.mxu1 %v7680_v19  ;;  %v8367_v19 = vld [vmem:[#allocation3 + $0x98] sm:$0xff]  ;;  %v10296_v25 = vld [vmem:[#allocation3 + $0x170] sm:$0xff] }
 0x504   : > { %7179 = vmatmul.mubr.f32.gmra.mrb[60].mxu1 %v9918_v57 }
 0x505   : > { %7181 = vmatprep.mubr.f32.mxu1 %v9924_v40  ;;  %7683 = vmatpush1.bf16.msra.mxu1 %v7682_v12  ;;  %v8374_v12 = vld [vmem:[#allocation3 + $0xd0] sm:$0xff] }
 0x506   : > { %7685 = vmatprep.subr.bf16.mxu1 %v7684_v58  ;;  %v8372_v58 = vld [vmem:[#allocation3 + $0xc0] sm:$0xff] }
 0x508   : > { %7182 = vmatmul.mubr.f32.gmra.mrb[62].mxu1 %v9932_v61 }
 0x509   : > { %7184 = vmatprep.mubr.f32.mxu1 %v8364_v28  ;;  %7687 = vmatpush1.bf16.msra.mxu1 %v7686_v33  ;;  %v8378_v33 = vld [vmem:[#allocation3 + $0xf0] sm:$0xff]  ;;  %v8379_v28 = vld [vmem:[#allocation3 + $0xf8] sm:$0xff] }
 0x50a   : > { %7689 = vmatprep.subr.bf16.mxu1 %v7688_v41 }
 0x50c   : > { %7185 = vmatmul.mubr.f32.gmra.mrb[64].mxu1 %v8365_v55  ;;  %v8380_v55 = vld [vmem:[#allocation3 + $0x100] sm:$0xff] }
 0x50d   : > { %7187 = vmatprep.mubr.f32.mxu1 %v8366_v20  ;;  %v8381_v20 = vld [vmem:[#allocation3 + $0x108] sm:$0xff] }
 0x510   : > { %7188 = vmatmul.mubr.f32.gmra.mrb[66].mxu1 %v8367_v19  ;;  %v4922_v19 = vld [vmem:[#allocation6 + $0x430] sm:$0xff] }
 0x511   : > { %7190 = vmatprep.mubr.f32.mxu1 %v8368_v7  ;;  %v4925_v7 = vld [vmem:[#allocation6 + $0x448] sm:$0xff] }
 0x514   : > { %7191 = vmatmul.mubr.f32.gmra.mrb[68].mxu1 %v8369_v37  ;;  %v7712_v37 = vpack.c.bf16 %v4925_v7, %v4922_v19  ;;  %v10272_v19 = vld [vmem:[#allocation3 + $0x140] sm:$0xff]  ;;  %v10276_v7 = vld [vmem:[#allocation3 + $0x148] sm:$0xff] }
 0x515   : > { %7193 = vmatprep.mubr.f32.mxu1 %v8370_v32  ;;  %v10176_v32 = vld [vmem:[#allocation3 + $0x80] sm:$0xff] }
 0x518   : > { %7194 = vmatmul.mubr.f32.gmra.mrb[70].mxu1 %v8371_v56  ;;  %v4928_v56 = vld [vmem:[#allocation6 + $0x460] sm:$0xff] }
 0x519   : > { %7196 = vmatprep.mubr.f32.mxu1 %v8372_v58  ;;  %v4931_v58 = vld [vmem:[#allocation6 + $0x478] sm:$0xff] }
 0x51c   : > { %7197 = vmatmul.mubr.f32.gmra.mrb[72].mxu1 %v8373_v63  ;;  %v7716_v63 = vpack.c.bf16 %v4931_v58, %v4928_v56  ;;  %v10284_v56 = vld [vmem:[#allocation3 + $0x158] sm:$0xff]  ;;  %v10288_v58 = vld [vmem:[#allocation3 + $0x160] sm:$0xff] }
 0x51d   : > { %7199 = vmatprep.mubr.f32.mxu1 %v8374_v12  ;;  %v10180_v12 = vld [vmem:[#allocation3 + $0x88] sm:$0xff] }
 0x520   : > { %7200 = vmatmul.mubr.f32.gmra.mrb[74].mxu1 %v8375_v4  ;;  %v10184_v4 = vld [vmem:[#allocation3 + $0x90] sm:$0xff] }
 0x521   : > { %7202 = vmatprep.mubr.f32.mxu1 %v8376_v52  ;;  %v10188_v52 = vld [vmem:[#allocation3 + $0x98] sm:$0xff] }
 0x524   : > { %7203 = vmatmul.mubr.f32.gmra.mrb[76].mxu1 %v8377_v0  ;;  %v10192_v0 = vld [vmem:[#allocation3 + $0xa0] sm:$0xff] }
 0x525   : > { %7205 = vmatprep.mubr.f32.mxu1 %v8378_v33  ;;  %v10196_v33 = vld [vmem:[#allocation3 + $0xa8] sm:$0xff] }
 0x528   : > { %7206 = vmatmul.mubr.f32.gmra.mrb[78].mxu1 %v8379_v28  ;;  %v10200_v28 = vld [vmem:[#allocation3 + $0xb0] sm:$0xff] }
 0x529   : > { %7208 = vmatprep.mubr.f32.mxu1 %v8380_v55  ;;  %v10204_v55 = vld [vmem:[#allocation3 + $0xb8] sm:$0xff] }
 0x52c   : > { %7209 = vmatmul.mubr.f32.gmra.mrb[80].mxu1 %v8381_v20  ;;  %v10208_v20 = vld [vmem:[#allocation3 + $0xc0] sm:$0xff] }
 0x52d   : > { %7211 = vmatprep.mubr.f32.mxu1 %v9721_v54  ;;  %v4892_v54 = vld [vmem:[#allocation6 + $0x340] sm:$0xff] }
 0x530   : > { %7212 = vmatmul.mubr.f32.gmra.mrb[82].mxu1 %v9723_v10  ;;  %v4895_v10 = vld [vmem:[#allocation6 + $0x358] sm:$0xff] }
 0x531   : > { %7214 = vmatprep.mubr.f32.mxu1 %v9736_v18  ;;  %v7692_v18 = vpack.c.bf16 %v4895_v10, %v4892_v54  ;;  %v10212_v54 = vld [vmem:[#allocation3 + $0xc8] sm:$0xff]  ;;  %v10216_v10 = vld [vmem:[#allocation3 + $0xd0] sm:$0xff] }
 0x534   : > { %7215 = vmatmul.mubr.f32.gmra.mrb[84].mxu1 %v9744_v15  ;;  %v4898_v15 = vld [vmem:[#allocation6 + $0x370] sm:$0xff] }
 0x535   : > { %7217 = vmatprep.mubr.f32.mxu1 %v9746_v30  ;;  %v4901_v30 = vld [vmem:[#allocation6 + $0x388] sm:$0xff] }
 0x538   : > { %7218 = vmatmul.mubr.f32.gmra.mrb[86].mxu1 %v9764_v44  ;;  %v7696_v44 = vpack.c.bf16 %v4901_v30, %v4898_v15  ;;  %v10224_v15 = vld [vmem:[#allocation3 + $0xe0] sm:$0xff]  ;;  %v10228_v30 = vld [vmem:[#allocation3 + $0xe8] sm:$0xff] }
 0x539   : > { %7220 = vmatprep.mubr.f32.mxu1 %v9777_v31  ;;  %v4904_v31 = vld [vmem:[#allocation6 + $0x3a0] sm:$0xff] }
 0x53c   : > { %7221 = vmatmul.mubr.f32.gmra.mrb[88].mxu1 %v9779_v11  ;;  %v4907_v11 = vld [vmem:[#allocation6 + $0x3b8] sm:$0xff] }
 0x53d   : > { %7223 = vmatprep.mubr.f32.mxu1 %v9792_v34  ;;  %v7700_v34 = vpack.c.bf16 %v4907_v11, %v4904_v31  ;;  %v10236_v31 = vld [vmem:[#allocation3 + $0xf8] sm:$0xff]  ;;  %v10240_v11 = vld [vmem:[#allocation3 + $0x100] sm:$0xff] }
 0x540   : > { %7224 = vmatmul.mubr.f32.gmra.mrb[90].mxu1 %v9800_v42  ;;  %v4910_v42 = vld [vmem:[#allocation6 + $0x3d0] sm:$0xff] }
 0x541   : > { %7226 = vmatprep.mubr.f32.mxu1 %v9802_v16  ;;  %v4913_v16 = vld [vmem:[#allocation6 + $0x3e8] sm:$0xff] }
 0x544   : > { %7227 = vmatmul.mubr.f32.gmra.mrb[92].mxu1 %v9815_v50  ;;  %v7704_v50 = vpack.c.bf16 %v4913_v16, %v4910_v42  ;;  %v10248_v42 = vld [vmem:[#allocation3 + $0x110] sm:$0xff]  ;;  %v10252_v16 = vld [vmem:[#allocation3 + $0x118] sm:$0xff] }
 0x545   : > { %7229 = vmatprep.mubr.f32.mxu1 %v9823_v29  ;;  %v4916_v29 = vld [vmem:[#allocation6 + $0x400] sm:$0xff] }
 0x548   : > { %7230 = vmatmul.mubr.f32.gmra.mrb[94].mxu1 %v9825_v36  ;;  %v4919_v36 = vld [vmem:[#allocation6 + $0x418] sm:$0xff] }
 0x549   : > { %4996 = vmatprep.mubr.f32.mxu1 %v10785_v26 }
 0x54c   : > { %4997 = vmatmul.mubr.f32.vlgmr.msra.gmra.mrb[96].mxu1 %v9866_v51 }
 0x54d   : > { %7691 = vmatpush3.bf16.msra.mxu1 %v7688_v41  ;;  %5002 = vmatprep.mubr.f32.mxu1 %v10785_v26  ;;  %v7708_v41 = vpack.c.bf16 %v4919_v36, %v4916_v29  ;;  %v10260_v29 = vld [vmem:[#allocation3 + $0x128] sm:$0xff]  ;;  %v10264_v36 = vld [vmem:[#allocation3 + $0x130] sm:$0xff] }
 0x54e   : > { %7693 = vmatprep.subr.bf16.mxu1 %v7692_v18 }
 0x550   : > { %5003 = vmatmul.mubr.f32.gmra.mrb[98].mxu1 %v9874_v8 }
 0x551   : > { %5008 = vmatprep.mubr.f32.mxu1 %v10785_v26  ;;  %7695 = vmatpush3.bf16.msra.mxu1 %v7692_v18  ;;  %v10220_v18 = vld [vmem:[#allocation3 + $0xd8] sm:$0xff] }
 0x552   : > { %7697 = vmatprep.subr.bf16.mxu1 %v7696_v44 }
 0x554   : > { %5009 = vmatmul.mubr.f32.gmra.mrb[100].mxu1 %v9880_v47 }
 0x555   : > { %5013 = vmatprep.mubr.f32.mxu1 %v10785_v26  ;;  %7699 = vmatpush3.bf16.msra.mxu1 %v7696_v44  ;;  %v10232_v44 = vld [vmem:[#allocation3 + $0xf0] sm:$0xff] }
 0x556   : > { %7701 = vmatprep.subr.bf16.mxu1 %v7700_v34 }
 0x558   : > { %5014 = vmatmul.mubr.f32.gmra.mrb[102].mxu1 %v9888_v46 }
 0x559   : > { %5019 = vmatprep.mubr.f32.mxu1 %v10785_v26  ;;  %7703 = vmatpush3.bf16.msra.mxu1 %v7700_v34  ;;  %v10244_v34 = vld [vmem:[#allocation3 + $0x108] sm:$0xff] }
 0x55a   : > { %7705 = vmatprep.subr.bf16.mxu1 %v7704_v50 }
 0x55c   : > { %5020 = vmatmul.mubr.f32.gmra.mrb[104].mxu1 %v9896_v53 }
 0x55d   : > { %5025 = vmatprep.mubr.f32.mxu1 %v10785_v26  ;;  %7707 = vmatpush3.bf16.msra.mxu1 %v7704_v50  ;;  %v10256_v50 = vld [vmem:[#allocation3 + $0x120] sm:$0xff] }
 0x55e   : > { %7709 = vmatprep.subr.bf16.mxu1 %v7708_v41 }
 0x560   : > { %5026 = vmatmul.mubr.f32.gmra.mrb[106].mxu1 %v9902_v21 }
 0x561   : > { %5030 = vmatprep.mubr.f32.mxu1 %v10785_v26  ;;  %7711 = vmatpush3.bf16.msra.mxu1 %v7708_v41  ;;  %v10268_v41 = vld [vmem:[#allocation3 + $0x138] sm:$0xff] }
 0x562   : > { %7713 = vmatprep.subr.bf16.mxu1 %v7712_v37 }
 0x564   : > { %5031 = vmatmul.mubr.f32.gmra.mrb[108].mxu1 %v9910_v22 }
 0x565   : > { %5036 = vmatprep.mubr.f32.mxu1 %v10785_v26  ;;  %7715 = vmatpush3.bf16.msra.mxu1 %v7712_v37  ;;  %v10280_v37 = vld [vmem:[#allocation3 + $0x150] sm:$0xff] }
 0x566   : > { %7717 = vmatprep.subr.bf16.mxu1 %v7716_v63 }
 0x568   : > { %5037 = vmatmul.mubr.f32.gmra.mrb[110].mxu1 %v9918_v57 }
 0x569   : > { %5042 = vmatprep.mubr.f32.mxu1 %v10785_v26  ;;  %7719 = vmatpush3.bf16.msra.mxu1 %v7716_v63  ;;  %v10292_v63 = vld [vmem:[#allocation3 + $0x168] sm:$0xff] }
 0x56c   : > { %5043 = vmatmul.mubr.f32.gmra.mrb[112].mxu1 %v9924_v40 }
 0x56d   : > { %5047 = vmatprep.mubr.f32.mxu1 %v10785_v26 }
 0x570   : > { %5048 = vmatmul.mubr.f32.gmra.mrb[114].mxu1 %v9932_v61 }
 0x571   : > { %5053 = vmatprep.mubr.f32.mxu1 %v10785_v26 }
 0x574   : > { %5054 = vmatmul.mubr.f32.gmra.mrb[116].mxu1 %v10176_v32 }
 0x575   : > { %5059 = vmatprep.mubr.f32.mxu1 %v10785_v26 }
 0x578   : > { %5060 = vmatmul.mubr.f32.gmra.mrb[118].mxu1 %v10180_v12 }
 0x579   : > { %5064 = vmatprep.mubr.f32.mxu1 %v10785_v26 }
 0x57c   : > { %5065 = vmatmul.mubr.f32.gmra.mrb[120].mxu1 %v10184_v4 }
 0x57d   : > { %5070 = vmatprep.mubr.f32.mxu1 %v10785_v26 }
 0x580   : > { %5071 = vmatmul.mubr.f32.gmra.mrb[122].mxu1 %v10188_v52 }
 0x581   : > { %5076 = vmatprep.mubr.f32.mxu1 %v10785_v26 }
 0x584   : > { %5077 = vmatmul.mubr.f32.gmra.mrb[124].mxu1 %v10192_v0 }
 0x585   : > { %5081 = vmatprep.mubr.f32.mxu1 %v10785_v26 }
 0x588   : > { %5082 = vmatmul.mubr.f32.gmra.mrb[126].mxu1 %v10196_v33 }
 0x589   : > { %5087 = vmatprep.mubr.f32.mxu1 %v10785_v26 }
 0x58c   : > { %5088 = vmatmul.mubr.f32.gmra.mrb[128].mxu1 %v10200_v28 }
 0x58d   : > { %5093 = vmatprep.mubr.f32.mxu1 %v10785_v26 }
 0x590   : > { %5094 = vmatmul.mubr.f32.gmra.mrb[130].mxu1 %v10204_v55 }
 0x591   : > { %5098 = vmatprep.mubr.f32.mxu1 %v10785_v26 }
 0x594   : > { %5099 = vmatmul.mubr.f32.gmra.mrb[132].mxu1 %v10208_v20 }
 0x595   : > { %5104 = vmatprep.mubr.f32.mxu1 %v10785_v26 }
 0x598   : > { %5105 = vmatmul.mubr.f32.gmra.mrb[134].mxu1 %v10212_v54 }
 0x599   : > { %5110 = vmatprep.mubr.f32.mxu1 %v10785_v26 }
 0x59c   : > { %5111 = vmatmul.mubr.f32.gmra.mrb[136].mxu1 %v10216_v10 }
 0x59d   : > { %5115 = vmatprep.mubr.f32.mxu1 %v10785_v26 }
 0x5a0   : > { %5116 = vmatmul.mubr.f32.gmra.mrb[138].mxu1 %v10220_v18 }
 0x5a1   : > { %5121 = vmatprep.mubr.f32.mxu1 %v10785_v26 }
 0x5a4   : > { %5122 = vmatmul.mubr.f32.gmra.mrb[140].mxu1 %v10224_v15 }
 0x5a5   : > { %5127 = vmatprep.mubr.f32.mxu1 %v10785_v26 }
 0x5a8   : > { %5128 = vmatmul.mubr.f32.gmra.mrb[142].mxu1 %v10228_v30 }
 0x5a9   : > { %5132 = vmatprep.mubr.f32.mxu1 %v10785_v26 }
 0x5ac   : > { %5133 = vmatmul.mubr.f32.gmra.mrb[144].mxu1 %v10232_v44 }
 0x5ad   : > { %5138 = vmatprep.mubr.f32.mxu1 %v10785_v26 }
 0x5b0   : > { %5139 = vmatmul.mubr.f32.gmra.mrb[146].mxu1 %v10236_v31 }
 0x5b1   : > { %5144 = vmatprep.mubr.f32.mxu1 %v10785_v26 }
 0x5b4   : > { %5145 = vmatmul.mubr.f32.gmra.mrb[148].mxu1 %v10240_v11 }
 0x5b5   : > { %5149 = vmatprep.mubr.f32.mxu1 %v10785_v26 }
 0x5b8   : > { %5150 = vmatmul.mubr.f32.gmra.mrb[150].mxu1 %v10244_v34 }
 0x5b9   : > { %5155 = vmatprep.mubr.f32.mxu1 %v10785_v26 }
 0x5bc   : > { %5156 = vmatmul.mubr.f32.gmra.mrb[152].mxu1 %v10248_v42 }
 0x5bd   : > { %5161 = vmatprep.mubr.f32.mxu1 %v10785_v26 }
 0x5c0   : > { %5162 = vmatmul.mubr.f32.gmra.mrb[154].mxu1 %v10252_v16 }
 0x5c1   : > { %5166 = vmatprep.mubr.f32.mxu1 %v10785_v26 }
 0x5c4   : > { %5167 = vmatmul.mubr.f32.gmra.mrb[156].mxu1 %v10256_v50 }
 0x5c5   : > { %5172 = vmatprep.mubr.f32.mxu1 %v10785_v26 }
 0x5c8   : > { %5173 = vmatmul.mubr.f32.gmra.mrb[158].mxu1 %v10260_v29 }
 0x5c9   : > { %5178 = vmatprep.mubr.f32.mxu1 %v10785_v26 }
 0x5cc   : > { %5179 = vmatmul.mubr.f32.gmra.mrb[160].mxu1 %v10264_v36 }
 0x5cd   : > { %5183 = vmatprep.mubr.f32.mxu1 %v10785_v26 }
 0x5d0   : > { %5184 = vmatmul.mubr.f32.gmra.mrb[162].mxu1 %v10268_v41 }
 0x5d1   : > { %5189 = vmatprep.mubr.f32.mxu1 %v10785_v26 }
 0x5d4   : > { %5190 = vmatmul.mubr.f32.gmra.mrb[164].mxu1 %v10272_v19 }
 0x5d5   : > { %5195 = vmatprep.mubr.f32.mxu1 %v10785_v26 }
 0x5d8   : > { %5196 = vmatmul.mubr.f32.gmra.mrb[166].mxu1 %v10276_v7 }
 0x5d9   : > { %5200 = vmatprep.mubr.f32.mxu1 %v10785_v26 }
 0x5dc   : > { %5201 = vmatmul.mubr.f32.gmra.mrb[168].mxu1 %v10280_v37 }
 0x5dd   : > { %5206 = vmatprep.mubr.f32.mxu1 %v10785_v26 }
 0x5e0   : > { %5207 = vmatmul.mubr.f32.gmra.mrb[170].mxu1 %v10284_v56 }
 0x5e1   : > { %5212 = vmatprep.mubr.f32.mxu1 %v10785_v26 }
 0x5e4   : > { %5213 = vmatmul.mubr.f32.gmra.mrb[172].mxu1 %v10288_v58 }
 0x5e5   : > { %5217 = vmatprep.mubr.f32.mxu1 %v10785_v26 }
 0x5e8   : > { %5218 = vmatmul.mubr.f32.gmra.mrb[174].mxu1 %v10292_v63 }
 0x5e9   : > { %5223 = vmatprep.mubr.f32.mxu1 %v10785_v26 }
 0x5ec   : > { %5224 = vmatmul.mubr.f32.gmra.mrb[176].mxu1 %v10296_v25 }
 0x5ed   : > { %5229 = vmatprep.mubr.f32.mxu1 %v10785_v26 }
 0x5f0   : > { %5230 = vmatmul.mubr.f32.gmra.mrb[178].mxu1 %v10300_v62 }
 0x5f1   : > { %5234 = vmatprep.mubr.f32.mxu1 %v10785_v26 }
 0x5f4   : > { %5235 = vmatmul.mubr.f32.gmra.mrb[180].mxu1 %v10304_v27 }
 0x5f5   : > { %5240 = vmatprep.mubr.f32.mxu1 %v10785_v26 }
 0x5f8   : > { %5241 = vmatmul.mubr.f32.gmra.mrb[182].mxu1 %v10308_v49  ;;  %v10324_v49 = vld [vmem:[#allocation3 + $0x1a8] sm:$0xff] }
 0x5f9   : > { %5246 = vmatprep.mubr.f32.mxu1 %v10785_v26 }
 0x5fc   : > { %5247 = vmatmul.mubr.f32.gmra.mrb[184].mxu1 %v10312_v23 }
 0x5fd   : > { %5251 = vmatprep.mubr.f32.mxu1 %v10785_v26 }
 0x600   : > { %5252 = vmatmul.mubr.f32.gmra.mrb[186].mxu1 %v10316_v3 }
 0x601   : > { %5257 = vmatprep.mubr.f32.mxu1 %v10785_v26 }
 0x604   : > { %5258 = vmatmul.mubr.f32.gmra.mrb[188].mxu1 %v10320_v9 }
 0x605   : > { %5263 = vmatprep.mubr.f32.mxu1 %v10785_v26 }
 0x608   : > { %5264 = vmatmul.mubr.f32.gmra.mrb[190].mxu1 %v10324_v49 }
 0x609   : > { %7264 = vmatprep.mubr.f32.mxu1 %v9866_v51 }
 0x60c   : > { %7265 = vmatmul.mubr.f32.vlgmr.msra.gmra.mrb[48].mxu1 %v9874_v8 }
 0x60d   : > { %7267 = vmatprep.mubr.f32.mxu1 %v9880_v47 }
 0x610   : > { %7268 = vmatmul.mubr.f32.gmra.mrb[50].mxu1 %v9888_v46 }
 0x611   : > { %7270 = vmatprep.mubr.f32.mxu1 %v9896_v53 }
 0x614   : > { %7271 = vmatmul.mubr.f32.gmra.mrb[52].mxu1 %v9902_v21 }
 0x615   : > { %7273 = vmatprep.mubr.f32.mxu1 %v9910_v22 }
 0x618   : > { %7274 = vmatmul.mubr.f32.gmra.mrb[54].mxu1 %v9918_v57 }
 0x619   : > { %7276 = vmatprep.mubr.f32.mxu1 %v9924_v40 }
 0x61c   : > { %7277 = vmatmul.mubr.f32.gmra.mrb[56].mxu1 %v9932_v61 }
 0x61d   : > { %7279 = vmatprep.mubr.f32.mxu1 %v10176_v32 }
 0x61f   : > { %v4998_v26 = vpop.f32.mrb[96].mxu1 }
 0x620   : > { %v7768_v51 = vadd.f32 %v4998_v26, %v9862_v39  ;;  %v5000_v8 = vpop.f32.mrb[97].mxu1  ;;  %7280 = vmatmul.mubr.f32.gmra.mrb[58].mxu1 %v10180_v12 }
 0x621   : > { %v7769_v47 = vadd.f32 %v5000_v8, %v9864_v17  ;;  %7282 = vmatprep.mubr.f32.mxu1 %v10184_v4  ;;  %v10861_v8 = vld [vmem:[#allocation13_spill] sm:$0xff] }
 0x623   : > { %v5004_v46 = vpop.f32.mrb[98].mxu1  ;;  %v5750_v61 = vrot.slane %v7769_v47, 1  ;;  %v10862_v47 = vld [vmem:[#allocation10_spill] sm:$0xff] }
 0x624   : > { %v7770_v53 = vadd.f32 %v5004_v46, %v9870_v5  ;;  %v5006_v21 = vpop.f32.mrb[99].mxu1  ;;  %7283 = vmatmul.mubr.f32.gmra.mrb[60].mxu1 %v10188_v52 }
 0x625   : > { %v7771_v22 = vadd.f32 %v5006_v21, %v9872_v24  ;;  %7285 = vmatprep.mubr.f32.mxu1 %v10192_v0 }
 0x627   : > { %v5751_v57 = vrot.slane %v7771_v22, 1  ;;  %v5010_v39 = vpop.f32.mrb[100].mxu1 }
 0x628   : > { %v5011_v40 = vpop.f32.mrb[101].mxu1  ;;  %7286 = vmatmul.mubr.f32.gmra.mrb[62].mxu1 %v10196_v33  ;;  %v10864_v39 = vld [vmem:[#allocation12_spill] sm:$0xff] }
 0x629   : > { %v5752_v17 = vsel %vm2878_vm2, %v5750_v61, %v5751_v57  ;;  %v7772_v32 = vadd.f32 %v5011_v40, %v9878_v2  ;;  %7288 = vmatprep.mubr.f32.mxu1 %v10200_v28 }
 0x62a   : > { %v10350_v5 = vadd.f32 %v7768_v51, %v5752_v17 }
 0x62b   : > { %v5753_v12 = vrot.slane %v7772_v32, 1  ;;  %v5015_v4 = vpop.f32.mrb[102].mxu1  ;;  %v10865_v32 = vld [vmem:[#allocation14_spill] sm:$0xff] }
 0x62c   : > { %v7773_v24 = vadd.f32 %v5015_v4, %v9884_v59  ;;  %v5017_v52 = vpop.f32.mrb[103].mxu1  ;;  %7289 = vmatmul.mubr.f32.gmra.mrb[64].mxu1 %v10204_v55 }
 0x62d   : > { %v5754_v0 = vsel %vm2878_vm2, %v5751_v57, %v5753_v12  ;;  %v7774_v26 = vadd.f32 %v5017_v52, %v9886_v6  ;;  %7291 = vmatprep.mubr.f32.mxu1 %v10208_v20  ;;  %v10863_v20 = vld [vmem:[#allocation11_spill] sm:$0xff] }
 0x62e   : > { %v10357_v33 = vadd.f32 %v7770_v53, %v5754_v0  ;;  %v10866_v52 = vld [vmem:[#allocation15_spill] sm:$0xff]  ;;  %v10867_v0 = vld [vmem:[#allocation16_spill] sm:$0xff] }
 0x62f   : > { %v5021_v2 = vpop.f32.mrb[104].mxu1  ;;  %v5755_v59 = vrot.slane %v7774_v26, 1 }
 0x630   : > { %v7775_v28 = vadd.f32 %v5021_v2, %v10861_v8  ;;  %v5023_v51 = vpop.f32.mrb[105].mxu1  ;;  %7292 = vmatmul.mubr.f32.gmra.mrb[66].mxu1 %v10212_v54 }
 0x631   : > { %v7776_v46 = vadd.f32 %v5023_v51, %v10862_v47  ;;  %7294 = vmatprep.mubr.f32.mxu1 %v10216_v10 }
 0x633   : > { %v5756_v55 = vrot.slane %v7776_v46, 1  ;;  %v5027_v21 = vpop.f32.mrb[106].mxu1 }
 0x634   : > { %v5028_v22 = vpop.f32.mrb[107].mxu1  ;;  %7295 = vmatmul.mubr.f32.gmra.mrb[68].mxu1 %v10220_v18 }
 0x635   : > { %v5757_v6 = vsel %vm2878_vm2, %v5755_v59, %v5756_v55  ;;  %v7777_v53 = vadd.f32 %v5028_v22, %v10863_v20  ;;  %7297 = vmatprep.mubr.f32.mxu1 %v10224_v15 }
 0x636   : > { %v10367_v61 = vadd.f32 %v7773_v24, %v5757_v6  ;;  %v10870_v6 = vld [vmem:[#allocation19_spill] sm:$0xff] }
 0x637   : > { %v5758_v57 = vrot.slane %v7777_v53, 1  ;;  %v5032_v54 = vpop.f32.mrb[108].mxu1 }
 0x638   : > { %v7778_v40 = vadd.f32 %v5032_v54, %v10864_v39  ;;  %v5034_v17 = vpop.f32.mrb[109].mxu1  ;;  %7298 = vmatmul.mubr.f32.gmra.mrb[70].mxu1 %v10228_v30  ;;  %v10872_v39 = vld [vmem:[#allocation21_spill] sm:$0xff] }
 0x639   : > { %v5759_v10 = vsel %vm2878_vm2, %v5756_v55, %v5758_v57  ;;  %v7779_v12 = vadd.f32 %v5034_v17, %v10865_v32  ;;  %7300 = vmatprep.mubr.f32.mxu1 %v10232_v44  ;;  %v10869_v55 = vld [vmem:[#allocation18_spill] sm:$0xff]  ;;  %v10871_v57 = vld [vmem:[#allocation20_spill] sm:$0xff] }
 0x63a   : > { %v10374_v18 = vadd.f32 %v7775_v28, %v5759_v10  ;;  %v10868_v28 = vld [vmem:[#allocation17_spill] sm:$0xff] }
 0x63b   : > { %v5038_v4 = vpop.f32.mrb[110].mxu1  ;;  %v5760_v2 = vrot.slane %v7779_v12, 1 }
 0x63c   : > { %v7780_v15 = vadd.f32 %v5038_v4, %v10866_v52  ;;  %v5040_v24 = vpop.f32.mrb[111].mxu1  ;;  %7301 = vmatmul.mubr.f32.gmra.mrb[72].mxu1 %v10236_v31 }
 0x63d   : > { %v7781_v26 = vadd.f32 %v5040_v24, %v10867_v0  ;;  %7303 = vmatprep.mubr.f32.mxu1 %v10240_v11 }
 0x63f   : > { %v5761_v30 = vrot.slane %v7781_v26, 1  ;;  %v5044_v8 = vpop.f32.mrb[112].mxu1 }
 0x640   : > { %v5045_v51 = vpop.f32.mrb[113].mxu1  ;;  %7304 = vmatmul.mubr.f32.gmra.mrb[74].mxu1 %v10244_v34 }
 0x641   : > { %v5762_v44 = vsel %vm2878_vm2, %v5760_v2, %v5761_v30  ;;  %v7782_v47 = vadd.f32 %v5045_v51, %v10868_v28  ;;  %7306 = vmatprep.mubr.f32.mxu1 %v10248_v42 }
 0x642   : > { %v10384_v46 = vadd.f32 %v7778_v40, %v5762_v44 }
 0x643   : > { %v5763_v59 = vrot.slane %v7782_v47, 1  ;;  %v5049_v31 = vpop.f32.mrb[114].mxu1 }
 0x644   : > { %v7783_v21 = vadd.f32 %v5049_v31, %v10869_v55  ;;  %v5051_v22 = vpop.f32.mrb[115].mxu1  ;;  %7307 = vmatmul.mubr.f32.gmra.mrb[76].mxu1 %v10252_v16  ;;  %v10874_v31 = vld [vmem:[#allocation22_spill] sm:$0xff] }
 0x645   : > { %v5764_v11 = vsel %vm2878_vm2, %v5761_v30, %v5763_v59  ;;  %v7784_v20 = vadd.f32 %v5051_v22, %v10870_v6  ;;  %7309 = vmatprep.mubr.f32.mxu1 %v10256_v50  ;;  %v10873_v59 = vld [vmem:[#allocation74_spill] sm:$0xff] }
 0x646   : > { %v10391_v34 = vadd.f32 %v7780_v15, %v5764_v11 }
 0x647   : > { %v5055_v53 = vpop.f32.mrb[116].mxu1  ;;  %v5765_v17 = vrot.slane %v7784_v20, 1 }
 0x648   : > { %v7785_v42 = vadd.f32 %v5055_v53, %v10871_v57  ;;  %v5057_v54 = vpop.f32.mrb[117].mxu1  ;;  %7310 = vmatmul.mubr.f32.gmra.mrb[78].mxu1 %v10260_v29  ;;  %v10876_v53 = vld [vmem:[#allocation24_spill] sm:$0xff] }
 0x649   : > { %v7786_v40 = vadd.f32 %v5057_v54, %v10872_v39  ;;  %7312 = vmatprep.mubr.f32.mxu1 %v10264_v36  ;;  %v10877_v54 = vld [vmem:[#allocation25_spill] sm:$0xff] }
 0x64b   : > { %v5766_v16 = vrot.slane %v7786_v40, 1  ;;  %v5061_v10 = vpop.f32.mrb[118].mxu1 }
 0x64c   : > { %v5062_v32 = vpop.f32.mrb[119].mxu1  ;;  %7313 = vmatmul.mubr.f32.gmra.mrb[80].mxu1 %v10268_v41 }
 0x64d   : > { %v5767_v50 = vsel %vm2878_vm2, %v5765_v17, %v5766_v16  ;;  %v7787_v12 = vadd.f32 %v5062_v32, %v9942_v48  ;;  %7315 = vmatprep.mubr.f32.mxu1 %v10272_v19  ;;  %v10878_v17 = vld [vmem:[#allocation26_spill] sm:$0xff] }
 0x64e   : > { %v10401_v4 = vadd.f32 %v7783_v21, %v5767_v50 }
 0x64f   : > { %v5768_v52 = vrot.slane %v7787_v12, 1  ;;  %v5066_v29 = vpop.f32.mrb[120].mxu1 }
 0x650   : > { %v7788_v15 = vadd.f32 %v5066_v29, %v9946_v38  ;;  %v5068_v24 = vpop.f32.mrb[121].mxu1  ;;  %7316 = vmatmul.mubr.f32.gmra.mrb[82].mxu1 %v10276_v7 }
 0x651   : > { %v5769_v36 = vsel %vm2878_vm2, %v5766_v16, %v5768_v52  ;;  %v7789_v0 = vadd.f32 %v5068_v24, %v9948_v1  ;;  %7318 = vmatprep.mubr.f32.mxu1 %v10280_v37  ;;  %v10880_v24 = vld [vmem:[#allocation28_spill] sm:$0xff] }
 0x652   : > { %v10408_v41 = vadd.f32 %v7785_v42, %v5769_v36 }
 0x653   : > { %v5072_v48 = vpop.f32.mrb[122].mxu1  ;;  %v5770_v38 = vrot.slane %v7789_v0, 1 }
 0x654   : > { %v7790_v19 = vadd.f32 %v5072_v48, %v9952_v45  ;;  %v5074_v26 = vpop.f32.mrb[123].mxu1  ;;  %7319 = vmatmul.mubr.f32.gmra.mrb[84].mxu1 %v10284_v56 }
 0x655   : > { %v7791_v2 = vadd.f32 %v5074_v26, %v9954_v43  ;;  %7321 = vmatprep.mubr.f32.mxu1 %v10288_v58 }
 0x657   : > { %v5771_v7 = vrot.slane %v7791_v2, 1  ;;  %v5078_v30 = vpop.f32.mrb[124].mxu1 }
 0x658   : > { %v5079_v8 = vpop.f32.mrb[125].mxu1  ;;  %7322 = vmatmul.mubr.f32.gmra.mrb[86].mxu1 %v10292_v63 }
 0x659   : > { %v5772_v1 = vsel %vm2878_vm2, %v5770_v38, %v5771_v7  ;;  %v7792_v37 = vadd.f32 %v5079_v8, %v9958_v35  ;;  %7324 = vmatprep.mubr.f32.mxu1 %v10296_v25 }
 0x65a   : > { %v10418_v45 = vadd.f32 %v7788_v15, %v5772_v1 }
 0x65b   : > { %v5773_v51 = vrot.slane %v7792_v37, 1  ;;  %v5083_v56 = vpop.f32.mrb[126].mxu1  ;;  %v10883_v37 = vld [vmem:[#allocation31_spill] sm:$0xff] }
 0x65c   : > { %v7793_v43 = vadd.f32 %v5083_v56, %v9962_v60  ;;  %v5085_v44 = vpop.f32.mrb[127].mxu1  ;;  %7325 = vmatmul.mubr.f32.gmra.mrb[88].mxu1 %v10300_v62 }
 0x65d   : > { %v5774_v58 = vsel %vm2878_vm2, %v5771_v7, %v5773_v51  ;;  %v7794_v28 = vadd.f32 %v5085_v44, %v9964_v13  ;;  %7327 = vmatprep.mubr.f32.mxu1 %v10304_v27  ;;  %v10875_v27 = vld [vmem:[#allocation23_spill] sm:$0xff]  ;;  %v10882_v7 = vld [vmem:[#allocation30_spill] sm:$0xff] }
 0x65e   : > { %v10425_v63 = vadd.f32 %v7790_v19, %v5774_v58  ;;  %v10881_v19 = vld [vmem:[#allocation29_spill] sm:$0xff] }
 0x65f   : > { %v5089_v35 = vpop.f32.mrb[128].mxu1  ;;  %v5775_v60 = vrot.slane %v7794_v28, 1 }
 0x660   : > { %v7795_v25 = vadd.f32 %v5089_v35, %v9968_v14  ;;  %v5091_v47 = vpop.f32.mrb[129].mxu1  ;;  %7328 = vmatmul.mubr.f32.gmra.mrb[90].mxu1 %v10873_v59  ;;  %v10885_v59 = vld [vmem:[#allocation33_spill] sm:$0xff] }
 0x661   : > { %v7796_v55 = vadd.f32 %v5091_v47, %v10874_v31  ;;  %7330 = vmatprep.mubr.f32.mxu1 %v10312_v23 }
 0x663   : > { %v5776_v62 = vrot.slane %v7796_v55, 1  ;;  %v5095_v21 = vpop.f32.mrb[130].mxu1 }
 0x664   : > { %v5096_v22 = vpop.f32.mrb[131].mxu1  ;;  %7331 = vmatmul.mubr.f32.gmra.mrb[92].mxu1 %v10316_v3  ;;  %v10886_v21 = vld [vmem:[#allocation34_spill] sm:$0xff] }
 0x665   : > { %v5777_v13 = vsel %vm2878_vm2, %v5775_v60, %v5776_v62  ;;  %v7797_v11 = vadd.f32 %v5096_v22, %v10875_v27  ;;  %7333 = vmatprep.mubr.f32.mxu1 %v10320_v9  ;;  %v10879_v9 = vld [vmem:[#allocation27_spill] sm:$0xff] }
 0x666   : > { %v10435_v14 = vadd.f32 %v7793_v43, %v5777_v13  ;;  %v10884_v43 = vld [vmem:[#allocation32_spill] sm:$0xff] }
 0x667   : > { %v5778_v6 = vrot.slane %v7797_v11, 1  ;;  %v5100_v20 = vpop.f32.mrb[132].mxu1  ;;  %v10887_v11 = vld [vmem:[#allocation35_spill] sm:$0xff] }
 0x668   : > { %v7798_v57 = vadd.f32 %v5100_v20, %v10876_v53  ;;  %v5102_v42 = vpop.f32.mrb[133].mxu1  ;;  %7334 = vmatmul.mubr.f32.gmra.mrb[94].mxu1 %v10324_v49 }
 0x669   : > { %v5779_v23 = vsel %vm2878_vm2, %v5776_v62, %v5778_v6  ;;  %v7799_v39 = vadd.f32 %v5102_v42, %v10877_v54  ;;  %v10889_v54 = vld [vmem:[#allocation37_spill] sm:$0xff] }
 0x66a   : > { %v10441_v3 = vadd.f32 %v7795_v25, %v5779_v23 }
 0x66b   : > { %v5106_v40 = vpop.f32.mrb[134].mxu1  ;;  %v5780_v50 = vrot.slane %v7799_v39, 1 }
 0x66c   : > { %v7800_v16 = vadd.f32 %v5106_v40, %v10878_v17  ;;  %v5108_v10 = vpop.f32.mrb[135].mxu1 }
 0x66d   : > { %v7801_v32 = vadd.f32 %v5108_v10, %v10879_v9 }
 0x66f   : > { %v5781_v12 = vrot.slane %v7801_v32, 1  ;;  %v5112_v52 = vpop.f32.mrb[136].mxu1  ;;  %v10890_v32 = vld [vmem:[#allocation38_spill] sm:$0xff] }
 0x670   : > { %v5113_v29 = vpop.f32.mrb[137].mxu1 }
 0x671   : > { %v5782_v15 = vsel %vm2878_vm2, %v5780_v50, %v5781_v12  ;;  %v7802_v49 = vadd.f32 %v5113_v29, %v10880_v24 }
 0x672   : > { %v10447_v36 = vadd.f32 %v7798_v57, %v5782_v15  ;;  %v10888_v57 = vld [vmem:[#allocation36_spill] sm:$0xff]  ;;  %v10891_v15 = vld [vmem:[#allocation39_spill] sm:$0xff] }
 0x673   : > { %v5783_v0 = vrot.slane %v7802_v49, 1  ;;  %v5117_v48 = vpop.f32.mrb[138].mxu1 }
 0x674   : > { %v7803_v26 = vadd.f32 %v5117_v48, %v10881_v19  ;;  %v5119_v2 = vpop.f32.mrb[139].mxu1  ;;  %v10892_v48 = vld [vmem:[#allocation40_spill] sm:$0xff] }
 0x675   : > { %v5784_v38 = vsel %vm2878_vm2, %v5781_v12, %v5783_v0  ;;  %v7804_v30 = vadd.f32 %v5119_v2, %v10882_v7 }
 0x676   : > { %v10452_v8 = vadd.f32 %v7800_v16, %v5784_v38  ;;  %v10893_v38 = vld [vmem:[#allocation41_spill] sm:$0xff] }
 0x677   : > { %v5123_v1 = vpop.f32.mrb[140].mxu1  ;;  %v5785_v58 = vrot.slane %v7804_v30, 1 }
 0x678   : > { %v7805_v51 = vadd.f32 %v5123_v1, %v10883_v37  ;;  %v5125_v56 = vpop.f32.mrb[141].mxu1  ;;  %v10894_v1 = vld [vmem:[#allocation42_spill] sm:$0xff] }
 0x679   : > { %v7806_v44 = vadd.f32 %v5125_v56, %v10884_v43 }
 0x67b   : > { %v5786_v28 = vrot.slane %v7806_v44, 1  ;;  %v5129_v35 = vpop.f32.mrb[142].mxu1 }
 0x67c   : > { %v5130_v25 = vpop.f32.mrb[143].mxu1 }
 0x67d   : > { %v5787_v47 = vsel %vm2878_vm2, %v5785_v58, %v5786_v28  ;;  %v7807_v31 = vadd.f32 %v5130_v25, %v10885_v59 }
 0x67e   : > { %v10458_v55 = vadd.f32 %v7803_v26, %v5787_v47 }
 0x67f   : > { %v5788_v60 = vrot.slane %v7807_v31, 1  ;;  %v5134_v62 = vpop.f32.mrb[144].mxu1  ;;  %v10896_v31 = vld [vmem:[#allocation44_spill] sm:$0xff] }
 0x680   : > { %v7808_v22 = vadd.f32 %v5134_v62, %v10886_v21  ;;  %v5136_v13 = vpop.f32.mrb[145].mxu1 }
 0x681   : > { %v5789_v27 = vsel %vm2878_vm2, %v5786_v28, %v5788_v60  ;;  %v7809_v6 = vadd.f32 %v5136_v13, %v10887_v11  ;;  %v10895_v28 = vld [vmem:[#allocation43_spill] sm:$0xff] }
 0x682   : > { %v10463_v20 = vadd.f32 %v7805_v51, %v5789_v27 }
 0x683   : > { %v5140_v53 = vpop.f32.mrb[146].mxu1  ;;  %v5790_v40 = vrot.slane %v7809_v6, 1  ;;  %v10898_v6 = vld [vmem:[#allocation46_spill] sm:$0xff] }
 0x684   : > { %v7810_v42 = vadd.f32 %v5140_v53, %v10888_v57  ;;  %v5142_v23 = vpop.f32.mrb[147].mxu1 }
 0x685   : > { %v7811_v39 = vadd.f32 %v5142_v23, %v10889_v54 }
 0x687   : > { %v5791_v17 = vrot.slane %v7811_v39, 1  ;;  %v5146_v16 = vpop.f32.mrb[148].mxu1 }
 0x688   : > { %v5147_v10 = vpop.f32.mrb[149].mxu1 }
 0x689   : > { %v5792_v9 = vsel %vm2878_vm2, %v5790_v40, %v5791_v17  ;;  %v7812_v50 = vadd.f32 %v5147_v10, %v10890_v32  ;;  %v10900_v10 = vld [vmem:[#allocation48_spill] sm:$0xff] }
 0x68a   : > { %v10469_v12 = vadd.f32 %v7808_v22, %v5792_v9  ;;  %v10897_v22 = vld [vmem:[#allocation45_spill] sm:$0xff] }
 0x68b   : > { %v5793_v52 = vrot.slane %v7812_v50, 1  ;;  %v5151_v29 = vpop.f32.mrb[150].mxu1 }
 0x68c   : > { %v7813_v24 = vadd.f32 %v5151_v29, %v10891_v15  ;;  %v5153_v49 = vpop.f32.mrb[151].mxu1  ;;  %v10901_v29 = vld [vmem:[#allocation49_spill] sm:$0xff] }
 0x68d   : > { %v5794_v0 = vsel %vm2878_vm2, %v5791_v17, %v5793_v52  ;;  %v7814_v19 = vadd.f32 %v5153_v49, %v10892_v48 }
 0x68e   : > { %v10474_v26 = vadd.f32 %v7810_v42, %v5794_v0  ;;  %v10899_v42 = vld [vmem:[#allocation47_spill] sm:$0xff]  ;;  %v10902_v0 = vld [vmem:[#allocation50_spill] sm:$0xff] }
 0x68f   : > { %v5157_v2 = vpop.f32.mrb[152].mxu1  ;;  %v5795_v51 = vrot.slane %v7814_v19, 1 }
 0x690   : > { %v7815_v7 = vadd.f32 %v5157_v2, %v10893_v38  ;;  %v5159_v30 = vpop.f32.mrb[153].mxu1  ;;  %v10903_v38 = vld [vmem:[#allocation51_spill] sm:$0xff] }
 0x691   : > { %v7816_v37 = vadd.f32 %v5159_v30, %v10894_v1  ;;  %v10904_v1 = vld [vmem:[#allocation52_spill] sm:$0xff] }
 0x693   : > { %v5796_v56 = vrot.slane %v7816_v37, 1  ;;  %v5163_v43 = vpop.f32.mrb[154].mxu1 }
 0x694   : > { %v5164_v44 = vpop.f32.mrb[155].mxu1 }
 0x695   : > { %v5797_v58 = vsel %vm2878_vm2, %v5795_v51, %v5796_v56  ;;  %v7817_v35 = vadd.f32 %v5164_v44, %v10895_v28  ;;  %v10905_v28 = vld [vmem:[#allocation53_spill] sm:$0xff] }
 0x696   : > { %v10480_v25 = vadd.f32 %v7813_v24, %v5797_v58 }
 0x697   : > { %v5798_v47 = vrot.slane %v7817_v35, 1  ;;  %v5168_v59 = vpop.f32.mrb[156].mxu1 }
 0x698   : > { %v7818_v60 = vadd.f32 %v5168_v59, %v10896_v31  ;;  %v5170_v62 = vpop.f32.mrb[157].mxu1 }
 0x699   : > { %v5799_v21 = vsel %vm2878_vm2, %v5796_v56, %v5798_v47  ;;  %v7819_v13 = vadd.f32 %v5170_v62, %v10897_v22 }
 0x69a   : > { %v10485_v27 = vadd.f32 %v7815_v7, %v5799_v21 }
 0x69b   : > { %v5174_v11 = vpop.f32.mrb[158].mxu1  ;;  %v5800_v54 = vrot.slane %v7819_v13, 1  ;;  %v10907_v13 = vld [vmem:[#allocation55_spill] sm:$0xff] }
 0x69c   : > { %v7820_v53 = vadd.f32 %v5174_v11, %v10898_v6  ;;  %v5176_v57 = vpop.f32.mrb[159].mxu1 }
 0x69d   : > { %v7821_v23 = vadd.f32 %v5176_v57, %v10899_v42  ;;  %v10908_v57 = vld [vmem:[#allocation56_spill] sm:$0xff] }
 0x69f   : > { %v5801_v39 = vrot.slane %v7821_v23, 1  ;;  %v5180_v40 = vpop.f32.mrb[160].mxu1 }
 0x6a0   : > { %v5181_v17 = vpop.f32.mrb[161].mxu1 }
 0x6a1   : > { %v5802_v16 = vsel %vm2878_vm2, %v5800_v54, %v5801_v39  ;;  %v7822_v9 = vadd.f32 %v5181_v17, %v10900_v10  ;;  %v10909_v54 = vld [vmem:[#allocation57_spill] sm:$0xff] }
 0x6a2   : > { %v10491_v32 = vadd.f32 %v7818_v60, %v5802_v16  ;;  %v10906_v60 = vld [vmem:[#allocation54_spill] sm:$0xff] }
 0x6a3   : > { %v5803_v50 = vrot.slane %v7822_v9, 1  ;;  %v5185_v52 = vpop.f32.mrb[162].mxu1 }
 0x6a4   : > { %v7823_v15 = vadd.f32 %v5185_v52, %v10901_v29  ;;  %v5187_v24 = vpop.f32.mrb[163].mxu1 }
 0x6a5   : > { %v5804_v49 = vsel %vm2878_vm2, %v5801_v39, %v5803_v50  ;;  %v7824_v48 = vadd.f32 %v5187_v24, %v10902_v0  ;;  %v10910_v50 = vld [vmem:[#allocation58_spill] sm:$0xff] }
 0x6a6   : > { %v10496_v19 = vadd.f32 %v7820_v53, %v5804_v49  ;;  %v10911_v49 = vld [vmem:[#allocation59_spill] sm:$0xff] }
 0x6a7   : > { %v5191_v2 = vpop.f32.mrb[164].mxu1  ;;  %v5805_v51 = vrot.slane %v7824_v48, 1 }
 0x6a8   : > { %v7825_v7 = vadd.f32 %v5191_v2, %v10903_v38  ;;  %v5193_v30 = vpop.f32.mrb[165].mxu1  ;;  %v10912_v38 = vld [vmem:[#allocation60_spill] sm:$0xff] }
 0x6a9   : > { %v7826_v37 = vadd.f32 %v5193_v30, %v10904_v1 }
 0x6ab   : > { %v5806_v56 = vrot.slane %v7826_v37, 1  ;;  %v5197_v43 = vpop.f32.mrb[166].mxu1  ;;  %v10913_v37 = vld [vmem:[#allocation61_spill] sm:$0xff] }
 0x6ac   : > { %v5198_v44 = vpop.f32.mrb[167].mxu1  ;;  %v10914_v43 = vld [vmem:[#allocation62_spill] sm:$0xff] }
 0x6ad   : > { %v5807_v58 = vsel %vm2878_vm2, %v5805_v51, %v5806_v56  ;;  %v7827_v35 = vadd.f32 %v5198_v44, %v10905_v28 }
 0x6ae   : > { %v10502_v47 = vadd.f32 %v7823_v15, %v5807_v58 }
 0x6af   : > { %v5808_v59 = vrot.slane %v7827_v35, 1  ;;  %v5202_v31 = vpop.f32.mrb[168].mxu1 }
 0x6b0   : > { %v7828_v62 = vadd.f32 %v5202_v31, %v10906_v60  ;;  %v5204_v21 = vpop.f32.mrb[169].mxu1  ;;  %v10915_v60 = vld [vmem:[#allocation63_spill] sm:$0xff] }
 0x6b1   : > { %v5809_v22 = vsel %vm2878_vm2, %v5806_v56, %v5808_v59  ;;  %v7829_v11 = vadd.f32 %v5204_v21, %v10907_v13 }
 0x6b2   : > { %v10507_v6 = vadd.f32 %v7825_v7, %v5809_v22 }
 0x6b3   : > { %v5208_v53 = vpop.f32.mrb[170].mxu1  ;;  %v5810_v40 = vrot.slane %v7829_v11, 1  ;;  %v10916_v11 = vld [vmem:[#allocation64_spill] sm:$0xff] }
 0x6b4   : > { %v7830_v42 = vadd.f32 %v5208_v53, %v10908_v57  ;;  %v5210_v23 = vpop.f32.mrb[171].mxu1 }
 0x6b5   : > { %v7831_v39 = vadd.f32 %v5210_v23, %v10909_v54  ;;  %v10917_v23 = vld [vmem:[#allocation65_spill] sm:$0xff] }
 0x6b7   : > { %v5811_v17 = vrot.slane %v7831_v39, 1  ;;  %v5214_v16 = vpop.f32.mrb[172].mxu1 }
 0x6b8   : > { %v5215_v10 = vpop.f32.mrb[173].mxu1 }
 0x6b9   : > { %v5812_v9 = vsel %vm2878_vm2, %v5810_v40, %v5811_v17  ;;  %v7832_v52 = vadd.f32 %v5215_v10, %v10910_v50 }
 0x6ba   : > { %v10513_v29 = vadd.f32 %v7828_v62, %v5812_v9  ;;  %v10919_v9 = vld [vmem:[#allocation67_spill] sm:$0xff] }
 0x6bb   : > { %v5813_v15 = vrot.slane %v7832_v52, 1  ;;  %v5219_v24 = vpop.f32.mrb[174].mxu1 }
 0x6bc   : > { %v7833_v0 = vadd.f32 %v5219_v24, %v10911_v49  ;;  %v5221_v48 = vpop.f32.mrb[175].mxu1 }
 0x6bd   : > { %v5814_v2 = vsel %vm2878_vm2, %v5811_v17, %v5813_v15  ;;  %v7834_v7 = vadd.f32 %v5221_v48, %v10912_v38  ;;  %v10918_v17 = vld [vmem:[#allocation66_spill] sm:$0xff]  ;;  %v10920_v48 = vld [vmem:[#allocation68_spill] sm:$0xff] }
 0x6be   : > { %v10518_v30 = vadd.f32 %v7830_v42, %v5814_v2 }
 0x6bf   : > { %v5225_v1 = vpop.f32.mrb[176].mxu1  ;;  %v5815_v58 = vrot.slane %v7834_v7, 1 }
 0x6c0   : > { %v7835_v51 = vadd.f32 %v5225_v1, %v10913_v37  ;;  %v5227_v56 = vpop.f32.mrb[177].mxu1  ;;  %v10921_v37 = vld [vmem:[#allocation69_spill] sm:$0xff] }
 0x6c1   : > { %v7836_v44 = vadd.f32 %v5227_v56, %v10914_v43 }
 0x6c3   : > { %v5816_v28 = vrot.slane %v7836_v44, 1  ;;  %v5231_v35 = vpop.f32.mrb[178].mxu1  ;;  %v10922_v44 = vld [vmem:[#allocation70_spill] sm:$0xff] }
 0x6c4   : > { %v5232_v59 = vpop.f32.mrb[179].mxu1 }
 0x6c5   : > { %v5817_v31 = vsel %vm2878_vm2, %v5815_v58, %v5816_v28  ;;  %v7837_v62 = vadd.f32 %v5232_v59, %v10915_v60  ;;  %v10923_v59 = vld [vmem:[#allocation71_spill] sm:$0xff] }
 0x6c6   : > { %v10524_v21 = vadd.f32 %v7833_v0, %v5817_v31 }
 0x6c7   : > { %v5818_v22 = vrot.slane %v7837_v62, 1  ;;  %v5236_v13 = vpop.f32.mrb[180].mxu1  ;;  %v10924_v62 = vld [vmem:[#allocation72_spill] sm:$0xff] }
 0x6c8   : > { %v7838_v53 = vadd.f32 %v5236_v13, %v10916_v11  ;;  %v5238_v57 = vpop.f32.mrb[181].mxu1 }
 0x6c9   : > { %v5819_v42 = vsel %vm2878_vm2, %v5816_v28, %v5818_v22  ;;  %v7839_v54 = vadd.f32 %v5238_v57, %v10917_v23  ;;  %v10925_v23 = vld [vmem:[#allocation73_spill] sm:$0xff] }
 0x6ca   : > { %v10529_v39 = vadd.f32 %v7835_v51, %v5819_v42 }
 0x6cb   : > { %v5242_v40 = vpop.f32.mrb[182].mxu1  ;;  %v5820_v52 = vrot.slane %v7839_v54, 1 }
 0x6cc   : > { %v7840_v16 = vadd.f32 %v5242_v40, %v10918_v17  ;;  %v5244_v10 = vpop.f32.mrb[183].mxu1 }
 0x6cd   : > { %v7841_v50 = vadd.f32 %v5244_v10, %v10919_v9 }
 0x6cf   : > { %v5821_v15 = vrot.slane %v7841_v50, 1  ;;  %v5248_v24 = vpop.f32.mrb[184].mxu1 }
 0x6d0   : > { %v5249_v49 = vpop.f32.mrb[185].mxu1 }
 0x6d1   : > { %v5822_v0 = vsel %vm2878_vm2, %v5820_v52, %v5821_v15  ;;  %v7842_v2 = vadd.f32 %v5249_v49, %v10920_v48  ;;  %v10555_v49 = vld [vmem:[%s10761_s5] ss:$0 sm:$0xff] }
 0x6d2   : > { %v10535_v38 = vadd.f32 %v7838_v53, %v5822_v0 }
 0x6d3   : > { %v5823_v7 = vrot.slane %v7842_v2, 1  ;;  %v5253_v1 = vpop.f32.mrb[186].mxu1 }
 0x6d4   : > { %v7843_v51 = vadd.f32 %v5253_v1, %v10921_v37  ;;  %v5255_v56 = vpop.f32.mrb[187].mxu1 }
 0x6d5   : > { %v5824_v43 = vsel %vm2878_vm2, %v5821_v15, %v5823_v7  ;;  %v7844_v58 = vadd.f32 %v5255_v56, %v10922_v44  ;;  %v10561_v7 = vld [vmem:[%s10762_s6] ss:$0 sm:$0xff] }
 0x6d6   : > { %v10540_v28 = vadd.f32 %v7840_v16, %v5824_v43 }
 0x6d7   : > { %v5259_v35 = vpop.f32.mrb[188].mxu1  ;;  %v5825_v13 = vrot.slane %v7844_v58, 1 }
 0x6d8   : > { %v7845_v31 = vadd.f32 %v5259_v35, %v10923_v59  ;;  %v5261_v60 = vpop.f32.mrb[189].mxu1 }
 0x6d9   : > { %v7846_v22 = vadd.f32 %v5261_v60, %v10924_v62 }
 0x6db   : > { %v5826_v11 = vrot.slane %v7846_v22, 1  ;;  %v5265_v53 = vpop.f32.mrb[190].mxu1 }
 0x6dc   : > { %v5266_v57 = vpop.f32.mrb[191].mxu1 }
 0x6dd   : > { %v5827_v42 = vsel %vm2878_vm2, %v5825_v13, %v5826_v11  ;;  %v7847_v54 = vadd.f32 %v5266_v57, %v10925_v23 }
 0x6de   : > { %v10546_v40 = vadd.f32 %v7843_v51, %v5827_v42 }
 0x6df   : > { %v5828_v17 = vrot.slane %v7847_v54, 1  ;;  %v7266_v10 = vpop.f32.mrb[48].mxu1 }
 0x6e0   : > { %v5943_v16 = vrot.slane %v7266_v10, 2  ;;  %v5335_v9 = vpop.f32.mrb[49].mxu1 }
 0x6e1   : > { %v5829_v50 = vsel %vm2878_vm2, %v5826_v11, %v5828_v17  ;;  %v5942_v52 = vrot.slane %v5335_v9, 2 }
 0x6e2   : > { %v10549_v15 = vadd.f32 %v7845_v31, %v5829_v50 }
 0x6e3   : > { %v5944_v24 = vsel %vm3071_vm1, %v5942_v52, %v5943_v16  ;;  %v7269_v0 = vpop.f32.mrb[50].mxu1 }
 0x6e4   : > { %v6054_v48 = vadd.f32 %v5944_v24, %v10350_v5  ;;  %v5345_v2 = vpop.f32.mrb[51].mxu1  ;;  %v5947_v5 = vrot.slane %v7269_v0, 2 }
 0x6e5   : > { %v5945_v1 = vrot.slane %v5345_v2, 2 }
 0x6e6   : > { %v6093_v37 = vmul.f32 %v10555_v49, %v6054_v48 }
 0x6e7   : > { %v5946_v51 = vsel %vm3071_vm1, %v5943_v16, %v5945_v1  ;;  %v7272_v56 = vpop.f32.mrb[52].mxu1 }
 0x6e8   : > { %v6132_v43 = vadd.f32 %v10561_v7, %v6093_v37  ;;  %v6055_v44 = vadd.f32 %v5946_v51, %v10357_v33  ;;  %v5950_v58 = vrot.slane %v7272_v56, 2  ;;  %v5355_v35 = vpop.f32.mrb[53].mxu1 }
 0x6e9   : > { %v5948_v59 = vrot.slane %v5355_v35, 2 }
 0x6ea   : > { %v6164_v31 = vmax.f32 %v6132_v43, 0.0  ;;  %v6094_v60 = vmul.f32 %v10555_v49, %v6055_v44 }
 0x6eb   : > { %v5949_v62 = vsel %vm3071_vm1, %v5947_v5, %v5948_v59  ;;  %v5951_v22 = vsel %vm3071_vm1, %v5948_v59, %v5950_v58  ;;  %v7275_v13 = vpop.f32.mrb[54].mxu1 }
 0x6ec   : > { %6197 = vst.msk [vmem:[%s8593_s17] sm:$0xff] %vm6196_vm3, %v6164_v31  ;;  %v6133_v11 = vadd.f32 %v10561_v7, %v6094_v60  ;;  %v6056_v33 = vadd.f32 %v5949_v62, %v10367_v61  ;;  %v6057_v53 = vadd.f32 %v5951_v22, %v10374_v18  ;;  %v5953_v57 = vrot.slane %v7275_v13, 2  ;;  %v5365_v42 = vpop.f32.mrb[55].mxu1 }
 0x6ed   : > { %v5952_v23 = vrot.slane %v5365_v42, 2 }
 0x6ee   : > { %v6165_v54 = vmax.f32 %v6133_v11, 0.0  ;;  %v6095_v17 = vmul.f32 %v10555_v49, %v6056_v33  ;;  %v6096_v10 = vmul.f32 %v10555_v49, %v6057_v53 }
 0x6ef   : > { %v5954_v16 = vsel %vm3071_vm1, %v5952_v23, %v5953_v57  ;;  %v7278_v9 = vpop.f32.mrb[56].mxu1 }
 0x6f0   : > { %6198 = vst.msk [vmem:[%s8593_s17 + $0x8] sm:$0xff] %vm6196_vm3, %v6165_v54  ;;  %v6134_v50 = vadd.f32 %v10561_v7, %v6095_v17  ;;  %v6135_v61 = vadd.f32 %v10561_v7, %v6096_v10  ;;  %v6058_v18 = vadd.f32 %v5954_v16, %v10384_v46  ;;  %v5375_v52 = vpop.f32.mrb[57].mxu1  ;;  %v5957_v44 = vrot.slane %v7278_v9, 2 }
 0x6f1   : > { %v5955_v24 = vrot.slane %v5375_v52, 2 }
 0x6f2   : > { %v6166_v0 = vmax.f32 %v6134_v50, 0.0  ;;  %v6167_v48 = vmax.f32 %v6135_v61, 0.0  ;;  %v6097_v2 = vmul.f32 %v10555_v49, %v6058_v18 }
 0x6f3   : > { %v5956_v1 = vsel %vm3071_vm1, %v5953_v57, %v5955_v24  ;;  %v7281_v37 = vpop.f32.mrb[58].mxu1 }
 0x6f4   : > { %6199 = vst.msk [vmem:[%s8593_s17 + $0x10] sm:$0xff] %vm6196_vm3, %v6166_v0  ;;  %6200 = vst.msk [vmem:[%s8593_s17 + $0x18] sm:$0xff] %vm6196_vm3, %v6167_v48  ;;  %v6136_v51 = vadd.f32 %v10561_v7, %v6097_v2  ;;  %v6059_v56 = vadd.f32 %v5956_v1, %v10391_v34  ;;  %v5960_v43 = vrot.slane %v7281_v37, 2  ;;  %v5385_v46 = vpop.f32.mrb[59].mxu1 }
 0x6f5   : > { %v5958_v58 = vrot.slane %v5385_v46, 2 }
 0x6f6   : > { %v6168_v35 = vmax.f32 %v6136_v51, 0.0  ;;  %v6098_v5 = vmul.f32 %v10555_v49, %v6059_v56 }
 0x6f7   : > { %v5959_v59 = vsel %vm3071_vm1, %v5957_v44, %v5958_v58  ;;  %v5961_v31 = vsel %vm3071_vm1, %v5958_v58, %v5960_v43  ;;  %v7284_v60 = vpop.f32.mrb[60].mxu1 }
 0x6f8   : > { %6201 = vst.msk [vmem:[%s8593_s17 + $0x20] sm:$0xff] %vm6196_vm3, %v6168_v35  ;;  %v6137_v62 = vadd.f32 %v10561_v7, %v6098_v5  ;;  %v6060_v22 = vadd.f32 %v5959_v59, %v10401_v4  ;;  %v6061_v34 = vadd.f32 %v5961_v31, %v10408_v41  ;;  %v5963_v13 = vrot.slane %v7284_v60, 2  ;;  %v5395_v11 = vpop.f32.mrb[61].mxu1 }
 0x6f9   : > { %v5962_v33 = vrot.slane %v5395_v11, 2 }
 0x6fa   : > { %v6169_v53 = vmax.f32 %v6137_v62, 0.0  ;;  %v6099_v57 = vmul.f32 %v10555_v49, %v6060_v22  ;;  %v6100_v42 = vmul.f32 %v10555_v49, %v6061_v34 }
 0x6fb   : > { %v5964_v23 = vsel %vm3071_vm1, %v5962_v33, %v5963_v13  ;;  %v7287_v54 = vpop.f32.mrb[62].mxu1 }
 0x6fc   : > { %6202 = vst.msk [vmem:[%s8593_s17 + $0x28] sm:$0xff] %vm6196_vm3, %v6169_v53  ;;  %v6138_v17 = vadd.f32 %v10561_v7, %v6099_v57  ;;  %v6139_v4 = vadd.f32 %v10561_v7, %v6100_v42  ;;  %v6062_v41 = vadd.f32 %v5964_v23, %v10418_v45  ;;  %v5405_v10 = vpop.f32.mrb[63].mxu1  ;;  %v5967_v2 = vrot.slane %v7287_v54, 2 }
 0x6fd   : > { %v5965_v16 = vrot.slane %v5405_v10, 2 }
 0x6fe   : > { %v6170_v9 = vmax.f32 %v6138_v17, 0.0  ;;  %v6171_v50 = vmax.f32 %v6139_v4, 0.0  ;;  %v6101_v61 = vmul.f32 %v10555_v49, %v6062_v41 }
 0x6ff   : > { %v5966_v18 = vsel %vm3071_vm1, %v5963_v13, %v5965_v16  ;;  %v7290_v52 = vpop.f32.mrb[64].mxu1 }
 0x700   : > { %6203 = vst.msk [vmem:[%s8593_s17 + $0x30] sm:$0xff] %vm6196_vm3, %v6170_v9  ;;  %6204 = vst.msk [vmem:[%s8593_s17 + $0x38] sm:$0xff] %vm6196_vm3, %v6171_v50  ;;  %v6140_v24 = vadd.f32 %v10561_v7, %v6101_v61  ;;  %v6063_v0 = vadd.f32 %v5966_v18, %v10425_v63  ;;  %v5970_v48 = vrot.slane %v7290_v52, 2  ;;  %v5415_v45 = vpop.f32.mrb[65].mxu1 }
 0x701   : > { %v5968_v1 = vrot.slane %v5415_v45, 2 }
 0x702   : > { %v6172_v37 = vmax.f32 %v6140_v24, 0.0  ;;  %v6102_v51 = vmul.f32 %v10555_v49, %v6063_v0 }
 0x703   : > { %v5969_v56 = vsel %vm3071_vm1, %v5967_v2, %v5968_v1  ;;  %v5971_v43 = vsel %vm3071_vm1, %v5968_v1, %v5970_v48  ;;  %v7293_v46 = vpop.f32.mrb[66].mxu1 }
 0x704   : > { %6205 = vst.msk [vmem:[%s8593_s17 + $0x40] sm:$0xff] %vm6196_vm3, %v6172_v37  ;;  %v6141_v44 = vadd.f32 %v10561_v7, %v6102_v51  ;;  %v6064_v58 = vadd.f32 %v5969_v56, %v10435_v14  ;;  %v6065_v63 = vadd.f32 %v5971_v43, %v10441_v3  ;;  %v5973_v35 = vrot.slane %v7293_v46, 2  ;;  %v5425_v5 = vpop.f32.mrb[67].mxu1 }
 0x705   : > { %v5972_v59 = vrot.slane %v5425_v5, 2 }
 0x706   : > { %v6173_v31 = vmax.f32 %v6141_v44, 0.0  ;;  %v6103_v60 = vmul.f32 %v10555_v49, %v6064_v58  ;;  %v6104_v62 = vmul.f32 %v10555_v49, %v6065_v63 }
 0x707   : > { %v5974_v22 = vsel %vm3071_vm1, %v5972_v59, %v5973_v35  ;;  %v7296_v34 = vpop.f32.mrb[68].mxu1 }
 0x708   : > { %6206 = vst.msk [vmem:[%s8593_s17 + $0x48] sm:$0xff] %vm6196_vm3, %v6173_v31  ;;  %v6142_v13 = vadd.f32 %v10561_v7, %v6103_v60  ;;  %v6143_v14 = vadd.f32 %v10561_v7, %v6104_v62  ;;  %v6066_v3 = vadd.f32 %v5974_v22, %v10447_v36  ;;  %v5435_v11 = vpop.f32.mrb[69].mxu1  ;;  %v5977_v10 = vrot.slane %v7296_v34, 2 }
 0x709   : > { %v5975_v33 = vrot.slane %v5435_v11, 2 }
 0x70a   : > { %v6174_v53 = vmax.f32 %v6142_v13, 0.0  ;;  %v6175_v57 = vmax.f32 %v6143_v14, 0.0  ;;  %v6105_v42 = vmul.f32 %v10555_v49, %v6066_v3 }
 0x70b   : > { %v5976_v23 = vsel %vm3071_vm1, %v5973_v35, %v5975_v33  ;;  %v7299_v54 = vpop.f32.mrb[70].mxu1 }
 0x70c   : > { %6207 = vst.msk [vmem:[%s8593_s17 + $0x50] sm:$0xff] %vm6196_vm3, %v6174_v53  ;;  %6208 = vst.msk [vmem:[%s8593_s17 + $0x58] sm:$0xff] %vm6196_vm3, %v6175_v57  ;;  %v6144_v17 = vadd.f32 %v10561_v7, %v6105_v42  ;;  %v6067_v4 = vadd.f32 %v5976_v23, %v10452_v8  ;;  %v5980_v41 = vrot.slane %v7299_v54, 2  ;;  %v5445_v36 = vpop.f32.mrb[71].mxu1 }
 0x70d   : > { %v5978_v16 = vrot.slane %v5445_v36, 2 }
 0x70e   : > { %v6176_v9 = vmax.f32 %v6144_v17, 0.0  ;;  %v6106_v50 = vmul.f32 %v10555_v49, %v6067_v4 }
 0x70f   : > { %v5979_v61 = vsel %vm3071_vm1, %v5977_v10, %v5978_v16  ;;  %v5981_v18 = vsel %vm3071_vm1, %v5978_v16, %v5980_v41  ;;  %v7302_v52 = vpop.f32.mrb[72].mxu1 }
 0x710   : > { %6209 = vst.msk [vmem:[%s8593_s17 + $0x60] sm:$0xff] %vm6196_vm3, %v6176_v9  ;;  %v6145_v24 = vadd.f32 %v10561_v7, %v6106_v50  ;;  %v6068_v0 = vadd.f32 %v5979_v61, %v10458_v55  ;;  %v6069_v8 = vadd.f32 %v5981_v18, %v10463_v20  ;;  %v5983_v48 = vrot.slane %v7302_v52, 2  ;;  %v5455_v45 = vpop.f32.mrb[73].mxu1 }
 0x711   : > { %v5982_v2 = vrot.slane %v5455_v45, 2 }
 0x712   : > { %v6177_v1 = vmax.f32 %v6145_v24, 0.0  ;;  %v6107_v37 = vmul.f32 %v10555_v49, %v6068_v0  ;;  %v6108_v51 = vmul.f32 %v10555_v49, %v6069_v8 }
 0x713   : > { %v5984_v56 = vsel %vm3071_vm1, %v5982_v2, %v5983_v48  ;;  %v7305_v43 = vpop.f32.mrb[74].mxu1 }
 0x714   : > { %6210 = vst.msk [vmem:[%s8593_s17 + $0x68] sm:$0xff] %vm6196_vm3, %v6177_v1  ;;  %v6146_v46 = vadd.f32 %v10561_v7, %v6107_v37  ;;  %v6147_v55 = vadd.f32 %v10561_v7, %v6108_v51  ;;  %v6070_v20 = vadd.f32 %v5984_v56, %v10469_v12  ;;  %v5465_v44 = vpop.f32.mrb[75].mxu1  ;;  %v5987_v34 = vrot.slane %v7305_v43, 2 }
 0x715   : > { %v5985_v58 = vrot.slane %v5465_v44, 2 }
 0x716   : > { %v6178_v63 = vmax.f32 %v6146_v46, 0.0  ;;  %v6179_v35 = vmax.f32 %v6147_v55, 0.0  ;;  %v6109_v5 = vmul.f32 %v10555_v49, %v6070_v20 }
 0x717   : > { %v5986_v59 = vsel %vm3071_vm1, %v5983_v48, %v5985_v58  ;;  %v7308_v31 = vpop.f32.mrb[76].mxu1 }
 0x718   : > { %6211 = vst.msk [vmem:[%s8593_s17 + $0x70] sm:$0xff] %vm6196_vm3, %v6178_v63  ;;  %6212 = vst.msk [vmem:[%s8593_s17 + $0x78] sm:$0xff] %vm6196_vm3, %v6179_v35  ;;  %v6148_v60 = vadd.f32 %v10561_v7, %v6109_v5  ;;  %v6071_v62 = vadd.f32 %v5986_v59, %v10474_v26  ;;  %v5990_v22 = vrot.slane %v7308_v31, 2  ;;  %v5475_v12 = vpop.f32.mrb[77].mxu1 }
 0x719   : > { %v5988_v13 = vrot.slane %v5475_v12, 2 }
 0x71a   : > { %v6180_v14 = vmax.f32 %v6148_v60, 0.0  ;;  %v6110_v3 = vmul.f32 %v10555_v49, %v6071_v62 }
 0x71b   : > { %v5989_v11 = vsel %vm3071_vm1, %v5987_v34, %v5988_v13  ;;  %v5991_v33 = vsel %vm3071_vm1, %v5988_v13, %v5990_v22  ;;  %v7311_v53 = vpop.f32.mrb[78].mxu1 }
 0x71c   : > { %6213 = vst.msk [vmem:[%s8593_s17 + $0x80] sm:$0xff] %vm6196_vm3, %v6180_v14  ;;  %v6149_v57 = vadd.f32 %v10561_v7, %v6110_v3  ;;  %v6072_v42 = vadd.f32 %v5989_v11, %v10480_v25  ;;  %v6073_v26 = vadd.f32 %v5991_v33, %v10485_v27  ;;  %v5993_v23 = vrot.slane %v7311_v53, 2  ;;  %v5485_v54 = vpop.f32.mrb[79].mxu1 }
 0x71d   : > { %v5992_v17 = vrot.slane %v5485_v54, 2 }
 0x71e   : > { %v6181_v4 = vmax.f32 %v6149_v57, 0.0  ;;  %v6111_v41 = vmul.f32 %v10555_v49, %v6072_v42  ;;  %v6112_v36 = vmul.f32 %v10555_v49, %v6073_v26 }
 0x71f   : > { %v5994_v10 = vsel %vm3071_vm1, %v5992_v17, %v5993_v23  ;;  %v7314_v16 = vpop.f32.mrb[80].mxu1 }
 0x720   : > { %6214 = vst.msk [vmem:[%s8593_s17 + $0x88] sm:$0xff] %vm6196_vm3, %v6181_v4  ;;  %v6150_v9 = vadd.f32 %v10561_v7, %v6111_v41  ;;  %v6151_v25 = vadd.f32 %v10561_v7, %v6112_v36  ;;  %v6074_v27 = vadd.f32 %v5994_v10, %v10491_v32  ;;  %v5495_v50 = vpop.f32.mrb[81].mxu1  ;;  %v5997_v1 = vrot.slane %v7314_v16, 2 }
 0x721   : > { %v5995_v61 = vrot.slane %v5495_v50, 2 }
 0x722   : > { %v6182_v18 = vmax.f32 %v6150_v9, 0.0  ;;  %v6183_v52 = vmax.f32 %v6151_v25, 0.0  ;;  %v6113_v24 = vmul.f32 %v10555_v49, %v6074_v27 }
 0x723   : > { %v5996_v0 = vsel %vm3071_vm1, %v5993_v23, %v5995_v61  ;;  %v7317_v8 = vpop.f32.mrb[82].mxu1 }
 0x724   : > { %6215 = vst.msk [vmem:[%s8593_s17 + $0x90] sm:$0xff] %vm6196_vm3, %v6182_v18  ;;  %6216 = vst.msk [vmem:[%s8593_s17 + $0x98] sm:$0xff] %vm6196_vm3, %v6183_v52  ;;  %v6152_v48 = vadd.f32 %v10561_v7, %v6113_v24  ;;  %v6075_v45 = vadd.f32 %v5996_v0, %v10496_v19  ;;  %v6000_v2 = vrot.slane %v7317_v8, 2  ;;  %v5505_v32 = vpop.f32.mrb[83].mxu1 }
 0x725   : > { %v5998_v37 = vrot.slane %v5505_v32, 2 }
 0x726   : > { %v6184_v51 = vmax.f32 %v6152_v48, 0.0  ;;  %v6114_v56 = vmul.f32 %v10555_v49, %v6075_v45 }
 0x727   : > { %v5999_v43 = vsel %vm3071_vm1, %v5997_v1, %v5998_v37  ;;  %v6001_v46 = vsel %vm3071_vm1, %v5998_v37, %v6000_v2  ;;  %v7320_v55 = vpop.f32.mrb[84].mxu1 }
 0x728   : > { %6217 = vst.msk [vmem:[%s8593_s17 + $0xa0] sm:$0xff] %vm6196_vm3, %v6184_v51  ;;  %v6153_v20 = vadd.f32 %v10561_v7, %v6114_v56  ;;  %v6076_v44 = vadd.f32 %v5999_v43, %v10502_v47  ;;  %v6077_v19 = vadd.f32 %v6001_v46, %v10507_v6  ;;  %v6003_v58 = vrot.slane %v7320_v55, 2  ;;  %v5515_v63 = vpop.f32.mrb[85].mxu1 }
 0x729   : > { %v6002_v35 = vrot.slane %v5515_v63, 2 }
 0x72a   : > { %v6185_v5 = vmax.f32 %v6153_v20, 0.0  ;;  %v6115_v59 = vmul.f32 %v10555_v49, %v6076_v44  ;;  %v6116_v31 = vmul.f32 %v10555_v49, %v6077_v19 }
 0x72b   : > { %v6004_v60 = vsel %vm3071_vm1, %v6002_v35, %v6003_v58  ;;  %v7323_v62 = vpop.f32.mrb[86].mxu1 }
 0x72c   : > { %6218 = vst.msk [vmem:[%s8593_s17 + $0xa8] sm:$0xff] %vm6196_vm3, %v6185_v5  ;;  %v6154_v22 = vadd.f32 %v10561_v7, %v6115_v59  ;;  %v6155_v47 = vadd.f32 %v10561_v7, %v6116_v31  ;;  %v6078_v6 = vadd.f32 %v6004_v60, %v10513_v29  ;;  %v5525_v12 = vpop.f32.mrb[87].mxu1  ;;  %v6007_v26 = vrot.slane %v7323_v62, 2 }
 0x72d   : > { %v6005_v34 = vrot.slane %v5525_v12, 2 }
 0x72e   : > { %v6186_v13 = vmax.f32 %v6154_v22, 0.0  ;;  %v6187_v14 = vmax.f32 %v6155_v47, 0.0  ;;  %v6117_v3 = vmul.f32 %v10555_v49, %v6078_v6 }
 0x72f   : > { %v6006_v11 = vsel %vm3071_vm1, %v6003_v58, %v6005_v34  ;;  %v7326_v33 = vpop.f32.mrb[88].mxu1 }
 0x730   : > { %6219 = vst.msk [vmem:[%s8593_s17 + $0xb0] sm:$0xff] %vm6196_vm3, %v6186_v13  ;;  %6220 = vst.msk [vmem:[%s8593_s17 + $0xb8] sm:$0xff] %vm6196_vm3, %v6187_v14  ;;  %v6156_v53 = vadd.f32 %v10561_v7, %v6117_v3  ;;  %v6079_v57 = vadd.f32 %v6006_v11, %v10518_v30  ;;  %v6010_v42 = vrot.slane %v7326_v33, 2  ;;  %v5535_v29 = vpop.f32.mrb[89].mxu1 }
 0x731   : > { %v6008_v23 = vrot.slane %v5535_v29, 2 }
 0x732   : > { %v6188_v54 = vmax.f32 %v6156_v53, 0.0  ;;  %v6118_v17 = vmul.f32 %v10555_v49, %v6079_v57 }
 0x733   : > { %v6009_v4 = vsel %vm3071_vm1, %v6007_v26, %v6008_v23  ;;  %v6011_v41 = vsel %vm3071_vm1, %v6008_v23, %v6010_v42  ;;  %v7329_v36 = vpop.f32.mrb[90].mxu1 }
 0x734   : > { %6221 = vst.msk [vmem:[%s8593_s17 + $0xc0] sm:$0xff] %vm6196_vm3, %v6188_v54  ;;  %v6157_v10 = vadd.f32 %v10561_v7, %v6118_v17  ;;  %v6080_v16 = vadd.f32 %v6009_v4, %v10524_v21  ;;  %v6081_v30 = vadd.f32 %v6011_v41, %v10529_v39  ;;  %v6013_v9 = vrot.slane %v7329_v36, 2  ;;  %v5545_v25 = vpop.f32.mrb[91].mxu1 }
 0x735   : > { %v6012_v27 = vrot.slane %v5545_v25, 2 }
 0x736   : > { %v6189_v50 = vmax.f32 %v6157_v10, 0.0  ;;  %v6119_v61 = vmul.f32 %v10555_v49, %v6080_v16  ;;  %v6120_v18 = vmul.f32 %v10555_v49, %v6081_v30 }
 0x737   : > { %v6014_v52 = vsel %vm3071_vm1, %v6012_v27, %v6013_v9  ;;  %v7332_v24 = vpop.f32.mrb[92].mxu1 }
 0x738   : > { %6222 = vst.msk [vmem:[%s8593_s17 + $0xc8] sm:$0xff] %vm6196_vm3, %v6189_v50  ;;  %v6158_v0 = vadd.f32 %v10561_v7, %v6119_v61  ;;  %v6159_v21 = vadd.f32 %v10561_v7, %v6120_v18  ;;  %v6082_v39 = vadd.f32 %v6014_v52, %v10535_v38  ;;  %v5555_v8 = vpop.f32.mrb[93].mxu1  ;;  %v6017_v46 = vrot.slane %v7332_v24, 2 }
 0x739   : > { %v6015_v48 = vrot.slane %v5555_v8, 2 }
 0x73a   : > { %v6190_v45 = vmax.f32 %v6158_v0, 0.0  ;;  %v6191_v2 = vmax.f32 %v6159_v21, 0.0  ;;  %v6121_v32 = vmul.f32 %v10555_v49, %v6082_v39 }
 0x73b   : > { %v6016_v1 = vsel %vm3071_vm1, %v6013_v9, %v6015_v48  ;;  %v7335_v37 = vpop.f32.mrb[94].mxu1 }
 0x73c   : > { %6223 = vst.msk [vmem:[%s8593_s17 + $0xd0] sm:$0xff] %vm6196_vm3, %v6190_v45  ;;  %6224 = vst.msk [vmem:[%s8593_s17 + $0xd8] sm:$0xff] %vm6196_vm3, %v6191_v2  ;;  %v6160_v51 = vadd.f32 %v10561_v7, %v6121_v32  ;;  %v6083_v56 = vadd.f32 %v6016_v1, %v10540_v28  ;;  %v6020_v38 = vrot.slane %v7335_v37, 2  ;;  %v5565_v43 = vpop.f32.mrb[95].mxu1 }
 0x73d   : > { %v6018_v55 = vrot.slane %v5565_v43, 2 }
 0x73e   : > { %v6192_v20 = vmax.f32 %v6160_v51, 0.0  ;;  %v6122_v44 = vmul.f32 %v10555_v49, %v6083_v56 }
 0x73f   : > { %v6019_v19 = vsel %vm3071_vm1, %v6017_v46, %v6018_v55  ;;  %v6021_v58 = vsel %vm3071_vm1, %v6018_v55, %v6020_v38 }
 0x740   : > { %6225 = vst.msk [vmem:[%s8593_s17 + $0xe0] sm:$0xff] %vm6196_vm3, %v6192_v20  ;;  %v6161_v63 = vadd.f32 %v10561_v7, %v6122_v44  ;;  %v6084_v28 = vadd.f32 %v6019_v19, %v10546_v40  ;;  %v6085_v35 = vadd.f32 %v6021_v58, %v10549_v15 }
 0x742   : > { %v6193_v5 = vmax.f32 %v6161_v63, 0.0  ;;  %v6123_v59 = vmul.f32 %v10555_v49, %v6084_v28  ;;  %v6124_v31 = vmul.f32 %v10555_v49, %v6085_v35 }
 0x744   : > { %6226 = vst.msk [vmem:[%s8593_s17 + $0xe8] sm:$0xff] %vm6196_vm3, %v6193_v5  ;;  %v6162_v60 = vadd.f32 %v10561_v7, %v6123_v59  ;;  %v6163_v62 = vadd.f32 %v10561_v7, %v6124_v31 }
 0x746   : > { %v6194_v22 = vmax.f32 %v6162_v60, 0.0  ;;  %v6195_v47 = vmax.f32 %v6163_v62, 0.0 }
 0x748   : > { %6227 = vst.msk [vmem:[%s8593_s17 + $0xf0] sm:$0xff] %vm6196_vm3, %v6194_v22  ;;  %6228 = vst.msk [vmem:[%s8593_s17 + $0xf8] sm:$0xff] %vm6196_vm3, %v6195_v47 }
 0x749 PF: > { %s19_s24 = sadd.s32 1, %s8452_s24  }
 0x74a   : > { %p16_p10 = scmp.ge.s32.totalorder %s19_s24, 4  }
 0x74c   :  { %18 = sbr.rel (!%p16_p10) target bundleno = 2 (0x2), region = 95 }
 0x753   :  { %6250 = vsyncpa [#allocation5], 1 }
 0x754   :  { %6252 = vsyncpa [#allocation5 + $0x1], 1 }
 0x755   :  { %6253 = vsyncpa [#allocation7], 1 }

</bundles_post_ra>
